<compile_context>
chip_gen: v5e
topology: v5e:2x2
jax: 0.10.0
libtpu: 0.0.40
codegen_flags: <defaults>
</compile_context>

<pallas_src>
import math
import functools

import numpy as np
import jax
import jax.numpy as jnp
from jax.experimental import pallas as pl
from jax.experimental.pallas import tpu as pltpu

PATCH = 14                        # Depth-Anything patch size
TARGET = 518                      # resize target used by the wrapper
HIDDEN = 64                       # synthetic backbone width (real model: 384)
MLP_HIDDEN = 128
HEAD_OUT = PATCH * PATCH          # 196 per-patch depth values
HEAD_PAD = 256                    # lane-dense (multiple of 128) store width
D_PATCH = 3 * PATCH * PATCH       # 588 raw token width
D_PATCH_PAD = 640                 # 5 * 128, lane-dense token loads
TOKEN_TILE = 1024                 # tokens per fused-kernel grid step

IMAGENET_MEAN = np.array([0.485, 0.456, 0.406], dtype=np.float32)
IMAGENET_STD = np.array([0.229, 0.224, 0.225], dtype=np.float32)


# ----------------------------------------------------------------------------
# Host-side glue: interpolation weights / index tables (cached, built once).
# ----------------------------------------------------------------------------
def _cubic_coeffs(t, A=-0.75):
    def c1(x):
        return ((A + 2.0) * x - (A + 3.0)) * x * x + 1.0

    def c2(x):
        return ((A * x - 5.0 * A) * x + 8.0 * A) * x - 4.0 * A

    return [c2(t + 1.0), c1(t), c1(1.0 - t), c2(2.0 - t)]


def _bicubic_matrix_np(out_size, in_size):
    """(out, in) matrix reproducing torch F.interpolate bicubic, align_corners=True."""
    W = np.zeros((out_size, in_size), dtype=np.float64)
    if in_size == 1 or out_size == 1:
        W[:, 0] = 1.0
        return W.astype(np.float32)
    scale = (in_size - 1) / (out_size - 1)
    for o in range(out_size):
        src = o * scale
        f = int(np.floor(src))
        t = src - f
        ws = _cubic_coeffs(t)
        for k in range(4):
            idx = min(max(f - 1 + k, 0), in_size - 1)
            W[o, idx] += ws[k]
    return W.astype(np.float32)


@functools.lru_cache(maxsize=None)
def _row_resize_weights(out_size, in_size):
    # bf16 MXU operand; accumulation stays f32 inside the kernel.
    return jnp.asarray(_bicubic_matrix_np(out_size, in_size), dtype=jnp.bfloat16)   # (out, in)


@functools.lru_cache(maxsize=None)
def _col_resize_weights_t(out_size, in_size):
    return jnp.asarray(_bicubic_matrix_np(out_size, in_size).T, dtype=jnp.bfloat16)  # (in, out)


@functools.lru_cache(maxsize=None)
def _imagenet_affine():
    scale = (1.0 / IMAGENET_STD).astype(np.float32)
    shift = (-IMAGENET_MEAN / IMAGENET_STD).astype(np.float32)
    return jnp.asarray(scale), jnp.asarray(shift)


@functools.lru_cache(maxsize=None)
def _nearest_indices(out_size, in_size):
    """torch F.interpolate(mode='nearest') source index per output position."""
    scale = in_size / out_size
    return np.minimum(np.floor(np.arange(out_size) * scale), in_size - 1).astype(np.int32)


# ----------------------------------------------------------------------------
# Kernel 1: ImageNet normalization + bicubic(align_corners=True) resize.
# One full output plane per (n, c) grid step.  bf16 MXU operands, f32
# accumulation; the ImageNet affine is a single f32 FMA on the output
# (exactly equivalent because bicubic rows sum to 1), stored as bf16.
# ----------------------------------------------------------------------------
def _make_norm_resize_kernel(wh_first):
    def kernel(scale_ref, shift_ref, x_ref, wh_ref, wwt_ref, o_ref):
        c = pl.program_id(1)
        x = x_ref[...].astype(jnp.bfloat16)                                 # (hin, win)
        if wh_first:   # FLOP-minimizing when downsampling rows
            tmp = jnp.dot(wh_ref[...], x, preferred_element_type=jnp.float32)
            out = jnp.dot(tmp.astype(jnp.bfloat16), wwt_ref[...],
                          preferred_element_type=jnp.float32)
        else:          # FLOP-minimizing when upsampling (e.g. small demo input)
            tmp = jnp.dot(x, wwt_ref[...], preferred_element_type=jnp.float32)
            out = jnp.dot(wh_ref[...], tmp.astype(jnp.bfloat16),
                          preferred_element_type=jnp.float32)
        o_ref[...] = (out * scale_ref[c] + shift_ref[c]).astype(o_ref.dtype)
    return kernel


def normalize_and_resize(x, wh, ww_t, scale, shift):
    n, c, hin, win = x.shape
    hout = wh.shape[0]
    wout = ww_t.shape[1]

    # Choose matmul order at trace time (minimize MXU FLOPs).
    flops_wh_first = hout * hin * win + hout * win * wout
    flops_ww_first = hin * win * wout + hout * hin * wout
    wh_first = flops_wh_first <= flops_ww_first

    # TODO(synk): for 4K inputs on v7x, single-buffer the constant-index x /
    # ww_t blocks (pl.Buffered(1)) or switch to manual DMA to stay in 64 MiB.
    # TODO(synk): on v7x, use pltpu.CORE_PARALLEL on the leading axis for 2 TCs.
    return pl.pallas_call(
        _make_norm_resize_kernel(wh_first),
        out_shape=jax.ShapeDtypeStruct((n, c, hout, wout), jnp.bfloat16),
        grid=(n, c),
        in_specs=[
            pl.BlockSpec(memory_space=pltpu.MemorySpace.SMEM),             # scale (3,)
            pl.BlockSpec(memory_space=pltpu.MemorySpace.SMEM),             # shift (3,)
            pl.BlockSpec((pl.Squeezed(), pl.Squeezed(), hin, win),
                         lambda i, j: (i, j, 0, 0)),                       # full input plane
            pl.BlockSpec((hout, hin), lambda i, j: (0, 0)),                # full wh
            pl.BlockSpec((win, wout), lambda i, j: (0, 0)),                # full ww_t
        ],
        out_specs=pl.BlockSpec((pl.Squeezed(), pl.Squeezed(), hout, wout),
                               lambda i, j: (i, j, 0, 0)),                 # full output plane
        compiler_params=pltpu.CompilerParams(
            dimension_semantics=("parallel", "parallel"),
            vmem_limit_bytes=48 * 1024 * 1024),
    )(scale, shift, x, wh, ww_t)


# ----------------------------------------------------------------------------
# Kernel 2: fused token pipeline (patch embed -> residual MLP -> depth head).
# bf16 operands, f32 accumulation + f32 epilogue (bias/ReLU); bf16 stores.
# All intermediates stay on-chip; head output padded to 256 lanes.
# ----------------------------------------------------------------------------
def _token_pipeline_kernel(tok_ref, we_ref, be_ref, w1_ref, b1_ref,
                           w2_ref, b2_ref, wd_ref, bd_ref,
                           depth_ref, feat_ref=None):
    x = tok_ref[...]                                                       # (T, 640) bf16
    emb = jnp.dot(x, we_ref[...], preferred_element_type=jnp.float32) + be_ref[...]
    h = jnp.dot(emb.astype(jnp.bfloat16), w1_ref[...],
                preferred_element_type=jnp.float32) + b1_ref[...]
    h = jnp.maximum(h, 0.0)
    emb = emb + jnp.dot(h.astype(jnp.bfloat16), w2_ref[...],
                        preferred_element_type=jnp.float32) + b2_ref[...]
    d = jnp.dot(emb.astype(jnp.bfloat16), wd_ref[...],
                preferred_element_type=jnp.float32) + bd_ref[...]
    depth_ref[...] = jnp.maximum(d, 0.0).astype(depth_ref.dtype)           # ReLU >= 0 depth
    if feat_ref is not None:
        feat_ref[...] = emb.astype(feat_ref.dtype)


def token_pipeline(tok, params, *, return_features=False):
    m, d_patch = tok.shape
    assert m % TOKEN_TILE == 0
    grid = (m // TOKEN_TILE,)

    def full(shape):
        return pl.BlockSpec(shape, lambda i, _s=shape: (0,) * len(_s))

    in_specs = [
        pl.BlockSpec((TOKEN_TILE, d_patch), lambda i: (i, 0)),
        full((d_patch, HIDDEN)), full((1, HIDDEN)),
        full((HIDDEN, MLP_HIDDEN)), full((1, MLP_HIDDEN)),
        full((MLP_HIDDEN, HIDDEN)), full((1, HIDDEN)),
        full((HIDDEN, HEAD_PAD)), full((1, HEAD_PAD)),
    ]
    depth_spec = pl.BlockSpec((TOKEN_TILE, HEAD_PAD), lambda i: (i, 0))
    depth_shape = jax.ShapeDtypeStruct((m, HEAD_PAD), jnp.bfloat16)
    if return_features:
        out_shape = (depth_shape, jax.ShapeDtypeStruct((m, HIDDEN), jnp.bfloat16))
        out_specs = (depth_spec, pl.BlockSpec((TOKEN_TILE, HIDDEN), lambda i: (i, 0)))
    else:
        out_shape = depth_shape
        out_specs = depth_spec

    return pl.pallas_call(
        _token_pipeline_kernel,
        out_shape=out_shape,
        grid=grid,
        in_specs=in_specs,
        out_specs=out_specs,
        compiler_params=pltpu.CompilerParams(dimension_semantics=("parallel",)),
    )(tok, params["w_embed"], params["b_embed"],
      params["w_mlp1"], params["b_mlp1"],
      params["w_mlp2"], params["b_mlp2"],
      params["w_head"], params["b_head"])


# ----------------------------------------------------------------------------
# Synthetic "Depth-Anything" parameters (deterministic init, no checkpoint).
# Token-path weights are bf16; biases f32; embed rows padded to 640, head
# padded to 256 lanes.
# ----------------------------------------------------------------------------
def init_params(seed=0):
    key = jax.random.PRNGKey(seed)
    ks = jax.random.split(key, 4)
    w_embed = 0.02 * jax.random.normal(ks[0], (D_PATCH, HIDDEN), jnp.float32)
    w_embed = jnp.pad(w_embed, ((0, D_PATCH_PAD - D_PATCH), (0, 0)))      # zero rows for padded lanes
    w_mlp1 = 0.02 * jax.random.normal(ks[1], (HIDDEN, MLP_HIDDEN), jnp.float32)
    w_mlp2 = 0.02 * jax.random.normal(ks[2], (MLP_HIDDEN, HIDDEN), jnp.float32)
    w_head = 0.02 * jax.random.normal(ks[3], (HIDDEN, HEAD_OUT), jnp.float32)
    b_head = 0.01 * jnp.ones((HEAD_OUT,), jnp.float32)
    pad = HEAD_PAD - HEAD_OUT
    return {
        "w_embed": w_embed.astype(jnp.bfloat16),
        "b_embed": jnp.zeros((1, HIDDEN), jnp.float32),
        "w_mlp1": w_mlp1.astype(jnp.bfloat16),
        "b_mlp1": jnp.zeros((1, MLP_HIDDEN), jnp.float32),
        "w_mlp2": w_mlp2.astype(jnp.bfloat16),
        "b_mlp2": jnp.zeros((1, HIDDEN), jnp.float32),
        "w_head": jnp.pad(w_head, ((0, 0), (0, pad))).astype(jnp.bfloat16),
        "b_head": jnp.pad(b_head, (0, pad)).reshape(1, HEAD_PAD),
    }


# ----------------------------------------------------------------------------
# Forward pass (mirrors DepthAnythingWrapper.forward)
# ----------------------------------------------------------------------------
def depth_anything_forward(x, params, return_features=False):
    n, c, h, w = x.shape
    assert c == 3, "wrapper normalization assumes 3-channel RGB input"

    # resize target, identical rule to the PyTorch wrapper
    if h < w:
        size = (TARGET, math.ceil(w * TARGET / h / PATCH) * PATCH)
    else:
        size = (math.ceil(h * TARGET / w / PATCH) * PATCH, TARGET)
    hh, ww = size

    # normalization + bicubic(align_corners=True) resize -> Pallas kernel (bf16 out)
    wh = _row_resize_weights(hh, h)             # (hh, h)  bf16
    ww_t = _col_resize_weights_t(ww, w)         # (w, ww)  bf16
    scale, shift = _imagenet_affine()
    pix = normalize_and_resize(x, wh, ww_t, scale, shift)        # (n, 3, hh, ww) bf16

    # Patchify (layout glue; already bf16 so transpose traffic is halved).
    # TODO(synk): fold patchify into the token kernel via PATCH-row-strip BlockSpecs.
    ph, pw = hh // PATCH, ww // PATCH
    tok = pix.reshape(n, 3, ph, PATCH, pw, PATCH)
    tok = tok.transpose(0, 2, 4, 1, 3, 5).reshape(n * ph * pw, D_PATCH)
    ntok = tok.shape[0]
    ntok_pad = ((ntok + TOKEN_TILE - 1) // TOKEN_TILE) * TOKEN_TILE
    tok = jnp.pad(tok, ((0, ntok_pad - ntok), (0, D_PATCH_PAD - D_PATCH)))

    # Fused synthetic backbone + neck + DPT head (single Pallas kernel).
    outs = token_pipeline(tok, params, return_features=return_features)
    if return_features:
        depth_pad, feat_pad = outs
    else:
        depth_pad = outs

    # Drop token-row padding and the 196->256 head-lane padding, unpatchify to
    # a dense (n, hh, ww) depth image with a cheap transpose/reshape.
    depth_tok = depth_pad[:ntok, :HEAD_OUT].reshape(n, ph, pw, PATCH, PATCH)
    depth_img = depth_tok.transpose(0, 1, 3, 2, 4).reshape(n, hh, ww)      # bf16

    # F.interpolate(..., size=(h, w), mode='nearest') as two per-axis
    # static-index takes (contiguous, lane-dense) instead of a 2-D fancy gather.
    # TODO(synk): per-axis gathers stay in XLA; Pallas TPU has no clean general
    # 2-D gather primitive.
    ri = _nearest_indices(h, hh)
    ci = _nearest_indices(w, ww)
    pred = jnp.take(depth_img, ri, axis=1)
    pred = jnp.take(pred, ci, axis=2)
    prediction = pred[:, None, :, :].astype(jnp.float32)                   # (n, 1, h, w)

    if not return_features:
        return [prediction]
    features = feat_pad[:ntok].astype(jnp.float32)
    features = features.reshape(n, ph, pw, HIDDEN).transpose(0, 3, 1, 2)
    return [prediction], features


if __name__ == "__main__":
    key = jax.random.PRNGKey(0)
    N, C, H, W = 2, 3, 16, 16
    x = jax.random.uniform(key, (N, C, H, W), dtype=jnp.float32)

    params = init_params(seed=0)
    out = depth_anything_forward(x, params, return_features=False)
    pred = jax.block_until_ready(out[0])

    assert pred.shape == (N, 1, H, W), pred.shape
    assert bool(jnp.all(jnp.isfinite(pred)))
    print("KERNEL_OK")
</pallas_src>

<mosaic_0001>
module attributes {stable_mosaic.version = 11 : i64} {
  func.func @kernel(%arg0: i32, %arg1: i32, %arg2: memref<3xf32, #tpu.memory_space<smem>>, %arg3: memref<3xf32, #tpu.memory_space<smem>>, %arg4: memref<1x1x16x16xf32, #tpu.memory_space<vmem>>, %arg5: memref<518x16xbf16, #tpu.memory_space<vmem>>, %arg6: memref<16x518xbf16, #tpu.memory_space<vmem>>, %arg7: memref<1x1x518x518xbf16, #tpu.memory_space<vmem>>) attributes {dimension_semantics = [#tpu.dimension_semantics<parallel>, #tpu.dimension_semantics<parallel>], iteration_bounds = array<i64: 2, 3>, scalar_prefetch = 0 : i64, scratch_operands = 0 : i64, tpu.core_type = #tpu.core_type<tc>, window_params = [{transform_indices = @transform_0, window_bounds = array<i64: 3>}, {transform_indices = @transform_1, window_bounds = array<i64: 3>}, {transform_indices = @transform_2, window_bounds = array<i64: 1, 1, 16, 16>}, {pipeline_mode = #tpu.pipeline_mode<synchronous>, transform_indices = @transform_3, window_bounds = array<i64: 518, 16>}, {pipeline_mode = #tpu.pipeline_mode<synchronous>, transform_indices = @transform_4, window_bounds = array<i64: 16, 518>}, {transform_indices = @transform_5, window_bounds = array<i64: 1, 1, 518, 518>}]} {
    %c0 = arith.constant 0 : index
    %c0_0 = arith.constant 0 : index
    %c0_1 = arith.constant 0 : index
    %c0_2 = arith.constant 0 : index
    %0 = vector.load %arg4[%c0, %c0_0, %c0_1, %c0_2] : memref<1x1x16x16xf32, #tpu.memory_space<vmem>>, vector<1x1x16x16xf32>
    %1 = vector.shape_cast %0 : vector<1x1x16x16xf32> to vector<16x16xf32>
    %2 = arith.truncf %1 : vector<16x16xf32> to vector<16x16xbf16>
    %c0_3 = arith.constant 0 : index
    %c0_4 = arith.constant 0 : index
    %3 = vector.load %arg5[%c0_3, %c0_4] : memref<518x16xbf16, #tpu.memory_space<vmem>>, vector<518x16xbf16>
    %cst = arith.constant dense<0.000000e+00> : vector<518x16xf32>
    %4 = tpu.matmul %3, %2, %cst {dimension_numbers = #tpu.dot_dimension_numbers<[1], [0], [0], [1], [0, 0, 1, 1], [], []>} : vector<518x16xbf16>, vector<16x16xbf16>, vector<518x16xf32> -> vector<518x16xf32>
    %5 = arith.truncf %4 : vector<518x16xf32> to vector<518x16xbf16>
    %c0_5 = arith.constant 0 : index
    %c0_6 = arith.constant 0 : index
    %6 = vector.load %arg6[%c0_5, %c0_6] : memref<16x518xbf16, #tpu.memory_space<vmem>>, vector<16x518xbf16>
    %cst_7 = arith.constant dense<0.000000e+00> : vector<518x518xf32>
    %7 = tpu.matmul %5, %6, %cst_7 {dimension_numbers = #tpu.dot_dimension_numbers<[1], [0], [0], [1], [0, 0, 1, 1], [], []>} : vector<518x16xbf16>, vector<16x518xbf16>, vector<518x518xf32> -> vector<518x518xf32>
    %8 = arith.index_cast %arg1 : i32 to index
    %9 = memref.load %arg2[%8] : memref<3xf32, #tpu.memory_space<smem>>
    %10 = vector.broadcast %9 : f32 to vector<518x518xf32>
    %11 = arith.mulf %7, %10 : vector<518x518xf32>
    %12 = arith.index_cast %arg1 : i32 to index
    %13 = memref.load %arg3[%12] : memref<3xf32, #tpu.memory_space<smem>>
    %14 = vector.broadcast %13 : f32 to vector<518x518xf32>
    %15 = arith.addf %11, %14 : vector<518x518xf32>
    %16 = arith.truncf %15 : vector<518x518xf32> to vector<518x518xbf16>
    %c0_8 = arith.constant 0 : index
    %c0_9 = arith.constant 0 : index
    %c0_10 = arith.constant 0 : index
    %c0_11 = arith.constant 0 : index
    %17 = vector.load %arg7[%c0_8, %c0_9, %c0_10, %c0_11] : memref<1x1x518x518xbf16, #tpu.memory_space<vmem>>, vector<1x1x518x518xbf16>
    %18 = vector.shape_cast %17 : vector<1x1x518x518xbf16> to vector<518x518xbf16>
    %19 = vector.shape_cast %16 : vector<518x518xbf16> to vector<1x1x518x518xbf16>
    tpu.vector_store %arg7[%c0_8, %c0_9, %c0_10, %c0_11], %19 {strides = array<i32>} : memref<1x1x518x518xbf16, #tpu.memory_space<vmem>>, vector<1x1x518x518xbf16>,
    return
  }
  func.func @transform_0(%arg0: i32, %arg1: i32) -> i32 {
    %c0_i32 = arith.constant 0 : i32
    %c0_i32_0 = arith.constant 0 : i32
    return %c0_i32 : i32
  }
  func.func @transform_1(%arg0: i32, %arg1: i32) -> i32 {
    %c0_i32 = arith.constant 0 : i32
    %c0_i32_0 = arith.constant 0 : i32
    return %c0_i32 : i32
  }
  func.func @transform_2(%arg0: i32, %arg1: i32) -> (i32, i32, i32, i32) {
    %c0_i32 = arith.constant 0 : i32
    %c0_i32_0 = arith.constant 0 : i32
    %c0_i32_1 = arith.constant 0 : i32
    return %arg0, %arg1, %c0_i32, %c0_i32_0 : i32, i32, i32, i32
  }
  func.func @transform_3(%arg0: i32, %arg1: i32) -> (i32, i32) {
    %c0_i32 = arith.constant 0 : i32
    %c0_i32_0 = arith.constant 0 : i32
    %c0_i32_1 = arith.constant 0 : i32
    return %c0_i32, %c0_i32_0 : i32, i32
  }
  func.func @transform_4(%arg0: i32, %arg1: i32) -> (i32, i32) {
    %c0_i32 = arith.constant 0 : i32
    %c0_i32_0 = arith.constant 0 : i32
    %c0_i32_1 = arith.constant 0 : i32
    return %c0_i32, %c0_i32_0 : i32, i32
  }
  func.func @transform_5(%arg0: i32, %arg1: i32) -> (i32, i32, i32, i32) {
    %c0_i32 = arith.constant 0 : i32
    %c0_i32_0 = arith.constant 0 : i32
    %c0_i32_1 = arith.constant 0 : i32
    return %arg0, %arg1, %c0_i32, %c0_i32_0 : i32, i32, i32, i32
  }
}

</mosaic_0001>

<bundles_post_ra>
// kernel: tpu_custom_call.1
= control target key start
LH: loop header
LB: loop body
LE: loop exit
PB: predicated region body
PF: predicated region fallthrough
CT: control target
= control target key end

     0   :  { %s5728_s0 = inlined_call_operand.hbm [shape: f32[3], index: 0, kind: input, shape index: {}]   ;;  %s5729_s1 = inlined_call_operand.hbm [shape: f32[3], index: 1, kind: input, shape index: {}]   ;;  %s5730_s2 = inlined_call_operand.hbm [shape: f32[2,3,16,16], index: 2, kind: input, shape index: {}]   ;;  %s5731_s3 = inlined_call_operand.vmem [shape: bf16[518,16], index: 3, kind: input, shape index: {}]   ;;  %s5732_s4 = inlined_call_operand.hbm [shape: bf16[16,518], index: 4, kind: input, shape index: {}]   ;;  %s5733_s5 = inlined_call_operand.vmem [shape: bf16[2,3,518,518], index: 5, kind: output, shape index: {}]  }
   0x1   :  { %5753 = sst [smem:[#allocation56_spill]] %s5728_s0 }
   0x2   :  { %5754 = sst [smem:[#allocation57_spill]] %s5729_s1 }
   0x3   :  { %5755 = sst [smem:[#allocation58_spill]] %s5732_s4 }
   0x4   :  { %10 = vsyncpa [#allocation4], 0 }
   0x5   :  { %11 = vsyncpa [#allocation6], 0 }
   0x6   :  { %12 = vsyncpa [#allocation3], 0 }
   0x7   :  { %14 = vsyncpa [#allocation3 + $0x1], 0 }
   0x8   :  { %15 = vsyncpa [#allocation9], 0  ;;  %s3749_s18 = smov 0   ;;  %s3751_s19 = smov 0  }
   0x9   :  { %s3753_s20 = smov 0   ;;  %s3755_s21 = smov 0  }
   0xa   :  { %s3757_s22 = smov 0   ;;  %s3759_s23 = smov 0  }
   0xb   :  { %s3761_s24 = smov 0   ;;  %s3763_s25 = smov 0  }
   0xc LB: > { %5756 = sst [smem:[#allocation14_spill]] %s3710_s25  ;;  %s3030_s26 = sadd.s32 4294967295, %s3710_s25   ;;  %s3710_s25 = sphi %s3763_s25, %s21_s25   ;;  %s3706_s24 = sphi %s3761_s24, %s5852_s24   ;;  %s3702_s23 = sphi %s3759_s23, %s5851_s23   ;;  %s3698_s22 = sphi %s3757_s22, %s5850_s22   ;;  %s3694_s21 = sphi %s3755_s21, %s5849_s21   ;;  %s3690_s20 = sphi %s3753_s20, %s5848_s20   ;;  %s3686_s19 = sphi %s3751_s19, %s5847_s19   ;;  %s3682_s18 = sphi %s3749_s18, %s5846_s18  }
   0xd   : > { %p97_p0 = scmp.ne.s32.totalorder %s3686_s19, %s3682_s18  ;;  %p3789_p1 = scmp.eq.s32.totalorder %s3030_s26, 0 }
   0xe   : > { %p3032_p2 = scmp.ge.s32.totalorder %s3710_s25, 1  ;;  %p178_p3 = scmp.lt.s32.totalorder %s3710_s25, 7 }
   0xf   : > { %p3797_p4 = por %p3789_p1, %p97_p0  ;;  %s5759_s0 = sld [smem:[#allocation56_spill]] }
  0x10   : > { %p3804_p5 = pnand %p3032_p2, %p178_p3  ;;  %s5761_s1 = sld [smem:[#allocation57_spill]] }
  0x11   : > { %s5762_s4 = sld [smem:[#allocation58_spill]]  ;;  %s3712_s14 = smov [#allocation8]  }
  0x12   : > { %p3450_p6 = pneg %p3804_p5  ;;  %s214_s15 = sshll.u32 %s3712_s14, 4  ;;  %s215_s15 = int_to_ptr.vmem [resolvable:$true] %s214_s15 }
  0x13   : > { %s3713_s16 = smov [#allocation2]   ;;  %s3714_s17 = smov [#allocation5]  }
  0x14   : > { %p3451_p7 = pnand %p3450_p6, %p3789_p1  ;;  %s3715_s18 = smov 320  }
  0x15   : > { %s190_s6 = sshll.u32 %s5759_s0, 4  ;;  %s3716_s26 = smov 20   ;;  %s191_s6 = int_to_ptr.hbm [resolvable:$true] %s190_s6 }
  0x16   : > { %s200_s10 = sshll.u32 %s5761_s1, 4  ;;  %s30_s29 = sadd.s32 1, %s3702_s23  ;;  %s201_s10 = int_to_ptr.hbm [resolvable:$true] %s200_s10 }
  0x17   : > { %s212_s13 = sshll.u32 %s5762_s4, 4  ;;  %p31_p8 = scmp.ge.s32.totalorder %s30_s29, 3  ;;  %s213_s13 = int_to_ptr.hbm [resolvable:$true] %s212_s13 }
  0x18   : > { %3453 = dma.hbm_to_smem (!%p3451_p7), %s191_s6, 16, %s3713_s16, [#allocation4]  }
  0x19   : > { %3456 = dma.hbm_to_smem (!%p3451_p7), %s201_s10, 16, %s3714_s17, [#allocation6]  }
  0x1a   : > { %3459 = dma.hbm_to_vmem [thread:$0]  (!%p3451_p7), %s213_s13, 640, %s215_s15, [#allocation9], %s3715_s18, %s3715_s18, %s3716_s26  }
  0x1b   : > { %s33_s30 = sadd.s32 1, %s3706_s24  ;;  %s84_s8 = sadd.s32 1, %s3690_s20 }
  0x1c   : > { %p91_p9 = scmp.ne.s32.totalorder %s3690_s20, %s3686_s19  ;;  %s5854_s29 = smov (%p31_p8, %s30_s29), 0 }
  0x1d   : > { %5763 = sst [smem:[#allocation15_spill]] %s5854_s29  ;;  %s5856_s30 = smov (!%p31_p8, %s33_s30), %s3706_s24 }
  0x1e   : > { %s80_s6 = ssub.s32 %s3702_s23, %s5854_s29  ;;  %p92_p10 = scmp.eq.s32.totalorder %s3710_s25, 0 }
  0x1f   : > { %p35_p11 = scmp.ge.s32.totalorder %s5856_s30, 2  ;;  %p3467_p12 = scmp.lt.s32.totalorder %s3710_s25, 6 }
  0x20   : > { %p93_p13 = por %p92_p10, %p91_p9  ;;  %s228_s9 = sand.u32 1, %s3690_s20  }
  0x21   : > { %s5858_s30 = smov (%p35_p11, %s5856_s30), 0  ;;  %s3037_s10 = sshll.u32 %s228_s9, 4 }
  0x22   : > { %5764 = sst [smem:[#allocation16_spill]] %s5858_s30  ;;  %s79_s11 = ssub.s32 %s3706_s24, %s5858_s30 }
  0x23   : > { %s81_s12 = sor.u32 %s80_s6, %s79_s11  ;;  %s3038_s13 = sshll.u32 %s3702_s23, 1 }
  0x24   : > { %p82_p0 = scmp.eq.s32.totalorder %s81_s12, 0  ;;  %s3433_s14 = smul.u32 6, %s3706_s24 }
  0x25   : > { %s232_s15 = scalar_lea.vmem [#allocation7], %s3037_s10  ;;  %p3461_p2 = pnand %p3467_p12, %p93_p13 }
  0x26   : > { %s242_s16 = sshll.u32 %s232_s15, 4  ;;  %s237_s18 = sadd.s32 %s3433_s14, %s3038_s13  ;;  %s243_s16 = int_to_ptr.vmem [resolvable:$true] %s242_s16 }
  0x27   : > { %s3838_s17 = scalar_select %p82_p0, %s3690_s20, %s84_s8  }
  0x28   : > { %s3039_s26 = sshll.u32 %s237_s18, 3  ;;  %s229_s25 = scalar_lea.sflag [#allocation3], %s228_s9 }
  0x29   : > { %s239_s4 = scalar_lea.hbm %s5730_s2, %s3039_s26  ;;  %s3717_s30 = smov 128  }
  0x2a   : > { %s240_s29 = sshll.u32 %s239_s4, 4  ;;  %s3718_s6 = smov 8   ;;  %s241_s29 = int_to_ptr.hbm [resolvable:$true] %s240_s29 }
  0x2b   : > { %3463 = dma.hbm_to_vmem [thread:$0]  (!%p3461_p2), %s241_s29, 256, %s243_s16, %s229_s25, %s3717_s30, %s3717_s30, %s3718_s6  }
  0x2c   : > { %254 = sbr.rel (%p3804_p5) target bundleno = 1120 (0x460), region = 40 }
  0x31   : > { %3665 = dma.done.wait (%p3789_p1), [#allocation4], 16  }
  0x32   : > { %3667 = vsyncadd (%p3789_p1), [#allocation4], 4294967280 }
  0x33   : > { %3669 = dma.done.wait (%p3789_p1), [#allocation6], 16  }
  0x34   : > { %3671 = vsyncadd (%p3789_p1), [#allocation6], 4294967280  ;;  %s266_s0 = sand.u32 1, %s3686_s19  }
  0x35   : > { %s3043_s1 = sshll.u32 %s266_s0, 4  ;;  %s267_s4 = scalar_lea.sflag [#allocation3], %s266_s0 }
  0x36   : > { %s270_s25 = scalar_lea.vmem [#allocation7], %s3043_s1 }
  0x37   : > { %3673 = dma.done.wait (%p3797_p4), %s267_s4, 256  }
  0x38   : > { %3675 = vsyncadd (%p3797_p4), %s267_s4, 4294967040 }
  0x39   : > { %3677 = dma.done.wait (%p3789_p1), [#allocation9], 640  }
  0x3a   : > { %3679 = vsyncadd (%p3789_p1), [#allocation9], 4294966656 }
  0x3b   : > { %281 = sfence }
  0x3c   : > { %v318_v0 = vld [vmem:[%s270_s25] sm:$0xff]  ;;  %v319_v1 = vld [vmem:[%s270_s25 + $0x8] sm:$0xff]  ;;  %vm549_vm0 = vcmask 130048   ;;  %p308_p1 = scmp.lt.s32.totalorder %s3698_s22, 1  ;;  %p310_p3 = scmp.lt.s32.totalorder %s3694_s21, 2  ;;  %vm2702_vm1 = vcmask 44032  }
  0x3d   : > { %v320_v2 = vpack.c.bf16 %v319_v1, %v318_v0  ;;  %v3394_v3 = vld [vmem:[%s5731_s3] sm:$0xff]  ;;  %v3411_v4 = vld [vmem:[%s5731_s3 + $0x88] sm:$0xff]  ;;  %v3412_v6 = vld [vmem:[%s5731_s3 + $0x90] sm:$0xff]  ;;  %s1851_s8 = sld [smem:[#allocation2 + %s3694_s21]]  ;;  %vm2895_vm2 = vcmask 43008  }
  0x3e   : > { %v3395_v5 = vld [vmem:[%s5731_s3 + $0x8] sm:$0xff]  ;;  %v3396_v7 = vld [vmem:[%s5731_s3 + $0x10] sm:$0xff]  ;;  %v3413_v8 = vld [vmem:[%s5731_s3 + $0x98] sm:$0xff]  ;;  %s5860_s22 = smov (!%p308_p1, %s3698_s22), 1  ;;  %s2178_s28 = sld [smem:[#allocation5 + %s3694_s21]] }
  0x3f   : > { %656 = vmatpush.bf16.msra.mxu0 %v320_v2  ;;  %3431 = vmatpush.bf16.msra.mxu2 %v320_v2  ;;  %v3397_v9 = vld [vmem:[%s5731_s3 + $0x18] sm:$0xff]  ;;  %v3414_v10 = vld [vmem:[%s5731_s3 + $0xa0] sm:$0xff]  ;;  %v3415_v12 = vld [vmem:[%s5731_s3 + $0xa8] sm:$0xff]  ;;  %s311_s27 = scalar_select %p310_p3, %s3694_s21, 2 }
  0x40   : > { %v3398_v11 = vld [vmem:[%s5731_s3 + $0x20] sm:$0xff]  ;;  %v3399_v13 = vld [vmem:[%s5731_s3 + $0x28] sm:$0xff]  ;;  %v3416_v14 = vld [vmem:[%s5731_s3 + $0xb0] sm:$0xff]  ;;  %s3435_s9 = smul.u32 975, %s5860_s22 }
  0x41   : > { %v3400_v15 = vld [vmem:[%s5731_s3 + $0x30] sm:$0xff]  ;;  %v3417_v16 = vld [vmem:[%s5731_s3 + $0xb8] sm:$0xff]  ;;  %v3209_v17 = vld [vmem:[#allocation8] sm:$0xf]  ;;  %s3434_s10 = smul.u32 325, %s311_s27 }
  0x42   : > { %3174 = vmatmul.msk.bf16.vlgmr.msra.gmra.mxu0 %vm549_vm0, %v3394_v3  ;;  %3191 = vmatmul.msk.bf16.vlgmr.msra.gmra.mxu2 %vm549_vm0, %v3411_v4  ;;  %v3428_v18 = vld [vmem:[#allocation8 + $0x10] sm:$0xf0]  ;;  %v3427_v20 = vld [vmem:[#allocation8 + $0xc] sm:$0xf]  ;;  %v3219_v21 = vld [vmem:[#allocation8 + $0x1c] sm:$0xf0] }
  0x43   : > { %v3210_v19 = vor.u32 %v3428_v18, %v3209_v17  ;;  %v3225_v22 = vld [vmem:[#allocation8 + $0x10] sm:$0xf]  ;;  %v3222_v23 = vor.u32 %v3427_v20, %v3219_v21  ;;  %v3430_v24 = vld [vmem:[#allocation8 + $0x20] sm:$0xf0]  ;;  %v3401_v26 = vld [vmem:[%s5731_s3 + $0x38] sm:$0xff]  ;;  %s314_s21 = sadd.s32 %s3435_s9, %s3434_s10 }
  0x44   : > { %v3226_v25 = vor.u32 %v3430_v24, %v3225_v22  ;;  %v3418_v27 = vld [vmem:[%s5731_s3 + $0xc0] sm:$0xff]  ;;  %v3211_v29 = vld [vmem:[#allocation8 + $0x14] sm:$0xf0]  ;;  %v3217_v30 = vld [vmem:[#allocation8 + $0x8] sm:$0xf]  ;;  %s3045_s22 = sshll.u32 %s314_s21, 2 }
  0x45   : > { %993 = vmatpush.bf16.msra.mxu1 %v3210_v19  ;;  %3432 = vmatpush.bf16.msra.mxu3 %v3210_v19  ;;  %v3426_v28 = vld [vmem:[#allocation8 + $0x4] sm:$0xf]  ;;  %v3429_v32 = vld [vmem:[#allocation8 + $0x18] sm:$0xf0]  ;;  %v3419_v35 = vld [vmem:[%s5731_s3 + $0xc8] sm:$0xff]  ;;  %s4240_s13 = scalar_lea.vmem %s5733_s5, %s3045_s22 }
  0x46   : > { %1512 = vmatpush.bf16.msrb.mxu0 %v3222_v23  ;;  %v3214_v31 = vor.u32 %v3426_v28, %v3211_v29  ;;  %v3218_v33 = vor.u32 %v3429_v32, %v3217_v30  ;;  %v3402_v34 = vld [vmem:[%s5731_s3 + $0x40] sm:$0xff]  ;;  %v3403_v42 = vld [vmem:[%s5731_s3 + $0x48] sm:$0xff]  ;;  %v3420_v43 = vld [vmem:[%s5731_s3 + $0xd0] sm:$0xff] }
  0x47   : > { %v3404_v50 = vld [vmem:[%s5731_s3 + $0x50] sm:$0xff]  ;;  %v3421_v51 = vld [vmem:[%s5731_s3 + $0xd8] sm:$0xff]  ;;  %v3422_v59 = vld [vmem:[%s5731_s3 + $0xe0] sm:$0xff] }
  0x48   : > { %1166 = vmatpush.bf16.msrb.mxu2 %v3214_v31  ;;  %v3405_v58 = vld [vmem:[%s5731_s3 + $0x58] sm:$0xff]  ;;  %v3406_v2 = vld [vmem:[%s5731_s3 + $0x60] sm:$0xff]  ;;  %v3423_v3 = vld [vmem:[%s5731_s3 + $0xe8] sm:$0xff] }
  0x49   : > { %1685 = vmatpush.bf16.msrb.mxu1 %v3226_v25  ;;  %1339 = vmatpush.bf16.msrb.mxu3 %v3218_v33  ;;  %v3408_v18 = vld [vmem:[%s5731_s3 + $0x70] sm:$0xff]  ;;  %v3425_v19 = vld [vmem:[%s5731_s3 + $0xf8] sm:$0xff]  ;;  %v385_v23 = vld [vmem:[%s5731_s3 + $0x100] sm:$0x7] }
  0x4a   : > { %v515_v25 = vunpack.c.l.b16 %v385_v23  ;;  %v3409_v28 = vld [vmem:[%s5731_s3 + $0x78] sm:$0xff] }
  0x4c   : > { %v548_v29 = vpack.c.b16 %v515_v25, %v515_v25 }
  0x52   : > { %3175 = vmatmul.msk.bf16.gmra.mxu0 %vm549_vm0, %v3395_v5  ;;  %3192 = vmatmul.msk.bf16.gmra.mxu2 %vm549_vm0, %v3412_v6 }
  0x62   : > { %3176 = vmatmul.msk.bf16.gmra.mxu0 %vm549_vm0, %v3396_v7  ;;  %3193 = vmatmul.msk.bf16.gmra.mxu2 %vm549_vm0, %v3413_v8 }
  0x72   : > { %3177 = vmatmul.msk.bf16.gmra.mxu0 %vm549_vm0, %v3397_v9  ;;  %3194 = vmatmul.msk.bf16.gmra.mxu2 %vm549_vm0, %v3414_v10  ;;  %v3407_v10 = vld [vmem:[%s5731_s3 + $0x68] sm:$0xff] }
  0x82   : > { %3178 = vmatmul.msk.bf16.gmra.mxu0 %vm549_vm0, %v3398_v11  ;;  %3195 = vmatmul.msk.bf16.gmra.mxu2 %vm549_vm0, %v3415_v12  ;;  %v3424_v11 = vld [vmem:[%s5731_s3 + $0xf0] sm:$0xff] }
  0x92   : > { %3179 = vmatmul.msk.bf16.gmra.mxu0 %vm549_vm0, %v3399_v13  ;;  %3196 = vmatmul.msk.bf16.gmra.mxu2 %vm549_vm0, %v3416_v14 }
  0xa2   : > { %3180 = vmatmul.msk.bf16.gmra.mxu0 %vm549_vm0, %v3400_v15  ;;  %3197 = vmatmul.msk.bf16.gmra.mxu2 %vm549_vm0, %v3417_v16 }
  0xb2   : > { %3181 = vmatmul.msk.bf16.gmra.mxu0 %vm549_vm0, %v3401_v26  ;;  %3198 = vmatmul.msk.bf16.gmra.mxu2 %vm549_vm0, %v3418_v27 }
  0xbf   : > { %v658_v36 = vpop.f32.mrf.mxu0 }
  0xc2   : > { %3182 = vmatmul.msk.bf16.gmra.mxu0 %vm549_vm0, %v3402_v34  ;;  %3199 = vmatmul.msk.bf16.gmra.mxu2 %vm549_vm0, %v3419_v35 }
  0xc5   : > { %v743_v37 = vpop.f32.mrf.mxu2 }
  0xc7   : > { %v660_v38 = vpop.f32.mrf.mxu0 }
  0xc8   : > { %v3934_v39 = vpack.c.bf16 %v660_v38, %v658_v36  ;;  %v3410_v36 = vld [vmem:[%s5731_s3 + $0x80] sm:$0xff] }
  0xca   : > { %3227 = vmatmul.msk.bf16.vlgmr.msra.gmra.mxu1 %vm549_vm0, %v3934_v39 }
  0xcd   : > { %v745_v40 = vpop.f32.mrf.mxu2 }
  0xce   : > { %v3938_v41 = vpack.c.bf16 %v745_v40, %v743_v37 }
  0xcf   : > { %v663_v44 = vpop.f32.mrf.mxu0 }
  0xd0   : > { %3244 = vmatmul.msk.bf16.vlgmr.msra.gmra.mxu3 %vm549_vm0, %v3938_v41 }
  0xd2   : > { %3183 = vmatmul.msk.bf16.gmra.mxu0 %vm549_vm0, %v3403_v42  ;;  %3200 = vmatmul.msk.bf16.gmra.mxu2 %vm549_vm0, %v3420_v43 }
  0xd5   : > { %v748_v45 = vpop.f32.mrf.mxu2 }
  0xd7   : > { %v665_v46 = vpop.f32.mrf.mxu0 }
  0xd8   : > { %v3950_v47 = vpack.c.bf16 %v665_v46, %v663_v44 }
  0xda   : > { %3228 = vmatmul.msk.bf16.gmra.mxu1 %vm549_vm0, %v3950_v47 }
  0xdd   : > { %v750_v48 = vpop.f32.mrf.mxu2 }
  0xde   : > { %v3954_v49 = vpack.c.bf16 %v750_v48, %v748_v45 }
  0xdf   : > { %v668_v52 = vpop.f32.mrf.mxu0 }
  0xe0   : > { %3245 = vmatmul.msk.bf16.gmra.mxu3 %vm549_vm0, %v3954_v49 }
  0xe2   : > { %3184 = vmatmul.msk.bf16.gmra.mxu0 %vm549_vm0, %v3404_v50  ;;  %3201 = vmatmul.msk.bf16.gmra.mxu2 %vm549_vm0, %v3421_v51 }
  0xe5   : > { %v753_v53 = vpop.f32.mrf.mxu2 }
  0xe7   : > { %v670_v54 = vpop.f32.mrf.mxu0 }
  0xe8   : > { %v3966_v55 = vpack.c.bf16 %v670_v54, %v668_v52 }
  0xea   : > { %3229 = vmatmul.msk.bf16.gmra.mxu1 %vm549_vm0, %v3966_v55 }
  0xed   : > { %v755_v56 = vpop.f32.mrf.mxu2 }
  0xee   : > { %v3970_v57 = vpack.c.bf16 %v755_v56, %v753_v53 }
  0xef   : > { %v673_v60 = vpop.f32.mrf.mxu0 }
  0xf0   : > { %3246 = vmatmul.msk.bf16.gmra.mxu3 %vm549_vm0, %v3970_v57 }
  0xf2   : > { %3185 = vmatmul.msk.bf16.gmra.mxu0 %vm549_vm0, %v3405_v58  ;;  %3202 = vmatmul.msk.bf16.gmra.mxu2 %vm549_vm0, %v3422_v59 }
  0xf5   : > { %v758_v61 = vpop.f32.mrf.mxu2 }
  0xf7   : > { %v675_v62 = vpop.f32.mrf.mxu0 }
  0xf8   : > { %v3982_v63 = vpack.c.bf16 %v675_v62, %v673_v60 }
  0xfa   : > { %3230 = vmatmul.msk.bf16.gmra.mxu1 %vm549_vm0, %v3982_v63 }
  0xfd   : > { %v760_v0 = vpop.f32.mrf.mxu2 }
  0xfe   : > { %v3986_v1 = vpack.c.bf16 %v760_v0, %v758_v61 }
  0xff   : > { %v678_v4 = vpop.f32.mrf.mxu0 }
 0x100   : > { %3247 = vmatmul.msk.bf16.gmra.mxu3 %vm549_vm0, %v3986_v1 }
 0x102   : > { %3186 = vmatmul.msk.bf16.gmra.mxu0 %vm549_vm0, %v3406_v2  ;;  %3203 = vmatmul.msk.bf16.gmra.mxu2 %vm549_vm0, %v3423_v3 }
 0x105   : > { %v763_v5 = vpop.f32.mrf.mxu2 }
 0x107   : > { %v680_v6 = vpop.f32.mrf.mxu0 }
 0x108   : > { %v3998_v7 = vpack.c.bf16 %v680_v6, %v678_v4 }
 0x10a   : > { %3231 = vmatmul.msk.bf16.gmra.mxu1 %vm549_vm0, %v3998_v7 }
 0x10d   : > { %v765_v8 = vpop.f32.mrf.mxu2 }
 0x10e   : > { %v4002_v9 = vpack.c.bf16 %v765_v8, %v763_v5 }
 0x10f   : > { %v683_v12 = vpop.f32.mrf.mxu0 }
 0x110   : > { %3248 = vmatmul.msk.bf16.gmra.mxu3 %vm549_vm0, %v4002_v9 }
 0x112   : > { %3187 = vmatmul.msk.bf16.gmra.mxu0 %vm549_vm0, %v3407_v10  ;;  %3204 = vmatmul.msk.bf16.gmra.mxu2 %vm549_vm0, %v3424_v11 }
 0x115   : > { %v768_v13 = vpop.f32.mrf.mxu2 }
 0x117   : > { %v685_v14 = vpop.f32.mrf.mxu0 }
 0x118   : > { %v4014_v15 = vpack.c.bf16 %v685_v14, %v683_v12 }
 0x11a   : > { %3232 = vmatmul.msk.bf16.gmra.mxu1 %vm549_vm0, %v4014_v15 }
 0x11d   : > { %v770_v16 = vpop.f32.mrf.mxu2 }
 0x11e   : > { %v4018_v17 = vpack.c.bf16 %v770_v16, %v768_v13 }
 0x11f   : > { %v688_v20 = vpop.f32.mrf.mxu0 }
 0x120   : > { %3249 = vmatmul.msk.bf16.gmra.mxu3 %vm549_vm0, %v4018_v17 }
 0x122   : > { %3188 = vmatmul.msk.bf16.gmra.mxu0 %vm549_vm0, %v3408_v18  ;;  %3205 = vmatmul.msk.bf16.gmra.mxu2 %vm549_vm0, %v3425_v19 }
 0x125   : > { %v773_v21 = vpop.f32.mrf.mxu2 }
 0x127   : > { %v690_v22 = vpop.f32.mrf.mxu0 }
 0x128   : > { %v4033_v24 = vpack.c.bf16 %v690_v22, %v688_v20 }
 0x12a   : > { %3233 = vmatmul.msk.bf16.gmra.mxu1 %vm549_vm0, %v4033_v24 }
 0x12d   : > { %v775_v26 = vpop.f32.mrf.mxu2 }
 0x12e   : > { %v4037_v27 = vpack.c.bf16 %v775_v26, %v773_v21 }
 0x12f   : > { %v693_v30 = vpop.f32.mrf.mxu0 }
 0x130   : > { %3250 = vmatmul.msk.bf16.gmra.mxu3 %vm549_vm0, %v4037_v27 }
 0x132   : > { %3189 = vmatmul.msk.bf16.gmra.mxu0 %vm549_vm0, %v3409_v28  ;;  %3206 = vmatmul.msk.bf16.gmra.mxu2 %vm549_vm0, %v548_v29 }
 0x135   : > { %v778_v31 = vpop.f32.mrf.mxu2 }
 0x137   : > { %v695_v32 = vpop.f32.mrf.mxu0 }
 0x138   : > { %v4046_v33 = vpack.c.bf16 %v695_v32, %v693_v30 }
 0x13a   : > { %3234 = vmatmul.msk.bf16.gmra.mxu1 %vm549_vm0, %v4046_v33 }
 0x13d   : > { %v780_v34 = vpop.f32.mrf.mxu2 }
 0x13e   : > { %v4050_v35 = vpack.c.bf16 %v780_v34, %v778_v31 }
 0x13f   : > { %v698_v37 = vpop.f32.mrf.mxu0 }
 0x140   : > { %3251 = vmatmul.msk.bf16.gmra.mxu3 %vm549_vm0, %v4050_v35 }
 0x142   : > { %3190 = vmatmul.msk.bf16.gmra.mxu0 %vm549_vm0, %v3410_v36  ;;  %3260 = vmatmul.msk.bf16.vlgmr.msrb.gmra.mxu2 %vm549_vm0, %v3934_v39 }
 0x145   : > { %v783_v38 = vpop.f32.mrf.mxu2 }
 0x147   : > { %v700_v40 = vpop.f32.mrf.mxu0  ;;  %v4060_v42 = vpop.f32.mrf.mxu1 }
 0x148   : > { %v4062_v43 = vpack.c.bf16 %v700_v40, %v698_v37 }
 0x14a   : > { %3235 = vmatmul.msk.bf16.gmra.mxu1 %vm549_vm0, %v4062_v43 }
 0x14d   : > { %v785_v44 = vpop.f32.mrf.mxu2 }
 0x14e   : > { %v4066_v45 = vpack.c.bf16 %v785_v44, %v783_v38 }
 0x14f   : > { %v703_v46 = vpop.f32.mrf.mxu0  ;;  %v4068_v48 = vpop.f32.mrf.mxu1 }
 0x150   : > { %5765 = vst [vmem:[#allocation17_spill] sm:$0xff] %v4066_v45  ;;  %3252 = vmatmul.msk.bf16.gmra.mxu3 %vm549_vm0, %v4066_v45 }
 0x152   : > { %3261 = vmatmul.msk.bf16.gmra.mxu2 %vm549_vm0, %v3950_v47  ;;  %3326 = vmatmul.msk.bf16.vlgmr.msrb.gmra.mxu0 %vm549_vm0, %v3934_v39 }
 0x153   : > { %v4076_v50 = vpop.f32.mrf.mxu3 }
 0x154   : > { %5766 = vst [vmem:[#allocation18_spill] sm:$0xff] %v4076_v50 }
 0x155   : > { %v788_v51 = vpop.f32.mrf.mxu2 }
 0x157   : > { %v705_v52 = vpop.f32.mrf.mxu0  ;;  %v4078_v53 = vpop.f32.mrf.mxu1 }
 0x158   : > { %v4080_v54 = vpack.c.bf16 %v705_v52, %v703_v46 }
 0x15a   : > { %3236 = vmatmul.msk.bf16.gmra.mxu1 %vm549_vm0, %v4080_v54 }
 0x15b   : > { %v4084_v56 = vpop.f32.mrf.mxu3 }
 0x15c   : > { %5767 = vst [vmem:[#allocation19_spill] sm:$0xff] %v4084_v56 }
 0x15d   : > { %v790_v58 = vpop.f32.mrf.mxu2 }
 0x15e   : > { %v4086_v59 = vpack.c.bf16 %v790_v58, %v788_v51 }
 0x15f   : > { %v708_v60 = vpop.f32.mrf.mxu0  ;;  %v4088_v61 = vpop.f32.mrf.mxu1 }
 0x160   : > { %5768 = vst [vmem:[#allocation20_spill] sm:$0xff] %v4086_v59  ;;  %3253 = vmatmul.msk.bf16.gmra.mxu3 %vm549_vm0, %v4086_v59 }
 0x162   : > { %3262 = vmatmul.msk.bf16.gmra.mxu2 %vm549_vm0, %v3966_v55  ;;  %3327 = vmatmul.msk.bf16.gmra.mxu0 %vm549_vm0, %v3950_v47 }
 0x163   : > { %v4096_v62 = vpop.f32.mrf.mxu3 }
 0x164   : > { %5769 = vst [vmem:[#allocation21_spill] sm:$0xff] %v4096_v62 }
 0x165   : > { %v793_v0 = vpop.f32.mrf.mxu2 }
 0x167   : > { %v710_v2 = vpop.f32.mrf.mxu0  ;;  %v4098_v3 = vpop.f32.mrf.mxu1 }
 0x168   : > { %v4100_v4 = vpack.c.bf16 %v710_v2, %v708_v60 }
 0x16a   : > { %3237 = vmatmul.msk.bf16.gmra.mxu1 %vm549_vm0, %v4100_v4 }
 0x16b   : > { %v4104_v5 = vpop.f32.mrf.mxu3 }
 0x16c   : > { %5770 = vst [vmem:[#allocation22_spill] sm:$0xff] %v4104_v5 }
 0x16d   : > { %v795_v6 = vpop.f32.mrf.mxu2 }
 0x16e   : > { %v4106_v8 = vpack.c.bf16 %v795_v6, %v793_v0 }
 0x16f   : > { %v713_v10 = vpop.f32.mrf.mxu0  ;;  %v4108_v11 = vpop.f32.mrf.mxu1 }
 0x170   : > { %5771 = vst [vmem:[#allocation23_spill] sm:$0xff] %v4106_v8  ;;  %3254 = vmatmul.msk.bf16.gmra.mxu3 %vm549_vm0, %v4106_v8 }
 0x172   : > { %3263 = vmatmul.msk.bf16.gmra.mxu2 %vm549_vm0, %v3982_v63  ;;  %3328 = vmatmul.msk.bf16.gmra.mxu0 %vm549_vm0, %v3966_v55 }
 0x173   : > { %v4116_v12 = vpop.f32.mrf.mxu3 }
 0x174   : > { %5772 = vst [vmem:[#allocation24_spill] sm:$0xff] %v4116_v12 }
 0x175   : > { %v798_v13 = vpop.f32.mrf.mxu2 }
 0x177   : > { %v715_v14 = vpop.f32.mrf.mxu0  ;;  %v4118_v16 = vpop.f32.mrf.mxu1 }
 0x178   : > { %v4120_v18 = vpack.c.bf16 %v715_v14, %v713_v10 }
 0x17a   : > { %3238 = vmatmul.msk.bf16.gmra.mxu1 %vm549_vm0, %v4120_v18 }
 0x17b   : > { %v4124_v19 = vpop.f32.mrf.mxu3 }
 0x17c   : > { %5773 = vst [vmem:[#allocation25_spill] sm:$0xff] %v4124_v19 }
 0x17d   : > { %v800_v20 = vpop.f32.mrf.mxu2 }
 0x17e   : > { %v4126_v21 = vpack.c.bf16 %v800_v20, %v798_v13 }
 0x17f   : > { %v718_v22 = vpop.f32.mrf.mxu0  ;;  %v4128_v23 = vpop.f32.mrf.mxu1 }
 0x180   : > { %5774 = vst [vmem:[#allocation26_spill] sm:$0xff] %v4126_v21  ;;  %3255 = vmatmul.msk.bf16.gmra.mxu3 %vm549_vm0, %v4126_v21 }
 0x182   : > { %3264 = vmatmul.msk.bf16.gmra.mxu2 %vm549_vm0, %v3998_v7  ;;  %3329 = vmatmul.msk.bf16.gmra.mxu0 %vm549_vm0, %v3982_v63 }
 0x183   : > { %v4136_v25 = vpop.f32.mrf.mxu3 }
 0x184   : > { %5775 = vst [vmem:[#allocation27_spill] sm:$0xff] %v4136_v25 }
 0x185   : > { %v803_v26 = vpop.f32.mrf.mxu2 }
 0x187   : > { %v720_v28 = vpop.f32.mrf.mxu0  ;;  %v4138_v29 = vpop.f32.mrf.mxu1 }
 0x188   : > { %v4140_v30 = vpack.c.bf16 %v720_v28, %v718_v22 }
 0x18a   : > { %3239 = vmatmul.msk.bf16.gmra.mxu1 %vm549_vm0, %v4140_v30 }
 0x18b   : > { %v4144_v31 = vpop.f32.mrf.mxu3 }
 0x18c   : > { %5776 = vst [vmem:[#allocation28_spill] sm:$0xff] %v4144_v31 }
 0x18d   : > { %v805_v32 = vpop.f32.mrf.mxu2 }
 0x18e   : > { %v4146_v34 = vpack.c.bf16 %v805_v32, %v803_v26 }
 0x18f   : > { %v723_v36 = vpop.f32.mrf.mxu0  ;;  %v4148_v37 = vpop.f32.mrf.mxu1 }
 0x190   : > { %5777 = vst [vmem:[#allocation29_spill] sm:$0xff] %v4146_v34  ;;  %3256 = vmatmul.msk.bf16.gmra.mxu3 %vm549_vm0, %v4146_v34 }
 0x192   : > { %3265 = vmatmul.msk.bf16.gmra.mxu2 %vm549_vm0, %v4014_v15  ;;  %3330 = vmatmul.msk.bf16.gmra.mxu0 %vm549_vm0, %v3998_v7 }
 0x193   : > { %v4156_v38 = vpop.f32.mrf.mxu3 }
 0x194   : > { %5778 = vst [vmem:[#allocation30_spill] sm:$0xff] %v4156_v38 }
 0x195   : > { %v808_v40 = vpop.f32.mrf.mxu2 }
 0x197   : > { %v725_v44 = vpop.f32.mrf.mxu0  ;;  %v4158_v46 = vpop.f32.mrf.mxu1 }
 0x198   : > { %v4160_v51 = vpack.c.bf16 %v725_v44, %v723_v36 }
 0x19a   : > { %3240 = vmatmul.msk.bf16.gmra.mxu1 %vm549_vm0, %v4160_v51 }
 0x19b   : > { %v4164_v52 = vpop.f32.mrf.mxu3 }
 0x19c   : > { %5779 = vst [vmem:[#allocation31_spill] sm:$0xff] %v4164_v52 }
 0x19d   : > { %v810_v58 = vpop.f32.mrf.mxu2 }
 0x19e   : > { %v4166_v60 = vpack.c.bf16 %v810_v58, %v808_v40 }
 0x19f   : > { %v728_v0 = vpop.f32.mrf.mxu0  ;;  %v4168_v2 = vpop.f32.mrf.mxu1 }
 0x1a0   : > { %5780 = vst [vmem:[#allocation32_spill] sm:$0xff] %v4166_v60  ;;  %3257 = vmatmul.msk.bf16.gmra.mxu3 %vm549_vm0, %v4166_v60 }
 0x1a2   : > { %3266 = vmatmul.msk.bf16.gmra.mxu2 %vm549_vm0, %v4033_v24  ;;  %3331 = vmatmul.msk.bf16.gmra.mxu0 %vm549_vm0, %v4014_v15 }
 0x1a3   : > { %v4176_v6 = vpop.f32.mrf.mxu3 }
 0x1a4   : > { %5781 = vst [vmem:[#allocation33_spill] sm:$0xff] %v4176_v6 }
 0x1a5   : > { %v813_v10 = vpop.f32.mrf.mxu2 }
 0x1a7   : > { %v730_v13 = vpop.f32.mrf.mxu0  ;;  %v4178_v14 = vpop.f32.mrf.mxu1 }
 0x1a8   : > { %v4180_v20 = vpack.c.bf16 %v730_v13, %v728_v0 }
 0x1aa   : > { %3241 = vmatmul.msk.bf16.gmra.mxu1 %vm549_vm0, %v4180_v20 }
 0x1ab   : > { %v4184_v22 = vpop.f32.mrf.mxu3 }
 0x1ac   : > { %5782 = vst [vmem:[#allocation34_spill] sm:$0xff] %v4184_v22 }
 0x1ad   : > { %v815_v26 = vpop.f32.mrf.mxu2 }
 0x1ae   : > { %v4186_v28 = vpack.c.bf16 %v815_v26, %v813_v10 }
 0x1af   : > { %v733_v32 = vpop.f32.mrf.mxu0  ;;  %v4188_v36 = vpop.f32.mrf.mxu1 }
 0x1b0   : > { %5783 = vst [vmem:[#allocation35_spill] sm:$0xff] %v4186_v28  ;;  %3258 = vmatmul.msk.bf16.gmra.mxu3 %vm549_vm0, %v4186_v28 }
 0x1b2   : > { %3267 = vmatmul.msk.bf16.gmra.mxu2 %vm549_vm0, %v4046_v33  ;;  %3332 = vmatmul.msk.bf16.gmra.mxu0 %vm549_vm0, %v4033_v24 }
 0x1b3   : > { %v4196_v40 = vpop.f32.mrf.mxu3 }
 0x1b4   : > { %5784 = vst [vmem:[#allocation36_spill] sm:$0xff] %v4196_v40 }
 0x1b5   : > { %v818_v44 = vpop.f32.mrf.mxu2 }
 0x1b6   : > { %v4211_v26 = vpack.c.bf16 %v818_v44, %v818_v44 }
 0x1b7   : > { %v735_v58 = vpop.f32.mrf.mxu0  ;;  %v4199_v0 = vpop.f32.mrf.mxu1 }
 0x1b8   : > { %v4202_v10 = vpack.c.bf16 %v735_v58, %v733_v32  ;;  %5786 = vst [vmem:[#allocation38_spill] sm:$0xff] %v4211_v26  ;;  %v4218_v32 = vstv %s1851_s8  ;;  %v4228_v58 = vstv %s2178_s28 }
 0x1ba   : > { %3242 = vmatmul.msk.bf16.gmra.mxu1 %vm549_vm0, %v4202_v10 }
 0x1bb   : > { %v4208_v13 = vpop.f32.mrf.mxu3 }
 0x1bc   : > { %5785 = vst [vmem:[#allocation37_spill] sm:$0xff] %v4208_v13 }
 0x1bd   : > { %v820_v40 = vpop.f32.mrf.mxu2 }
 0x1be   : > { %v1853_v40 = vmul.f32 %v4218_v32, %v4060_v42 }
 0x1bf   : > { %v738_v28 = vpop.f32.mrf.mxu0  ;;  %v4214_v22 = vpop.f32.mrf.mxu1 }
 0x1c0   : > { %3259 = vmatmul.msk.bf16.gmra.mxu3 %vm549_vm0, %v4211_v26  ;;  %v2180_v52 = vadd.f32 %v4228_v58, %v1853_v40  ;;  %v1858_v40 = vmul.f32 %v4218_v32, %v4068_v48 }
 0x1c2   : > { %3268 = vmatmul.msk.bf16.gmra.mxu2 %vm549_vm0, %v4062_v43  ;;  %3333 = vmatmul.msk.bf16.gmra.mxu0 %vm549_vm0, %v4046_v33  ;;  %v2185_v31 = vadd.f32 %v4228_v58, %v1858_v40 }
 0x1c3   : > { %v4224_v44 = vpop.f32.mrf.mxu3 }
 0x1c4   : > { %5787 = vst [vmem:[#allocation39_spill] sm:$0xff] %v4224_v44 }
 0x1c5   : > { %v1168_v13 = vpop.f32.mrf.mxu2 }
 0x1c6   : > { %v1854_v26 = vmul.f32 %v4218_v32, %v1168_v13 }
 0x1c7   : > { %v740_v6 = vpop.f32.mrf.mxu0  ;;  %v4231_v60 = vpop.f32.mrf.mxu1 }
 0x1c8   : > { %v2181_v38 = vadd.f32 %v4228_v58, %v1854_v26  ;;  %v4235_v34 = vpack.c.bf16 %v740_v6, %v738_v28 }
 0x1ca   : > { %v2505_v42 = vpack.c.bf16 %v2181_v38, %v2180_v52  ;;  %3243 = vmatmul.msk.bf16.gmra.mxu1 %vm549_vm0, %v4235_v34 }
 0x1cb   : > { %v4244_v13 = vpop.f32.mrf.mxu3 }
 0x1cc   : > { %5788 = vst [vmem:[#allocation40_spill] sm:$0xff] %v4244_v13 }
 0x1cd   : > { %2700 = vst [vmem:[%s4240_s13] sm:$0xff] %v2505_v42  ;;  %v1170_v26 = vpop.f32.mrf.mxu2  ;;  %v1863_v42 = vmul.f32 %v4218_v32, %v4078_v53  ;;  %v1868_v53 = vmul.f32 %v4218_v32, %v4088_v61 }
 0x1ce   : > { %v1859_v6 = vmul.f32 %v4218_v32, %v1170_v26 }
 0x1cf   : > { %v4250_v28 = vpop.f32.mrf.mxu1  ;;  %v4252_v44 = vpop.f32.mrf.mxu0 }
 0x1d0   : > { %v2186_v38 = vadd.f32 %v4228_v58, %v1859_v6  ;;  %3293 = vmatmul.msk.bf16.vlgmr.msrb.gmra.mxu3 %vm549_vm0, %v3934_v39 }
 0x1d2   : > { %v2508_v52 = vpack.c.bf16 %v2186_v38, %v2185_v31  ;;  %3269 = vmatmul.msk.bf16.gmra.mxu2 %vm549_vm0, %v4080_v54  ;;  %3334 = vmatmul.msk.bf16.gmra.mxu0 %vm549_vm0, %v4062_v43  ;;  %v2190_v31 = vadd.f32 %v4228_v58, %v1863_v42  ;;  %v2195_v42 = vadd.f32 %v4228_v58, %v1868_v53 }
 0x1d3   : > { %v4262_v48 = vpop.f32.mrf.mxu3 }
 0x1d4   : > { %5789 = vst [vmem:[#allocation41_spill] sm:$0xff] %v4262_v48 }
 0x1d5   : > { %2704 = vst [vmem:[%s4240_s13 + $0x14] sm:$0xff] %v2508_v52  ;;  %v1173_v40 = vpop.f32.mrf.mxu2 }
 0x1d6   : > { %v1864_v26 = vmul.f32 %v4218_v32, %v1173_v40 }
 0x1d7   : > { %v4268_v6 = vpop.f32.mrf.mxu1  ;;  %v4270_v13 = vpop.f32.mrf.mxu0 }
 0x1d8   : > { %v2191_v38 = vadd.f32 %v4228_v58, %v1864_v26 }
 0x1da   : > { %v2511_v25 = vpack.c.bf16 %v2191_v38, %v2190_v31  ;;  %3359 = vmatmul.msk.bf16.vlgmr.msrb.gmra.mxu1 %vm549_vm0, %v3934_v39 }
 0x1db   : > { %v4276_v48 = vpop.f32.mrf.mxu3 }
 0x1dc   : > { %5790 = vst [vmem:[#allocation42_spill] sm:$0xff] %v4276_v48 }
 0x1dd   : > { %2707 = vst [vmem:[%s4240_s13 + $0x28] sm:$0xff] %v2511_v25  ;;  %v1175_v52 = vpop.f32.mrf.mxu2  ;;  %v1873_v25 = vmul.f32 %v4218_v32, %v4098_v3  ;;  %v1878_v3 = vmul.f32 %v4218_v32, %v4108_v11 }
 0x1de   : > { %v1869_v40 = vmul.f32 %v4218_v32, %v1175_v52 }
 0x1df   : > { %v4282_v21 = vpop.f32.mrf.mxu1  ;;  %v4284_v19 = vpop.f32.mrf.mxu0 }
 0x1e0   : > { %v2196_v26 = vadd.f32 %v4228_v58, %v1869_v40  ;;  %3294 = vmatmul.msk.bf16.gmra.mxu3 %vm549_vm0, %v3950_v47  ;;  %v2200_v40 = vadd.f32 %v4228_v58, %v1873_v25  ;;  %v2205_v25 = vadd.f32 %v4228_v58, %v1878_v3 }
 0x1e2   : > { %v2514_v39 = vpack.c.bf16 %v2196_v26, %v2195_v42  ;;  %3270 = vmatmul.msk.bf16.gmra.mxu2 %vm549_vm0, %v4100_v4  ;;  %3335 = vmatmul.msk.bf16.gmra.mxu0 %vm549_vm0, %v4080_v54 }
 0x1e3   : > { %v4294_v61 = vpop.f32.mrf.mxu3 }
 0x1e4   : > { %5791 = vst [vmem:[#allocation43_spill] sm:$0xff] %v4294_v61 }
 0x1e5   : > { %2710 = vst [vmem:[%s4240_s13 + $0x3c] sm:$0xff] %v2514_v39  ;;  %v1178_v31 = vpop.f32.mrf.mxu2 }
 0x1e6   : > { %v1874_v38 = vmul.f32 %v4218_v32, %v1178_v31 }
 0x1e7   : > { %v4300_v53 = vpop.f32.mrf.mxu1  ;;  %v4302_v52 = vpop.f32.mrf.mxu0 }
 0x1e8   : > { %v2201_v42 = vadd.f32 %v4228_v58, %v1874_v38 }
 0x1ea   : > { %v2517_v26 = vpack.c.bf16 %v2201_v42, %v2200_v40  ;;  %3360 = vmatmul.msk.bf16.gmra.mxu1 %vm549_vm0, %v3950_v47  ;;  %v1883_v40 = vmul.f32 %v4218_v32, %v4118_v16  ;;  %v1888_v16 = vmul.f32 %v4218_v32, %v4128_v23 }
 0x1eb   : > { %v4308_v61 = vpop.f32.mrf.mxu3 }
 0x1ec   : > { %5792 = vst [vmem:[#allocation44_spill] sm:$0xff] %v4308_v61 }
 0x1ed   : > { %2713 = vst [vmem:[%s4240_s13 + $0x50] sm:$0xff] %v2517_v26  ;;  %v1180_v39 = vpop.f32.mrf.mxu2 }
 0x1ee   : > { %v1879_v31 = vmul.f32 %v4218_v32, %v1180_v39 }
 0x1ef   : > { %v4314_v48 = vpop.f32.mrf.mxu1  ;;  %v4316_v12 = vpop.f32.mrf.mxu0 }
 0x1f0   : > { %v2206_v38 = vadd.f32 %v4228_v58, %v1879_v31  ;;  %3295 = vmatmul.msk.bf16.gmra.mxu3 %vm549_vm0, %v3966_v55  ;;  %v2210_v31 = vadd.f32 %v4228_v58, %v1883_v40  ;;  %v2215_v40 = vadd.f32 %v4228_v58, %v1888_v16 }
 0x1f2   : > { %v2520_v47 = vpack.c.bf16 %v2206_v38, %v2205_v25  ;;  %3271 = vmatmul.msk.bf16.gmra.mxu2 %vm549_vm0, %v4120_v18  ;;  %3336 = vmatmul.msk.bf16.gmra.mxu0 %vm549_vm0, %v4100_v4 }
 0x1f3   : > { %v4326_v11 = vpop.f32.mrf.mxu3 }
 0x1f4   : > { %5793 = vst [vmem:[#allocation45_spill] sm:$0xff] %v4326_v11 }
 0x1f5   : > { %2716 = vst [vmem:[%s4240_s13 + $0x64] sm:$0xff] %v2520_v47  ;;  %v1183_v42 = vpop.f32.mrf.mxu2 }
 0x1f6   : > { %v1884_v26 = vmul.f32 %v4218_v32, %v1183_v42 }
 0x1f7   : > { %v4332_v3 = vpop.f32.mrf.mxu1  ;;  %v4334_v39 = vpop.f32.mrf.mxu0 }
 0x1f8   : > { %v2211_v25 = vadd.f32 %v4228_v58, %v1884_v26 }
 0x1fa   : > { %v2523_v38 = vpack.c.bf16 %v2211_v25, %v2210_v31  ;;  %3361 = vmatmul.msk.bf16.gmra.mxu1 %vm549_vm0, %v3966_v55  ;;  %v1893_v31 = vmul.f32 %v4218_v32, %v4138_v29  ;;  %v1898_v29 = vmul.f32 %v4218_v32, %v4148_v37 }
 0x1fb   : > { %v4340_v11 = vpop.f32.mrf.mxu3 }
 0x1fc   : > { %5794 = vst [vmem:[#allocation46_spill] sm:$0xff] %v4340_v11 }
 0x1fd   : > { %2719 = vst [vmem:[%s4240_s13 + $0x78] sm:$0xff] %v2523_v38  ;;  %v1185_v47 = vpop.f32.mrf.mxu2 }
 0x1fe   : > { %v1889_v42 = vmul.f32 %v4218_v32, %v1185_v47 }
 0x1ff   : > { %v4346_v61 = vpop.f32.mrf.mxu1  ;;  %v4348_v8 = vpop.f32.mrf.mxu0 }
 0x200   : > { %v2216_v26 = vadd.f32 %v4228_v58, %v1889_v42  ;;  %3296 = vmatmul.msk.bf16.gmra.mxu3 %vm549_vm0, %v3982_v63  ;;  %v2220_v42 = vadd.f32 %v4228_v58, %v1893_v31  ;;  %v2225_v31 = vadd.f32 %v4228_v58, %v1898_v29 }
 0x202   : > { %v2526_v55 = vpack.c.bf16 %v2216_v26, %v2215_v40  ;;  %3272 = vmatmul.msk.bf16.gmra.mxu2 %vm549_vm0, %v4140_v30  ;;  %3337 = vmatmul.msk.bf16.gmra.mxu0 %vm549_vm0, %v4120_v18 }
 0x203   : > { %v4358_v23 = vpop.f32.mrf.mxu3 }
 0x204   : > { %5795 = vst [vmem:[#allocation47_spill] sm:$0xff] %v4358_v23 }
 0x205   : > { %2722 = vst [vmem:[%s4240_s13 + $0x8c] sm:$0xff] %v2526_v55  ;;  %v1188_v25 = vpop.f32.mrf.mxu2 }
 0x206   : > { %v1894_v38 = vmul.f32 %v4218_v32, %v1188_v25 }
 0x207   : > { %v4364_v16 = vpop.f32.mrf.mxu1  ;;  %v4366_v47 = vpop.f32.mrf.mxu0 }
 0x208   : > { %v2221_v40 = vadd.f32 %v4228_v58, %v1894_v38 }
 0x20a   : > { %v2529_v26 = vpack.c.bf16 %v2221_v40, %v2220_v42  ;;  %3362 = vmatmul.msk.bf16.gmra.mxu1 %vm549_vm0, %v3982_v63  ;;  %v1903_v42 = vmul.f32 %v4218_v32, %v4158_v46  ;;  %v1908_v46 = vmul.f32 %v4218_v32, %v4168_v2 }
 0x20b   : > { %v4372_v23 = vpop.f32.mrf.mxu3 }
 0x20c   : > { %5796 = vst [vmem:[#allocation48_spill] sm:$0xff] %v4372_v23 }
 0x20d   : > { %2725 = vst [vmem:[%s4240_s13 + $0xa0] sm:$0xff] %v2529_v26  ;;  %v1190_v55 = vpop.f32.mrf.mxu2 }
 0x20e   : > { %v1899_v25 = vmul.f32 %v4218_v32, %v1190_v55 }
 0x20f   : > { %v4378_v11 = vpop.f32.mrf.mxu1  ;;  %v4380_v5 = vpop.f32.mrf.mxu0 }
 0x210   : > { %v2226_v38 = vadd.f32 %v4228_v58, %v1899_v25  ;;  %3297 = vmatmul.msk.bf16.gmra.mxu3 %vm549_vm0, %v3998_v7  ;;  %v2230_v25 = vadd.f32 %v4228_v58, %v1903_v42  ;;  %v2235_v42 = vadd.f32 %v4228_v58, %v1908_v46 }
 0x212   : > { %v2532_v63 = vpack.c.bf16 %v2226_v38, %v2225_v31  ;;  %3273 = vmatmul.msk.bf16.gmra.mxu2 %vm549_vm0, %v4160_v51  ;;  %3338 = vmatmul.msk.bf16.gmra.mxu0 %vm549_vm0, %v4140_v30 }
 0x213   : > { %v4390_v37 = vpop.f32.mrf.mxu3 }
 0x214   : > { %5797 = vst [vmem:[#allocation49_spill] sm:$0xff] %v4390_v37 }
 0x215   : > { %2728 = vst [vmem:[%s4240_s13 + $0xb4] sm:$0xff] %v2532_v63  ;;  %v1193_v40 = vpop.f32.mrf.mxu2 }
 0x216   : > { %v1904_v26 = vmul.f32 %v4218_v32, %v1193_v40 }
 0x217   : > { %v4396_v29 = vpop.f32.mrf.mxu1  ;;  %v4398_v55 = vpop.f32.mrf.mxu0 }
 0x218   : > { %v2231_v31 = vadd.f32 %v4228_v58, %v1904_v26 }
 0x21a   : > { %v2535_v38 = vpack.c.bf16 %v2231_v31, %v2230_v25  ;;  %3363 = vmatmul.msk.bf16.gmra.mxu1 %vm549_vm0, %v3998_v7  ;;  %v1913_v25 = vmul.f32 %v4218_v32, %v4178_v14  ;;  %v1918_v14 = vmul.f32 %v4218_v32, %v4188_v36 }
 0x21b   : > { %v4404_v37 = vpop.f32.mrf.mxu3 }
 0x21c   : > { %5798 = vst [vmem:[#allocation50_spill] sm:$0xff] %v4404_v37 }
 0x21d   : > { %2731 = vst [vmem:[%s4240_s13 + $0xc8] sm:$0xff] %v2535_v38  ;;  %v1195_v63 = vpop.f32.mrf.mxu2 }
 0x21e   : > { %v1909_v40 = vmul.f32 %v4218_v32, %v1195_v63 }
 0x21f   : > { %v4410_v23 = vpop.f32.mrf.mxu1  ;;  %v4412_v62 = vpop.f32.mrf.mxu0 }
 0x220   : > { %v2236_v26 = vadd.f32 %v4228_v58, %v1909_v40  ;;  %3298 = vmatmul.msk.bf16.gmra.mxu3 %vm549_vm0, %v4014_v15  ;;  %v2240_v40 = vadd.f32 %v4228_v58, %v1913_v25  ;;  %v2245_v25 = vadd.f32 %v4228_v58, %v1918_v14 }
 0x222   : > { %v2538_v7 = vpack.c.bf16 %v2236_v26, %v2235_v42  ;;  %3274 = vmatmul.msk.bf16.gmra.mxu2 %vm549_vm0, %v4180_v20  ;;  %3339 = vmatmul.msk.bf16.gmra.mxu0 %vm549_vm0, %v4160_v51 }
 0x223   : > { %v4422_v2 = vpop.f32.mrf.mxu3 }
 0x224   : > { %5799 = vst [vmem:[#allocation51_spill] sm:$0xff] %v4422_v2 }
 0x225   : > { %2734 = vst [vmem:[%s4240_s13 + $0xdc] sm:$0xff] %v2538_v7  ;;  %v1198_v31 = vpop.f32.mrf.mxu2 }
 0x226   : > { %v1914_v38 = vmul.f32 %v4218_v32, %v1198_v31 }
 0x227   : > { %v4428_v46 = vpop.f32.mrf.mxu1  ;;  %v4430_v63 = vpop.f32.mrf.mxu0 }
 0x228   : > { %v2241_v42 = vadd.f32 %v4228_v58, %v1914_v38 }
 0x22a   : > { %v2541_v26 = vpack.c.bf16 %v2241_v42, %v2240_v40  ;;  %3364 = vmatmul.msk.bf16.gmra.mxu1 %vm549_vm0, %v4014_v15  ;;  %v1923_v40 = vmul.f32 %v4218_v32, %v4199_v0  ;;  %v1928_v0 = vmul.f32 %v4218_v32, %v4214_v22 }
 0x22b   : > { %v4436_v2 = vpop.f32.mrf.mxu3 }
 0x22c   : > { %5800 = vst [vmem:[#allocation52_spill] sm:$0xff] %v4436_v2 }
 0x22d   : > { %2737 = vst [vmem:[%s4240_s13 + $0xf0] sm:$0xff] %v2541_v26  ;;  %v1200_v7 = vpop.f32.mrf.mxu2 }
 0x22e   : > { %v1919_v31 = vmul.f32 %v4218_v32, %v1200_v7 }
 0x22f   : > { %v4442_v37 = vpop.f32.mrf.mxu1  ;;  %v4444_v59 = vpop.f32.mrf.mxu0 }
 0x230   : > { %v2246_v38 = vadd.f32 %v4228_v58, %v1919_v31  ;;  %3299 = vmatmul.msk.bf16.gmra.mxu3 %vm549_vm0, %v4033_v24  ;;  %v2250_v31 = vadd.f32 %v4228_v58, %v1923_v40  ;;  %v2255_v40 = vadd.f32 %v4228_v58, %v1928_v0 }
 0x232   : > { %v2544_v15 = vpack.c.bf16 %v2246_v38, %v2245_v25  ;;  %3275 = vmatmul.msk.bf16.gmra.mxu2 %vm549_vm0, %v4202_v10  ;;  %3340 = vmatmul.msk.bf16.gmra.mxu0 %vm549_vm0, %v4180_v20 }
 0x233   : > { %v4454_v36 = vpop.f32.mrf.mxu3 }
 0x234   : > { %5801 = vst [vmem:[#allocation53_spill] sm:$0xff] %v4454_v36 }
 0x235   : > { %2740 = vst [vmem:[%s4240_s13 + $0x104] sm:$0xff] %v2544_v15  ;;  %v1203_v42 = vpop.f32.mrf.mxu2 }
 0x236   : > { %v1924_v26 = vmul.f32 %v4218_v32, %v1203_v42 }
 0x237   : > { %v4460_v14 = vpop.f32.mrf.mxu1  ;;  %v4462_v7 = vpop.f32.mrf.mxu0 }
 0x238   : > { %v2251_v25 = vadd.f32 %v4228_v58, %v1924_v26 }
 0x23a   : > { %v2547_v38 = vpack.c.bf16 %v2251_v25, %v2250_v31  ;;  %3365 = vmatmul.msk.bf16.gmra.mxu1 %vm549_vm0, %v4033_v24  ;;  %v1933_v31 = vmul.f32 %v4218_v32, %v4231_v60  ;;  %v1938_v60 = vmul.f32 %v4218_v32, %v4250_v28 }
 0x23b   : > { %v4468_v36 = vpop.f32.mrf.mxu3 }
 0x23c   : > { %5802 = vst [vmem:[#allocation54_spill] sm:$0xff] %v4468_v36 }
 0x23d   : > { %2743 = vst [vmem:[%s4240_s13 + $0x118] sm:$0xff] %v2547_v38  ;;  %v1205_v15 = vpop.f32.mrf.mxu2 }
 0x23e   : > { %v1929_v42 = vmul.f32 %v4218_v32, %v1205_v15 }
 0x23f   : > { %v4474_v2 = vpop.f32.mrf.mxu1  ;;  %v4476_v56 = vpop.f32.mrf.mxu0 }
 0x240   : > { %v2256_v26 = vadd.f32 %v4228_v58, %v1929_v42  ;;  %3300 = vmatmul.msk.bf16.gmra.mxu3 %vm549_vm0, %v4046_v33  ;;  %v2260_v42 = vadd.f32 %v4228_v58, %v1933_v31  ;;  %v2265_v31 = vadd.f32 %v4228_v58, %v1938_v60 }
 0x242   : > { %v2550_v24 = vpack.c.bf16 %v2256_v26, %v2255_v40  ;;  %3276 = vmatmul.msk.bf16.gmra.mxu2 %vm549_vm0, %v4235_v34  ;;  %3341 = vmatmul.msk.bf16.gmra.mxu0 %vm549_vm0, %v4202_v10 }
 0x243   : > { %v4486_v22 = vpop.f32.mrf.mxu3 }
 0x244   : > { %5803 = vst [vmem:[#allocation55_spill] sm:$0xff] %v4486_v22 }
 0x245   : > { %2746 = vst [vmem:[%s4240_s13 + $0x12c] sm:$0xff] %v2550_v24  ;;  %v1208_v25 = vpop.f32.mrf.mxu2 }
 0x246   : > { %v1934_v38 = vmul.f32 %v4218_v32, %v1208_v25 }
 0x247   : > { %v4492_v0 = vpop.f32.mrf.mxu1  ;;  %v4494_v15 = vpop.f32.mrf.mxu0 }
 0x248   : > { %v2261_v40 = vadd.f32 %v4228_v58, %v1934_v38 }
 0x24a   : > { %v2553_v26 = vpack.c.bf16 %v2261_v40, %v2260_v42  ;;  %3366 = vmatmul.msk.bf16.gmra.mxu1 %vm549_vm0, %v4046_v33  ;;  %v1856_v33 = vmul.f32 %v4218_v32, %v4252_v44  ;;  %v1943_v42 = vmul.f32 %v4218_v32, %v4268_v6 }
 0x24b   : > { %v1157_v22 = vpop.f32.mrf.mxu3 }
 0x24c   : > { %2749 = vst [vmem:[%s4240_s13 + $0x140] sm:$0xff] %v2553_v26  ;;  %v2183_v60 = vadd.f32 %v4228_v58, %v1856_v33 }
 0x24d   : > { %v1210_v24 = vpop.f32.mrf.mxu2 }
 0x24e   : > { %v1939_v25 = vmul.f32 %v4218_v32, %v1210_v24 }
 0x24f   : > { %v4504_v36 = vpop.f32.mrf.mxu1  ;;  %v4506_v50 = vpop.f32.mrf.mxu0 }
 0x250   : > { %v2266_v38 = vadd.f32 %v4228_v58, %v1939_v25  ;;  %3301 = vmatmul.msk.bf16.gmra.mxu3 %vm549_vm0, %v4062_v43 }
 0x252   : > { %v2556_v22 = vpack.c.bf16 %v2266_v38, %v2265_v31  ;;  %3277 = vmatmul.msk.bf16.gmra.mxu2 %vm549_vm0, %v3938_v41  ;;  %3342 = vmatmul.msk.bf16.gmra.mxu0 %vm549_vm0, %v4235_v34  ;;  %v2270_v38 = vadd.f32 %v4228_v58, %v1943_v42  ;;  %v1948_v42 = vmul.f32 %v4218_v32, %v4282_v21 }
 0x253   : > { %v1341_v28 = vpop.f32.mrf.mxu3 }
 0x254   : > { %2752 = vst [vmem:[%s4240_s13 + $0x154] sm:$0xff] %v2556_v22  ;;  %v1855_v40 = vmul.f32 %v4218_v32, %v1341_v28  ;;  %v1861_v28 = vmul.f32 %v4218_v32, %v4270_v13  ;;  %v2275_v21 = vadd.f32 %v4228_v58, %v1948_v42 }
 0x255   : > { %v1213_v26 = vpop.f32.mrf.mxu2 }
 0x256   : > { %v2182_v44 = vadd.f32 %v4228_v58, %v1855_v40  ;;  %v1944_v24 = vmul.f32 %v4218_v32, %v1213_v26  ;;  %v2188_v13 = vadd.f32 %v4228_v58, %v1861_v28  ;;  %v1866_v28 = vmul.f32 %v4218_v32, %v4284_v19 }
 0x257   : > { %v4525_v25 = vpop.f32.mrf.mxu0  ;;  %v1687_v31 = vpop.f32.mrf.mxu1 }
 0x258   : > { %v2506_v45 = vpack.c.bf16 %v2183_v60, %v2182_v44  ;;  %v2271_v6 = vadd.f32 %v4228_v58, %v1944_v24  ;;  %v1857_v22 = vmul.f32 %v4218_v32, %v1687_v31 }
 0x25a   : > { %2701 = vst [vmem:[%s4240_s13 + $0x8] sm:$0xff] %v2506_v45  ;;  %v2559_v33 = vpack.c.bf16 %v2271_v6, %v2270_v38  ;;  %v2184_v40 = vadd.f32 %v4228_v58, %v1857_v22  ;;  %3367 = vmatmul.msk.bf16.gmra.mxu1 %vm549_vm0, %v4062_v43 }
 0x25b   : > { %v1343_v26 = vpop.f32.mrf.mxu3 }
 0x25c   : > { %2755 = vst [vmem:[%s4240_s13 + $0x168] sm:$0xff] %v2559_v33  ;;  %v2507_v60 = vpack.c.bf16 %v2184_v40, %v2184_v40  ;;  %v1860_v44 = vmul.f32 %v4218_v32, %v1343_v26 }
 0x25d   : > { %v1215_v24 = vpop.f32.mrf.mxu2 }
 0x25e   : > { %2703 = vst.msk [vmem:[%s4240_s13 + $0x10] sm:$0xf] %vm2702_vm1, %v2507_v60  ;;  %v2187_v45 = vadd.f32 %v4228_v58, %v1860_v44  ;;  %v1949_v31 = vmul.f32 %v4218_v32, %v1215_v24  ;;  %v1953_v60 = vmul.f32 %v4218_v32, %v4300_v53 }
 0x25f   : > { %v4545_v43 = vpop.f32.mrf.mxu0  ;;  %v1689_v38 = vpop.f32.mrf.mxu1 }
 0x260   : > { %v2509_v6 = vpack.c.bf16 %v2188_v13, %v2187_v45  ;;  %v2276_v22 = vadd.f32 %v4228_v58, %v1949_v31  ;;  %v1862_v33 = vmul.f32 %v4218_v32, %v1689_v38  ;;  %3302 = vmatmul.msk.bf16.gmra.mxu3 %vm549_vm0, %v4080_v54  ;;  %v2193_v13 = vadd.f32 %v4228_v58, %v1866_v28 }
 0x261   : > { %v2280_v53 = vadd.f32 %v4228_v58, %v1953_v60  ;;  %v1871_v28 = vmul.f32 %v4218_v32, %v4302_v52  ;;  %v1958_v60 = vmul.f32 %v4218_v32, %v4314_v48 }
 0x262   : > { %2705 = vst [vmem:[%s4240_s13 + $0x1c] sm:$0xff] %v2509_v6  ;;  %v2562_v40 = vpack.c.bf16 %v2276_v22, %v2275_v21  ;;  %v2189_v26 = vadd.f32 %v4228_v58, %v1862_v33  ;;  %3278 = vmatmul.msk.bf16.gmra.mxu2 %vm549_vm0, %v3954_v49  ;;  %3343 = vmatmul.msk.bf16.gmra.mxu0 %vm549_vm0, %v3938_v41 }
 0x263   : > { %v1346_v42 = vpop.f32.mrf.mxu3  ;;  %v2285_v48 = vadd.f32 %v4228_v58, %v1958_v60 }
 0x264   : > { %2758 = vst [vmem:[%s4240_s13 + $0x17c] sm:$0xff] %v2562_v40  ;;  %v2510_v44 = vpack.c.bf16 %v2189_v26, %v2189_v26  ;;  %v1865_v24 = vmul.f32 %v4218_v32, %v1346_v42 }
 0x265   : > { %v1218_v19 = vpop.f32.mrf.mxu2 }
 0x266   : > { %2706 = vst.msk [vmem:[%s4240_s13 + $0x24] sm:$0xf] %vm2702_vm1, %v2510_v44  ;;  %v2192_v45 = vadd.f32 %v4228_v58, %v1865_v24  ;;  %v1954_v31 = vmul.f32 %v4218_v32, %v1218_v19 }
 0x267   : > { %v4569_v38 = vpop.f32.mrf.mxu0  ;;  %v1692_v21 = vpop.f32.mrf.mxu1 }
 0x268   : > { %v2512_v6 = vpack.c.bf16 %v2193_v13, %v2192_v45  ;;  %v2281_v22 = vadd.f32 %v4228_v58, %v1954_v31  ;;  %v1867_v33 = vmul.f32 %v4218_v32, %v1692_v21  ;;  %v2198_v13 = vadd.f32 %v4228_v58, %v1871_v28 }
 0x26a   : > { %2708 = vst [vmem:[%s4240_s13 + $0x30] sm:$0xff] %v2512_v6  ;;  %v2565_v40 = vpack.c.bf16 %v2281_v22, %v2280_v53  ;;  %v2194_v26 = vadd.f32 %v4228_v58, %v1867_v33  ;;  %3368 = vmatmul.msk.bf16.gmra.mxu1 %vm549_vm0, %v4080_v54  ;;  %v1876_v22 = vmul.f32 %v4218_v32, %v4316_v12 }
 0x26b   : > { %v1348_v42 = vpop.f32.mrf.mxu3 }
 0x26c   : > { %2761 = vst [vmem:[%s4240_s13 + $0x190] sm:$0xff] %v2565_v40  ;;  %v2513_v44 = vpack.c.bf16 %v2194_v26, %v2194_v26  ;;  %v1870_v24 = vmul.f32 %v4218_v32, %v1348_v42  ;;  %v1963_v26 = vmul.f32 %v4218_v32, %v4332_v3 }
 0x26d   : > { %v1220_v19 = vpop.f32.mrf.mxu2 }
 0x26e   : > { %2709 = vst.msk [vmem:[%s4240_s13 + $0x38] sm:$0xf] %vm2702_vm1, %v2513_v44  ;;  %v2197_v52 = vadd.f32 %v4228_v58, %v1870_v24  ;;  %v1959_v45 = vmul.f32 %v4218_v32, %v1220_v19  ;;  %v2203_v44 = vadd.f32 %v4228_v58, %v1876_v22  ;;  %v2290_v3 = vadd.f32 %v4228_v58, %v1963_v26 }
 0x26f   : > { %v4589_v54 = vpop.f32.mrf.mxu0  ;;  %v1694_v31 = vpop.f32.mrf.mxu1 }
 0x270   : > { %v2515_v21 = vpack.c.bf16 %v2198_v13, %v2197_v52  ;;  %v2286_v53 = vadd.f32 %v4228_v58, %v1959_v45  ;;  %v1872_v6 = vmul.f32 %v4218_v32, %v1694_v31  ;;  %3303 = vmatmul.msk.bf16.gmra.mxu3 %vm549_vm0, %v4100_v4 }
 0x272   : > { %2711 = vst [vmem:[%s4240_s13 + $0x44] sm:$0xff] %v2515_v21  ;;  %v2568_v33 = vpack.c.bf16 %v2286_v53, %v2285_v48  ;;  %v2199_v28 = vadd.f32 %v4228_v58, %v1872_v6  ;;  %3279 = vmatmul.msk.bf16.gmra.mxu2 %vm549_vm0, %v3970_v57  ;;  %3344 = vmatmul.msk.bf16.gmra.mxu0 %vm549_vm0, %v3954_v49 }
 0x273   : > { %v1351_v40 = vpop.f32.mrf.mxu3  ;;  %v1881_v21 = vmul.f32 %v4218_v32, %v4334_v39 }
 0x274   : > { %2764 = vst [vmem:[%s4240_s13 + $0x1a4] sm:$0xff] %v2568_v33  ;;  %v2516_v42 = vpack.c.bf16 %v2199_v28, %v2199_v28  ;;  %v1875_v60 = vmul.f32 %v4218_v32, %v1351_v40  ;;  %v1968_v33 = vmul.f32 %v4218_v32, %v4346_v61 }
 0x275   : > { %v1223_v12 = vpop.f32.mrf.mxu2 }
 0x276   : > { %2712 = vst.msk [vmem:[%s4240_s13 + $0x4c] sm:$0xf] %vm2702_vm1, %v2516_v42  ;;  %v2202_v24 = vadd.f32 %v4228_v58, %v1875_v60  ;;  %v1964_v19 = vmul.f32 %v4218_v32, %v1223_v12  ;;  %v2208_v42 = vadd.f32 %v4228_v58, %v1881_v21  ;;  %v2295_v61 = vadd.f32 %v4228_v58, %v1968_v33 }
 0x277   : > { %v4613_v13 = vpop.f32.mrf.mxu0  ;;  %v1697_v52 = vpop.f32.mrf.mxu1 }
 0x278   : > { %v2518_v45 = vpack.c.bf16 %v2203_v44, %v2202_v24  ;;  %v2291_v31 = vadd.f32 %v4228_v58, %v1964_v19  ;;  %v1877_v48 = vmul.f32 %v4218_v32, %v1697_v52  ;;  %v1886_v52 = vmul.f32 %v4218_v32, %v4348_v8 }
 0x27a   : > { %2714 = vst [vmem:[%s4240_s13 + $0x58] sm:$0xff] %v2518_v45  ;;  %v2571_v53 = vpack.c.bf16 %v2291_v31, %v2290_v3  ;;  %v2204_v6 = vadd.f32 %v4228_v58, %v1877_v48  ;;  %3369 = vmatmul.msk.bf16.gmra.mxu1 %vm549_vm0, %v4100_v4  ;;  %v1973_v48 = vmul.f32 %v4218_v32, %v4364_v16 }
 0x27b   : > { %v1353_v22 = vpop.f32.mrf.mxu3 }
 0x27c   : > { %2767 = vst [vmem:[%s4240_s13 + $0x1b8] sm:$0xff] %v2571_v53  ;;  %v2519_v28 = vpack.c.bf16 %v2204_v6, %v2204_v6  ;;  %v1880_v40 = vmul.f32 %v4218_v32, %v1353_v22  ;;  %v2213_v6 = vadd.f32 %v4228_v58, %v1886_v52  ;;  %v2300_v16 = vadd.f32 %v4228_v58, %v1973_v48 }
 0x27d   : > { %v1225_v26 = vpop.f32.mrf.mxu2 }
 0x27e   : > { %2715 = vst.msk [vmem:[%s4240_s13 + $0x60] sm:$0xf] %vm2702_vm1, %v2519_v28  ;;  %v2207_v39 = vadd.f32 %v4228_v58, %v1880_v40  ;;  %v1969_v60 = vmul.f32 %v4218_v32, %v1225_v26 }
 0x27f   : > { %v4633_v4 = vpop.f32.mrf.mxu0  ;;  %v1699_v12 = vpop.f32.mrf.mxu1 }
 0x280   : > { %v2521_v44 = vpack.c.bf16 %v2208_v42, %v2207_v39  ;;  %v2296_v24 = vadd.f32 %v4228_v58, %v1969_v60  ;;  %v1882_v19 = vmul.f32 %v4218_v32, %v1699_v12  ;;  %3304 = vmatmul.msk.bf16.gmra.mxu3 %vm549_vm0, %v4120_v18  ;;  %v1891_v60 = vmul.f32 %v4218_v32, %v4366_v47 }
 0x282   : > { %2717 = vst [vmem:[%s4240_s13 + $0x6c] sm:$0xff] %v2521_v44  ;;  %v2574_v3 = vpack.c.bf16 %v2296_v24, %v2295_v61  ;;  %v2209_v45 = vadd.f32 %v4228_v58, %v1882_v19  ;;  %3280 = vmatmul.msk.bf16.gmra.mxu2 %vm549_vm0, %v3986_v1  ;;  %3345 = vmatmul.msk.bf16.gmra.mxu0 %vm549_vm0, %v3970_v57 }
 0x283   : > { %v1356_v31 = vpop.f32.mrf.mxu3  ;;  %v1978_v24 = vmul.f32 %v4218_v32, %v4378_v11 }
 0x284   : > { %2770 = vst [vmem:[%s4240_s13 + $0x1cc] sm:$0xff] %v2574_v3  ;;  %v2522_v21 = vpack.c.bf16 %v2209_v45, %v2209_v45  ;;  %v1885_v53 = vmul.f32 %v4218_v32, %v1356_v31  ;;  %v2218_v45 = vadd.f32 %v4228_v58, %v1891_v60 }
 0x285   : > { %v1228_v8 = vpop.f32.mrf.mxu2  ;;  %v2305_v11 = vadd.f32 %v4228_v58, %v1978_v24 }
 0x286   : > { %2718 = vst.msk [vmem:[%s4240_s13 + $0x74] sm:$0xf] %vm2702_vm1, %v2522_v21  ;;  %v2212_v22 = vadd.f32 %v4228_v58, %v1885_v53  ;;  %v1974_v33 = vmul.f32 %v4218_v32, %v1228_v8 }
 0x287   : > { %v4657_v28 = vpop.f32.mrf.mxu0  ;;  %v1702_v40 = vpop.f32.mrf.mxu1 }
 0x288   : > { %v2524_v26 = vpack.c.bf16 %v2213_v6, %v2212_v22  ;;  %v2301_v42 = vadd.f32 %v4228_v58, %v1974_v33  ;;  %v1887_v39 = vmul.f32 %v4218_v32, %v1702_v40  ;;  %v1896_v6 = vmul.f32 %v4218_v32, %v4380_v5 }
 0x28a   : > { %2720 = vst [vmem:[%s4240_s13 + $0x80] sm:$0xff] %v2524_v26  ;;  %v2577_v12 = vpack.c.bf16 %v2301_v42, %v2300_v16  ;;  %v2214_v61 = vadd.f32 %v4228_v58, %v1887_v39  ;;  %3370 = vmatmul.msk.bf16.gmra.mxu1 %vm549_vm0, %v4120_v18  ;;  %v1983_v16 = vmul.f32 %v4218_v32, %v4396_v29 }
 0x28b   : > { %v1358_v44 = vpop.f32.mrf.mxu3  ;;  %v2223_v39 = vadd.f32 %v4228_v58, %v1896_v6 }
 0x28c   : > { %2773 = vst [vmem:[%s4240_s13 + $0x1e0] sm:$0xff] %v2577_v12  ;;  %v2525_v19 = vpack.c.bf16 %v2214_v61, %v2214_v61  ;;  %v1890_v52 = vmul.f32 %v4218_v32, %v1358_v44  ;;  %v2310_v29 = vadd.f32 %v4228_v58, %v1983_v16 }
 0x28d   : > { %v1230_v3 = vpop.f32.mrf.mxu2 }
 0x28e   : > { %2721 = vst.msk [vmem:[%s4240_s13 + $0x88] sm:$0xf] %vm2702_vm1, %v2525_v19  ;;  %v2217_v47 = vadd.f32 %v4228_v58, %v1890_v52  ;;  %v1979_v31 = vmul.f32 %v4218_v32, %v1230_v3  ;;  %v1901_v3 = vmul.f32 %v4218_v32, %v4398_v55 }
 0x28f   : > { %v4677_v18 = vpop.f32.mrf.mxu0  ;;  %v1704_v48 = vpop.f32.mrf.mxu1 }
 0x290   : > { %v2527_v21 = vpack.c.bf16 %v2218_v45, %v2217_v47  ;;  %v2306_v53 = vadd.f32 %v4228_v58, %v1979_v31  ;;  %v1892_v8 = vmul.f32 %v4218_v32, %v1704_v48  ;;  %3305 = vmatmul.msk.bf16.gmra.mxu3 %vm549_vm0, %v4140_v30  ;;  %v1988_v48 = vmul.f32 %v4218_v32, %v4410_v23 }
 0x292   : > { %2723 = vst [vmem:[%s4240_s13 + $0x94] sm:$0xff] %v2527_v21  ;;  %v2580_v22 = vpack.c.bf16 %v2306_v53, %v2305_v11  ;;  %v2219_v33 = vadd.f32 %v4228_v58, %v1892_v8  ;;  %3281 = vmatmul.msk.bf16.gmra.mxu2 %vm549_vm0, %v4002_v9  ;;  %3346 = vmatmul.msk.bf16.gmra.mxu0 %vm549_vm0, %v3986_v1 }
 0x293   : > { %v1361_v40 = vpop.f32.mrf.mxu3  ;;  %v2228_v8 = vadd.f32 %v4228_v58, %v1901_v3  ;;  %v2315_v23 = vadd.f32 %v4228_v58, %v1988_v48  ;;  %v1911_v48 = vmul.f32 %v4218_v32, %v4430_v63 }
 0x294   : > { %2776 = vst [vmem:[%s4240_s13 + $0x1f4] sm:$0xff] %v2580_v22  ;;  %v2528_v26 = vpack.c.bf16 %v2219_v33, %v2219_v33  ;;  %v1895_v42 = vmul.f32 %v4218_v32, %v1361_v40 }
 0x295   : > { %v1233_v5 = vpop.f32.mrf.mxu2 }
 0x296   : > { %2724 = vst.msk [vmem:[%s4240_s13 + $0x9c] sm:$0xf] %vm2702_vm1, %v2528_v26  ;;  %v2222_v60 = vadd.f32 %v4228_v58, %v1895_v42  ;;  %v1984_v12 = vmul.f32 %v4218_v32, %v1233_v5  ;;  %v1906_v26 = vmul.f32 %v4218_v32, %v4412_v62 }
 0x297   : > { %v4701_v61 = vpop.f32.mrf.mxu0  ;;  %v1707_v44 = vpop.f32.mrf.mxu1 }
 0x298   : > { %v2530_v24 = vpack.c.bf16 %v2223_v39, %v2222_v60  ;;  %v2311_v19 = vadd.f32 %v4228_v58, %v1984_v12  ;;  %v1897_v52 = vmul.f32 %v4218_v32, %v1707_v44  ;;  %v1993_v60 = vmul.f32 %v4218_v32, %v4428_v46 }
 0x29a   : > { %2726 = vst [vmem:[%s4240_s13 + $0xa8] sm:$0xff] %v2530_v24  ;;  %v2583_v45 = vpack.c.bf16 %v2311_v19, %v2310_v29  ;;  %v2224_v47 = vadd.f32 %v4228_v58, %v1897_v52  ;;  %3371 = vmatmul.msk.bf16.gmra.mxu1 %vm549_vm0, %v4140_v30  ;;  %v2233_v29 = vadd.f32 %v4228_v58, %v1906_v26 }
 0x29b   : > { %v1363_v31 = vpop.f32.mrf.mxu3  ;;  %v2320_v46 = vadd.f32 %v4228_v58, %v1993_v60 }
 0x29c   : > { %2779 = vst [vmem:[%s4240_s13 + $0x208] sm:$0xff] %v2583_v45  ;;  %v2531_v11 = vpack.c.bf16 %v2224_v47, %v2224_v47  ;;  %v1900_v21 = vmul.f32 %v4218_v32, %v1363_v31 }
 0x29d   : > { %v1235_v53 = vpop.f32.mrf.mxu2 }
 0x29e   : > { %2727 = vst.msk [vmem:[%s4240_s13 + $0xb0] sm:$0xf] %vm2702_vm1, %v2531_v11  ;;  %v2227_v55 = vadd.f32 %v4228_v58, %v1900_v21  ;;  %v1989_v6 = vmul.f32 %v4218_v32, %v1235_v53 }
 0x29f   : > { %v4721_v30 = vpop.f32.mrf.mxu0  ;;  %v1709_v22 = vpop.f32.mrf.mxu1 }
 0x2a0   : > { %v2533_v33 = vpack.c.bf16 %v2228_v8, %v2227_v55  ;;  %v2316_v40 = vadd.f32 %v4228_v58, %v1989_v6  ;;  %v1902_v16 = vmul.f32 %v4218_v32, %v1709_v22  ;;  %3306 = vmatmul.msk.bf16.gmra.mxu3 %vm549_vm0, %v4160_v51  ;;  %v1998_v8 = vmul.f32 %v4218_v32, %v4442_v37 }
 0x2a2   : > { %2729 = vst [vmem:[%s4240_s13 + $0xbc] sm:$0xff] %v2533_v33  ;;  %v2586_v42 = vpack.c.bf16 %v2316_v40, %v2315_v23  ;;  %v2229_v5 = vadd.f32 %v4228_v58, %v1902_v16  ;;  %3282 = vmatmul.msk.bf16.gmra.mxu2 %vm549_vm0, %v4018_v17  ;;  %3347 = vmatmul.msk.bf16.gmra.mxu0 %vm549_vm0, %v4002_v9 }
 0x2a3   : > { %v1366_v39 = vpop.f32.mrf.mxu3  ;;  %v2238_v23 = vadd.f32 %v4228_v58, %v1911_v48  ;;  %v2325_v37 = vadd.f32 %v4228_v58, %v1998_v8 }
 0x2a4   : > { %2782 = vst [vmem:[%s4240_s13 + $0x21c] sm:$0xff] %v2586_v42  ;;  %v2534_v12 = vpack.c.bf16 %v2229_v5, %v2229_v5  ;;  %v1905_v44 = vmul.f32 %v4218_v32, %v1366_v39  ;;  %v1916_v5 = vmul.f32 %v4218_v32, %v4444_v59 }
 0x2a5   : > { %v1238_v62 = vpop.f32.mrf.mxu2 }
 0x2a6   : > { %2730 = vst.msk [vmem:[%s4240_s13 + $0xc4] sm:$0xf] %vm2702_vm1, %v2534_v12  ;;  %v2232_v24 = vadd.f32 %v4228_v58, %v1905_v44  ;;  %v1994_v19 = vmul.f32 %v4218_v32, %v1238_v62  ;;  %v2003_v44 = vmul.f32 %v4218_v32, %v4460_v14 }
 0x2a7   : > { %v4745_v52 = vpop.f32.mrf.mxu0  ;;  %v1712_v3 = vpop.f32.mrf.mxu1 }
 0x2a8   : > { %v2536_v45 = vpack.c.bf16 %v2233_v29, %v2232_v24  ;;  %v2321_v47 = vadd.f32 %v4228_v58, %v1994_v19  ;;  %v1907_v31 = vmul.f32 %v4218_v32, %v1712_v3  ;;  %v2243_v24 = vadd.f32 %v4228_v58, %v1916_v5 }
 0x2a9   : > { %v2330_v14 = vadd.f32 %v4228_v58, %v2003_v44 }
 0x2aa   : > { %2732 = vst [vmem:[%s4240_s13 + $0xd0] sm:$0xff] %v2536_v45  ;;  %v2589_v11 = vpack.c.bf16 %v2321_v47, %v2320_v46  ;;  %v2234_v21 = vadd.f32 %v4228_v58, %v1907_v31  ;;  %3372 = vmatmul.msk.bf16.gmra.mxu1 %vm549_vm0, %v4160_v51 }
 0x2ab   : > { %v1368_v53 = vpop.f32.mrf.mxu3 }
 0x2ac   : > { %2785 = vst [vmem:[%s4240_s13 + $0x230] sm:$0xff] %v2589_v11  ;;  %v2537_v55 = vpack.c.bf16 %v2234_v21, %v2234_v21  ;;  %v1910_v6 = vmul.f32 %v4218_v32, %v1368_v53  ;;  %v1921_v11 = vmul.f32 %v4218_v32, %v4462_v7 }
 0x2ad   : > { %v1240_v22 = vpop.f32.mrf.mxu2 }
 0x2ae   : > { %2733 = vst.msk [vmem:[%s4240_s13 + $0xd8] sm:$0xf] %vm2702_vm1, %v2537_v55  ;;  %v2237_v63 = vadd.f32 %v4228_v58, %v1910_v6  ;;  %v1999_v33 = vmul.f32 %v4218_v32, %v1240_v22  ;;  %v2008_v55 = vmul.f32 %v4218_v32, %v4474_v2 }
 0x2af   : > { %v4765_v51 = vpop.f32.mrf.mxu0  ;;  %v1714_v40 = vpop.f32.mrf.mxu1 }
 0x2b0   : > { %v2539_v16 = vpack.c.bf16 %v2238_v23, %v2237_v63  ;;  %v2326_v26 = vadd.f32 %v4228_v58, %v1999_v33  ;;  %v1912_v42 = vmul.f32 %v4218_v32, %v1714_v40  ;;  %3307 = vmatmul.msk.bf16.gmra.mxu3 %vm549_vm0, %v4180_v20  ;;  %v2248_v63 = vadd.f32 %v4228_v58, %v1921_v11 }
 0x2b1   : > { %v2335_v2 = vadd.f32 %v4228_v58, %v2008_v55 }
 0x2b2   : > { %2735 = vst [vmem:[%s4240_s13 + $0xe4] sm:$0xff] %v2539_v16  ;;  %v2592_v39 = vpack.c.bf16 %v2326_v26, %v2325_v37  ;;  %v2239_v60 = vadd.f32 %v4228_v58, %v1912_v42  ;;  %3283 = vmatmul.msk.bf16.gmra.mxu2 %vm549_vm0, %v4037_v27  ;;  %3348 = vmatmul.msk.bf16.gmra.mxu0 %vm549_vm0, %v4018_v17 }
 0x2b3   : > { %v1371_v12 = vpop.f32.mrf.mxu3  ;;  %v1926_v42 = vmul.f32 %v4218_v32, %v4476_v56 }
 0x2b4   : > { %2788 = vst [vmem:[%s4240_s13 + $0x244] sm:$0xff] %v2592_v39  ;;  %v2540_v62 = vpack.c.bf16 %v2239_v60, %v2239_v60  ;;  %v1915_v29 = vmul.f32 %v4218_v32, %v1371_v12  ;;  %v2013_v12 = vmul.f32 %v4218_v32, %v4492_v0 }
 0x2b5   : > { %v1243_v59 = vpop.f32.mrf.mxu2 }
 0x2b6   : > { %2736 = vst.msk [vmem:[%s4240_s13 + $0xec] sm:$0xf] %vm2702_vm1, %v2540_v62  ;;  %v2242_v19 = vadd.f32 %v4228_v58, %v1915_v29  ;;  %v2004_v3 = vmul.f32 %v4218_v32, %v1243_v59  ;;  %v2253_v29 = vadd.f32 %v4228_v58, %v1926_v42  ;;  %v2340_v0 = vadd.f32 %v4228_v58, %v2013_v12 }
 0x2b7   : > { %v4789_v46 = vpop.f32.mrf.mxu0  ;;  %v1717_v45 = vpop.f32.mrf.mxu1 }
 0x2b8   : > { %v2542_v47 = vpack.c.bf16 %v2243_v24, %v2242_v19  ;;  %v2331_v31 = vadd.f32 %v4228_v58, %v2004_v3  ;;  %v1917_v48 = vmul.f32 %v4218_v32, %v1717_v45 }
 0x2ba   : > { %2738 = vst [vmem:[%s4240_s13 + $0xf8] sm:$0xff] %v2542_v47  ;;  %v2595_v21 = vpack.c.bf16 %v2331_v31, %v2330_v14  ;;  %v2244_v53 = vadd.f32 %v4228_v58, %v1917_v48  ;;  %3373 = vmatmul.msk.bf16.gmra.mxu1 %vm549_vm0, %v4180_v20  ;;  %v1931_v31 = vmul.f32 %v4218_v32, %v4494_v15 }
 0x2bb   : > { %v1373_v8 = vpop.f32.mrf.mxu3 }
 0x2bc   : > { %2791 = vst [vmem:[%s4240_s13 + $0x258] sm:$0xff] %v2595_v21  ;;  %v2543_v6 = vpack.c.bf16 %v2244_v53, %v2244_v53  ;;  %v1920_v22 = vmul.f32 %v4218_v32, %v1373_v8  ;;  %v2018_v53 = vmul.f32 %v4218_v32, %v4504_v36 }
 0x2bd   : > { %v1245_v23 = vpop.f32.mrf.mxu2 }
 0x2be   : > { %2739 = vst.msk [vmem:[%s4240_s13 + $0x100] sm:$0xf] %vm2702_vm1, %v2543_v6  ;;  %v2247_v7 = vadd.f32 %v4228_v58, %v1920_v22  ;;  %v2009_v33 = vmul.f32 %v4218_v32, %v1245_v23  ;;  %v2258_v22 = vadd.f32 %v4228_v58, %v1931_v31  ;;  %v2345_v36 = vadd.f32 %v4228_v58, %v2018_v53 }
 0x2bf   : > { %v4809_v20 = vpop.f32.mrf.mxu0  ;;  %v1719_v40 = vpop.f32.mrf.mxu1 }
 0x2c0   : > { %v2545_v37 = vpack.c.bf16 %v2248_v63, %v2247_v7  ;;  %v2336_v16 = vadd.f32 %v4228_v58, %v2009_v33  ;;  %v1922_v26 = vmul.f32 %v4218_v32, %v1719_v40  ;;  %3308 = vmatmul.msk.bf16.gmra.mxu3 %vm549_vm0, %v4202_v10 }
 0x2c2   : > { %2741 = vst [vmem:[%s4240_s13 + $0x10c] sm:$0xff] %v2545_v37  ;;  %v2598_v5 = vpack.c.bf16 %v2336_v16, %v2335_v2  ;;  %v2249_v39 = vadd.f32 %v4228_v58, %v1922_v26  ;;  %3284 = vmatmul.msk.bf16.gmra.mxu2 %vm549_vm0, %v4050_v35  ;;  %3349 = vmatmul.msk.bf16.gmra.mxu0 %vm549_vm0, %v4037_v27  ;;  %v5804_v26 = vld [vmem:[#allocation17_spill] sm:$0xff] }
 0x2c3   : > { %v1376_v60 = vpop.f32.mrf.mxu3  ;;  %v1936_v2 = vmul.f32 %v4218_v32, %v4506_v50 }
 0x2c4   : > { %2794 = vst [vmem:[%s4240_s13 + $0x26c] sm:$0xff] %v2598_v5  ;;  %v2546_v44 = vpack.c.bf16 %v2249_v39, %v2249_v39  ;;  %v1925_v62 = vmul.f32 %v4218_v32, %v1376_v60  ;;  %v5805_v5 = vld [vmem:[#allocation18_spill] sm:$0xff] }
 0x2c5   : > { %v1248_v56 = vpop.f32.mrf.mxu2  ;;  %v2023_v39 = vmul.f32 %v4218_v32, %v5805_v5 }
 0x2c6   : > { %2742 = vst.msk [vmem:[%s4240_s13 + $0x114] sm:$0xf] %vm2702_vm1, %v2546_v44  ;;  %v2252_v59 = vadd.f32 %v4228_v58, %v1925_v62  ;;  %v2014_v24 = vmul.f32 %v4218_v32, %v1248_v56  ;;  %v2263_v44 = vadd.f32 %v4228_v58, %v1936_v2 }
 0x2c7   : > { %v4833_v19 = vpop.f32.mrf.mxu0  ;;  %v1722_v3 = vpop.f32.mrf.mxu1 }
 0x2c8   : > { %v2548_v45 = vpack.c.bf16 %v2253_v29, %v2252_v59  ;;  %v2341_v14 = vadd.f32 %v4228_v58, %v2014_v24  ;;  %v1927_v47 = vmul.f32 %v4218_v32, %v1722_v3  ;;  %v2350_v24 = vadd.f32 %v4228_v58, %v2023_v39 }
 0x2ca   : > { %2744 = vst [vmem:[%s4240_s13 + $0x120] sm:$0xff] %v2548_v45  ;;  %v2601_v48 = vpack.c.bf16 %v2341_v14, %v2340_v0  ;;  %v2254_v11 = vadd.f32 %v4228_v58, %v1927_v47  ;;  %3374 = vmatmul.msk.bf16.gmra.mxu1 %vm549_vm0, %v4202_v10  ;;  %v1941_v14 = vmul.f32 %v4218_v32, %v4525_v25 }
 0x2cb   : > { %v1378_v21 = vpop.f32.mrf.mxu3 }
 0x2cc   : > { %2797 = vst [vmem:[%s4240_s13 + $0x280] sm:$0xff] %v2601_v48  ;;  %v2549_v8 = vpack.c.bf16 %v2254_v11, %v2254_v11  ;;  %v1930_v55 = vmul.f32 %v4218_v32, %v1378_v21  ;;  %v5806_v11 = vld [vmem:[#allocation19_spill] sm:$0xff] }
 0x2cd   : > { %v1250_v6 = vpop.f32.mrf.mxu2  ;;  %v2028_v21 = vmul.f32 %v4218_v32, %v5806_v11 }
 0x2ce   : > { %2745 = vst.msk [vmem:[%s4240_s13 + $0x128] sm:$0xf] %vm2702_vm1, %v2549_v8  ;;  %v2257_v15 = vadd.f32 %v4228_v58, %v1930_v55  ;;  %v2019_v23 = vmul.f32 %v4218_v32, %v1250_v6  ;;  %v2268_v6 = vadd.f32 %v4228_v58, %v1941_v14 }
 0x2cf   : > { %v4853_v10 = vpop.f32.mrf.mxu0  ;;  %v1724_v63 = vpop.f32.mrf.mxu1 }
 0x2d0   : > { %v2551_v7 = vpack.c.bf16 %v2258_v22, %v2257_v15  ;;  %v2346_v33 = vadd.f32 %v4228_v58, %v2019_v23  ;;  %v1932_v40 = vmul.f32 %v4218_v32, %v1724_v63  ;;  %3309 = vmatmul.msk.bf16.gmra.mxu3 %vm549_vm0, %v4235_v34  ;;  %v2355_v23 = vadd.f32 %v4228_v58, %v2028_v21 }
 0x2d2   : > { %2747 = vst [vmem:[%s4240_s13 + $0x134] sm:$0xff] %v2551_v7  ;;  %v2604_v37 = vpack.c.bf16 %v2346_v33, %v2345_v36  ;;  %v2259_v16 = vadd.f32 %v4228_v58, %v1932_v40  ;;  %3285 = vmatmul.msk.bf16.gmra.mxu2 %vm549_vm0, %v5804_v26  ;;  %3350 = vmatmul.msk.bf16.gmra.mxu0 %vm549_vm0, %v4050_v35 }
 0x2d3   : > { %v1381_v42 = vpop.f32.mrf.mxu3  ;;  %v1946_v33 = vmul.f32 %v4218_v32, %v4545_v43 }
 0x2d4   : > { %2800 = vst [vmem:[%s4240_s13 + $0x294] sm:$0xff] %v2604_v37  ;;  %v2552_v60 = vpack.c.bf16 %v2259_v16, %v2259_v16  ;;  %v1935_v12 = vmul.f32 %v4218_v32, %v1381_v42  ;;  %v5807_v37 = vld [vmem:[#allocation20_spill] sm:$0xff]  ;;  %v5808_v42 = vld [vmem:[#allocation21_spill] sm:$0xff] }
 0x2d5   : > { %v1253_v50 = vpop.f32.mrf.mxu2  ;;  %v2033_v5 = vmul.f32 %v4218_v32, %v5808_v42 }
 0x2d6   : > { %2748 = vst.msk [vmem:[%s4240_s13 + $0x13c] sm:$0xf] %vm2702_vm1, %v2552_v60  ;;  %v2262_v62 = vadd.f32 %v4228_v58, %v1935_v12  ;;  %v2024_v56 = vmul.f32 %v4218_v32, %v1253_v50  ;;  %v2273_v12 = vadd.f32 %v4228_v58, %v1946_v33 }
 0x2d7   : > { %v4877_v29 = vpop.f32.mrf.mxu0  ;;  %v1727_v59 = vpop.f32.mrf.mxu1 }
 0x2d8   : > { %v2554_v3 = vpack.c.bf16 %v2263_v44, %v2262_v62  ;;  %v2351_v0 = vadd.f32 %v4228_v58, %v2024_v56  ;;  %v1937_v45 = vmul.f32 %v4218_v32, %v1727_v59  ;;  %v2360_v59 = vadd.f32 %v4228_v58, %v2033_v5 }
 0x2da   : > { %2750 = vst [vmem:[%s4240_s13 + $0x148] sm:$0xff] %v2554_v3  ;;  %v2607_v47 = vpack.c.bf16 %v2351_v0, %v2350_v24  ;;  %v2264_v31 = vadd.f32 %v4228_v58, %v1937_v45  ;;  %3375 = vmatmul.msk.bf16.gmra.mxu1 %vm549_vm0, %v4235_v34  ;;  %v1951_v45 = vmul.f32 %v4218_v32, %v4569_v38 }
 0x2db   : > { %v1383_v48 = vpop.f32.mrf.mxu3 }
 0x2dc   : > { %2803 = vst [vmem:[%s4240_s13 + $0x2a8] sm:$0xff] %v2607_v47  ;;  %v2555_v53 = vpack.c.bf16 %v2264_v31, %v2264_v31  ;;  %v1940_v8 = vmul.f32 %v4218_v32, %v1383_v48  ;;  %v5809_v48 = vld [vmem:[#allocation22_spill] sm:$0xff] }
 0x2dd   : > { %v1255_v55 = vpop.f32.mrf.mxu2  ;;  %v2038_v11 = vmul.f32 %v4218_v32, %v5809_v48 }
 0x2de   : > { %2751 = vst.msk [vmem:[%s4240_s13 + $0x150] sm:$0xf] %vm2702_vm1, %v2555_v53  ;;  %v2267_v25 = vadd.f32 %v4228_v58, %v1940_v8  ;;  %v2029_v22 = vmul.f32 %v4218_v32, %v1255_v55  ;;  %v2278_v55 = vadd.f32 %v4228_v58, %v1951_v45 }
 0x2df   : > { %v4897_v34 = vpop.f32.mrf.mxu0  ;;  %v1729_v15 = vpop.f32.mrf.mxu1 }
 0x2e0   : > { %v2557_v63 = vpack.c.bf16 %v2268_v6, %v2267_v25  ;;  %v2356_v36 = vadd.f32 %v4228_v58, %v2029_v22  ;;  %v1942_v7 = vmul.f32 %v4218_v32, %v1729_v15  ;;  %3310 = vmatmul.msk.bf16.gmra.mxu3 %vm549_vm0, %v3938_v41  ;;  %v2365_v22 = vadd.f32 %v4228_v58, %v2038_v11 }
 0x2e2   : > { %2753 = vst [vmem:[%s4240_s13 + $0x15c] sm:$0xff] %v2557_v63  ;;  %v2610_v40 = vpack.c.bf16 %v2356_v36, %v2355_v23  ;;  %v2269_v2 = vadd.f32 %v4228_v58, %v1942_v7  ;;  %3286 = vmatmul.msk.bf16.gmra.mxu2 %vm549_vm0, %v5807_v37  ;;  %3351 = vmatmul.msk.bf16.gmra.mxu0 %vm549_vm0, %v5804_v26 }
 0x2e3   : > { %v1386_v16 = vpop.f32.mrf.mxu3  ;;  %v1956_v36 = vmul.f32 %v4218_v32, %v4589_v54 }
 0x2e4   : > { %2806 = vst [vmem:[%s4240_s13 + $0x2bc] sm:$0xff] %v2610_v40  ;;  %v2558_v39 = vpack.c.bf16 %v2269_v2, %v2269_v2  ;;  %v1945_v60 = vmul.f32 %v4218_v32, %v1386_v16  ;;  %v5810_v40 = vld [vmem:[#allocation23_spill] sm:$0xff]  ;;  %v5811_v16 = vld [vmem:[#allocation24_spill] sm:$0xff] }
 0x2e5   : > { %v1258_v43 = vpop.f32.mrf.mxu2  ;;  %v2043_v42 = vmul.f32 %v4218_v32, %v5811_v16 }
 0x2e6   : > { %2754 = vst.msk [vmem:[%s4240_s13 + $0x164] sm:$0xf] %vm2702_vm1, %v2558_v39  ;;  %v2272_v50 = vadd.f32 %v4228_v58, %v1945_v60  ;;  %v2034_v44 = vmul.f32 %v4218_v32, %v1258_v43  ;;  %v2283_v60 = vadd.f32 %v4228_v58, %v1956_v36 }
 0x2e7   : > { %v4921_v62 = vpop.f32.mrf.mxu0  ;;  %v1732_v56 = vpop.f32.mrf.mxu1 }
 0x2e8   : > { %v2560_v24 = vpack.c.bf16 %v2273_v12, %v2272_v50  ;;  %v2361_v3 = vadd.f32 %v4228_v58, %v2034_v44  ;;  %v1947_v0 = vmul.f32 %v4218_v32, %v1732_v56  ;;  %v2370_v56 = vadd.f32 %v4228_v58, %v2043_v42 }
 0x2ea   : > { %2756 = vst [vmem:[%s4240_s13 + $0x170] sm:$0xff] %v2560_v24  ;;  %v2613_v14 = vpack.c.bf16 %v2361_v3, %v2360_v59  ;;  %v2274_v47 = vadd.f32 %v4228_v58, %v1947_v0  ;;  %3376 = vmatmul.msk.bf16.gmra.mxu1 %vm549_vm0, %v3938_v41  ;;  %v1961_v0 = vmul.f32 %v4218_v32, %v4613_v13 }
 0x2eb   : > { %v1388_v31 = vpop.f32.mrf.mxu3 }
 0x2ec   : > { %2809 = vst [vmem:[%s4240_s13 + $0x2d0] sm:$0xff] %v2613_v14  ;;  %v2561_v21 = vpack.c.bf16 %v2274_v47, %v2274_v47  ;;  %v1950_v53 = vmul.f32 %v4218_v32, %v1388_v31  ;;  %v5812_v31 = vld [vmem:[#allocation25_spill] sm:$0xff] }
 0x2ed   : > { %v1260_v8 = vpop.f32.mrf.mxu2  ;;  %v2048_v48 = vmul.f32 %v4218_v32, %v5812_v31 }
 0x2ee   : > { %2757 = vst.msk [vmem:[%s4240_s13 + $0x178] sm:$0xf] %vm2702_vm1, %v2561_v21  ;;  %v2277_v38 = vadd.f32 %v4228_v58, %v1950_v53  ;;  %v2039_v6 = vmul.f32 %v4218_v32, %v1260_v8  ;;  %v2288_v8 = vadd.f32 %v4228_v58, %v1961_v0 }
 0x2ef   : > { %v4941_v41 = vpop.f32.mrf.mxu0  ;;  %v1734_v25 = vpop.f32.mrf.mxu1 }
 0x2f0   : > { %v2563_v15 = vpack.c.bf16 %v2278_v55, %v2277_v38  ;;  %v2366_v23 = vadd.f32 %v4228_v58, %v2039_v6  ;;  %v1952_v63 = vmul.f32 %v4218_v32, %v1734_v25  ;;  %3311 = vmatmul.msk.bf16.gmra.mxu3 %vm549_vm0, %v3954_v49  ;;  %v2375_v6 = vadd.f32 %v4228_v58, %v2048_v48 }
 0x2f2   : > { %2759 = vst [vmem:[%s4240_s13 + $0x184] sm:$0xff] %v2563_v15  ;;  %v2616_v7 = vpack.c.bf16 %v2366_v23, %v2365_v22  ;;  %v2279_v33 = vadd.f32 %v4228_v58, %v1952_v63  ;;  %3287 = vmatmul.msk.bf16.gmra.mxu2 %vm549_vm0, %v5810_v40  ;;  %3352 = vmatmul.msk.bf16.gmra.mxu0 %vm549_vm0, %v5807_v37 }
 0x2f3   : > { %v1391_v2 = vpop.f32.mrf.mxu3  ;;  %v1966_v23 = vmul.f32 %v4218_v32, %v4633_v4 }
 0x2f4   : > { %2812 = vst [vmem:[%s4240_s13 + $0x2e4] sm:$0xff] %v2616_v7  ;;  %v2564_v5 = vpack.c.bf16 %v2279_v33, %v2279_v33  ;;  %v1955_v39 = vmul.f32 %v4218_v32, %v1391_v2  ;;  %v5813_v7 = vld [vmem:[#allocation26_spill] sm:$0xff]  ;;  %v5814_v2 = vld [vmem:[#allocation27_spill] sm:$0xff] }
 0x2f5   : > { %v1263_v54 = vpop.f32.mrf.mxu2  ;;  %v2053_v16 = vmul.f32 %v4218_v32, %v5814_v2 }
 0x2f6   : > { %2760 = vst.msk [vmem:[%s4240_s13 + $0x18c] sm:$0xf] %vm2702_vm1, %v2564_v5  ;;  %v2282_v43 = vadd.f32 %v4228_v58, %v1955_v39  ;;  %v2044_v12 = vmul.f32 %v4218_v32, %v1263_v54  ;;  %v2293_v39 = vadd.f32 %v4228_v58, %v1966_v23 }
 0x2f7   : > { %v4965_v50 = vpop.f32.mrf.mxu0  ;;  %v1737_v44 = vpop.f32.mrf.mxu1 }
 0x2f8   : > { %v2566_v59 = vpack.c.bf16 %v2283_v60, %v2282_v43  ;;  %v2371_v24 = vadd.f32 %v4228_v58, %v2044_v12  ;;  %v1957_v3 = vmul.f32 %v4218_v32, %v1737_v44  ;;  %v2380_v44 = vadd.f32 %v4228_v58, %v2053_v16 }
 0x2fa   : > { %2762 = vst [vmem:[%s4240_s13 + $0x198] sm:$0xff] %v2566_v59  ;;  %v2619_v45 = vpack.c.bf16 %v2371_v24, %v2370_v56  ;;  %v2284_v14 = vadd.f32 %v4228_v58, %v1957_v3  ;;  %3377 = vmatmul.msk.bf16.gmra.mxu1 %vm549_vm0, %v3954_v49  ;;  %v1971_v3 = vmul.f32 %v4218_v32, %v4657_v28 }
 0x2fb   : > { %v1393_v47 = vpop.f32.mrf.mxu3 }
 0x2fc   : > { %2815 = vst [vmem:[%s4240_s13 + $0x2f8] sm:$0xff] %v2619_v45  ;;  %v2567_v11 = vpack.c.bf16 %v2284_v14, %v2284_v14  ;;  %v1960_v21 = vmul.f32 %v4218_v32, %v1393_v47  ;;  %v5815_v47 = vld [vmem:[#allocation28_spill] sm:$0xff] }
 0x2fd   : > { %v1265_v53 = vpop.f32.mrf.mxu2  ;;  %v2058_v31 = vmul.f32 %v4218_v32, %v5815_v47 }
 0x2fe   : > { %2763 = vst.msk [vmem:[%s4240_s13 + $0x1a0] sm:$0xf] %vm2702_vm1, %v2567_v11  ;;  %v2287_v13 = vadd.f32 %v4228_v58, %v1960_v21  ;;  %v2049_v55 = vmul.f32 %v4218_v32, %v1265_v53  ;;  %v2298_v53 = vadd.f32 %v4228_v58, %v1971_v3 }
 0x2ff   : > { %v4985_v49 = vpop.f32.mrf.mxu0  ;;  %v1739_v38 = vpop.f32.mrf.mxu1 }
 0x300   : > { %v2569_v25 = vpack.c.bf16 %v2288_v8, %v2287_v13  ;;  %v2376_v22 = vadd.f32 %v4228_v58, %v2049_v55  ;;  %v1962_v15 = vmul.f32 %v4218_v32, %v1739_v38  ;;  %3312 = vmatmul.msk.bf16.gmra.mxu3 %vm549_vm0, %v3970_v57  ;;  %v2385_v55 = vadd.f32 %v4228_v58, %v2058_v31 }
 0x302   : > { %2765 = vst [vmem:[%s4240_s13 + $0x1ac] sm:$0xff] %v2569_v25  ;;  %v2622_v63 = vpack.c.bf16 %v2376_v22, %v2375_v6  ;;  %v2289_v36 = vadd.f32 %v4228_v58, %v1962_v15  ;;  %3288 = vmatmul.msk.bf16.gmra.mxu2 %vm549_vm0, %v5813_v7  ;;  %3353 = vmatmul.msk.bf16.gmra.mxu0 %vm549_vm0, %v5810_v40 }
 0x303   : > { %v1396_v33 = vpop.f32.mrf.mxu3  ;;  %v1976_v22 = vmul.f32 %v4218_v32, %v4677_v18 }
 0x304   : > { %2818 = vst [vmem:[%s4240_s13 + $0x30c] sm:$0xff] %v2622_v63  ;;  %v2570_v42 = vpack.c.bf16 %v2289_v36, %v2289_v36  ;;  %v1965_v5 = vmul.f32 %v4218_v32, %v1396_v33  ;;  %v5816_v63 = vld [vmem:[#allocation29_spill] sm:$0xff]  ;;  %v5817_v33 = vld [vmem:[#allocation30_spill] sm:$0xff] }
 0x305   : > { %v1268_v4 = vpop.f32.mrf.mxu2  ;;  %v2063_v2 = vmul.f32 %v4218_v32, %v5817_v33 }
 0x306   : > { %2766 = vst.msk [vmem:[%s4240_s13 + $0x1b4] sm:$0xf] %vm2702_vm1, %v2570_v42  ;;  %v2292_v54 = vadd.f32 %v4228_v58, %v1965_v5  ;;  %v2054_v60 = vmul.f32 %v4218_v32, %v1268_v4  ;;  %v2303_v5 = vadd.f32 %v4228_v58, %v1976_v22 }
 0x307   : > { %v5009_v43 = vpop.f32.mrf.mxu0  ;;  %v1742_v12 = vpop.f32.mrf.mxu1 }
 0x308   : > { %v2572_v56 = vpack.c.bf16 %v2293_v39, %v2292_v54  ;;  %v2381_v59 = vadd.f32 %v4228_v58, %v2054_v60  ;;  %v1967_v24 = vmul.f32 %v4218_v32, %v1742_v12  ;;  %v2390_v12 = vadd.f32 %v4228_v58, %v2063_v2 }
 0x30a   : > { %2768 = vst [vmem:[%s4240_s13 + $0x1c0] sm:$0xff] %v2572_v56  ;;  %v2625_v0 = vpack.c.bf16 %v2381_v59, %v2380_v44  ;;  %v2294_v45 = vadd.f32 %v4228_v58, %v1967_v24  ;;  %3378 = vmatmul.msk.bf16.gmra.mxu1 %vm549_vm0, %v3970_v57  ;;  %v1981_v24 = vmul.f32 %v4218_v32, %v4701_v61 }
 0x30b   : > { %v1398_v14 = vpop.f32.mrf.mxu3 }
 0x30c   : > { %2821 = vst [vmem:[%s4240_s13 + $0x320] sm:$0xff] %v2625_v0  ;;  %v2573_v48 = vpack.c.bf16 %v2294_v45, %v2294_v45  ;;  %v1970_v11 = vmul.f32 %v4218_v32, %v1398_v14  ;;  %v5818_v14 = vld [vmem:[#allocation31_spill] sm:$0xff] }
 0x30d   : > { %v1270_v21 = vpop.f32.mrf.mxu2  ;;  %v2068_v47 = vmul.f32 %v4218_v32, %v5818_v14 }
 0x30e   : > { %2769 = vst.msk [vmem:[%s4240_s13 + $0x1c8] sm:$0xf] %vm2702_vm1, %v2573_v48  ;;  %v2297_v28 = vadd.f32 %v4228_v58, %v1970_v11  ;;  %v2059_v8 = vmul.f32 %v4218_v32, %v1270_v21  ;;  %v2308_v21 = vadd.f32 %v4228_v58, %v1981_v24 }
 0x30f   : > { %v5029_v57 = vpop.f32.mrf.mxu0  ;;  %v1744_v13 = vpop.f32.mrf.mxu1 }
 0x310   : > { %v2575_v38 = vpack.c.bf16 %v2298_v53, %v2297_v28  ;;  %v2386_v6 = vadd.f32 %v4228_v58, %v2059_v8  ;;  %v1972_v25 = vmul.f32 %v4218_v32, %v1744_v13  ;;  %3313 = vmatmul.msk.bf16.gmra.mxu3 %vm549_vm0, %v3986_v1  ;;  %v2395_v8 = vadd.f32 %v4228_v58, %v2068_v47 }
 0x312   : > { %2771 = vst [vmem:[%s4240_s13 + $0x1d4] sm:$0xff] %v2575_v38  ;;  %v2628_v15 = vpack.c.bf16 %v2386_v6, %v2385_v55  ;;  %v2299_v23 = vadd.f32 %v4228_v58, %v1972_v25  ;;  %3289 = vmatmul.msk.bf16.gmra.mxu2 %vm549_vm0, %v5816_v63  ;;  %3354 = vmatmul.msk.bf16.gmra.mxu0 %vm549_vm0, %v5813_v7 }
 0x313   : > { %v1401_v36 = vpop.f32.mrf.mxu3  ;;  %v1986_v6 = vmul.f32 %v4218_v32, %v4721_v30 }
 0x314   : > { %2824 = vst [vmem:[%s4240_s13 + $0x334] sm:$0xff] %v2628_v15  ;;  %v2576_v16 = vpack.c.bf16 %v2299_v23, %v2299_v23  ;;  %v1975_v42 = vmul.f32 %v4218_v32, %v1401_v36  ;;  %v5819_v15 = vld [vmem:[#allocation32_spill] sm:$0xff]  ;;  %v5820_v36 = vld [vmem:[#allocation33_spill] sm:$0xff] }
 0x315   : > { %v1273_v18 = vpop.f32.mrf.mxu2  ;;  %v2073_v33 = vmul.f32 %v4218_v32, %v5820_v36 }
 0x316   : > { %2772 = vst.msk [vmem:[%s4240_s13 + $0x1dc] sm:$0xf] %vm2702_vm1, %v2576_v16  ;;  %v2302_v4 = vadd.f32 %v4228_v58, %v1975_v42  ;;  %v2064_v39 = vmul.f32 %v4218_v32, %v1273_v18  ;;  %v2313_v42 = vadd.f32 %v4228_v58, %v1986_v6 }
 0x317   : > { %v5053_v54 = vpop.f32.mrf.mxu0  ;;  %v1747_v60 = vpop.f32.mrf.mxu1 }
 0x318   : > { %v2578_v44 = vpack.c.bf16 %v2303_v5, %v2302_v4  ;;  %v2391_v56 = vadd.f32 %v4228_v58, %v2064_v39  ;;  %v1977_v59 = vmul.f32 %v4218_v32, %v1747_v60  ;;  %v2400_v60 = vadd.f32 %v4228_v58, %v2073_v33 }
 0x31a   : > { %2774 = vst [vmem:[%s4240_s13 + $0x1e8] sm:$0xff] %v2578_v44  ;;  %v2631_v3 = vpack.c.bf16 %v2391_v56, %v2390_v12  ;;  %v2304_v0 = vadd.f32 %v4228_v58, %v1977_v59  ;;  %3379 = vmatmul.msk.bf16.gmra.mxu1 %vm549_vm0, %v3986_v1  ;;  %v1991_v59 = vmul.f32 %v4218_v32, %v4745_v52 }
 0x31b   : > { %v1403_v45 = vpop.f32.mrf.mxu3 }
 0x31c   : > { %2827 = vst [vmem:[%s4240_s13 + $0x348] sm:$0xff] %v2631_v3  ;;  %v2579_v31 = vpack.c.bf16 %v2304_v0, %v2304_v0  ;;  %v1980_v48 = vmul.f32 %v4218_v32, %v1403_v45  ;;  %v5821_v45 = vld [vmem:[#allocation34_spill] sm:$0xff] }
 0x31d   : > { %v1275_v11 = vpop.f32.mrf.mxu2  ;;  %v2078_v14 = vmul.f32 %v4218_v32, %v5821_v45 }
 0x31e   : > { %2775 = vst.msk [vmem:[%s4240_s13 + $0x1f0] sm:$0xf] %vm2702_vm1, %v2579_v31  ;;  %v2307_v61 = vadd.f32 %v4228_v58, %v1980_v48  ;;  %v2069_v53 = vmul.f32 %v4218_v32, %v1275_v11  ;;  %v2318_v11 = vadd.f32 %v4228_v58, %v1991_v59 }
 0x31f   : > { %v5073_v1 = vpop.f32.mrf.mxu0  ;;  %v1749_v28 = vpop.f32.mrf.mxu1 }
 0x320   : > { %v2581_v13 = vpack.c.bf16 %v2308_v21, %v2307_v61  ;;  %v2396_v55 = vadd.f32 %v4228_v58, %v2069_v53  ;;  %v1982_v38 = vmul.f32 %v4218_v32, %v1749_v28  ;;  %3314 = vmatmul.msk.bf16.gmra.mxu3 %vm549_vm0, %v4002_v9  ;;  %v2405_v53 = vadd.f32 %v4228_v58, %v2078_v14 }
 0x322   : > { %2777 = vst [vmem:[%s4240_s13 + $0x1fc] sm:$0xff] %v2581_v13  ;;  %v2634_v25 = vpack.c.bf16 %v2396_v55, %v2395_v8  ;;  %v2309_v22 = vadd.f32 %v4228_v58, %v1982_v38  ;;  %3290 = vmatmul.msk.bf16.gmra.mxu2 %vm549_vm0, %v5819_v15  ;;  %3355 = vmatmul.msk.bf16.gmra.mxu0 %vm549_vm0, %v5816_v63 }
 0x323   : > { %v1406_v23 = vpop.f32.mrf.mxu3  ;;  %v1996_v55 = vmul.f32 %v4218_v32, %v4765_v51 }
 0x324   : > { %2830 = vst [vmem:[%s4240_s13 + $0x35c] sm:$0xff] %v2634_v25  ;;  %v2582_v2 = vpack.c.bf16 %v2309_v22, %v2309_v22  ;;  %v1985_v16 = vmul.f32 %v4218_v32, %v1406_v23  ;;  %v5822_v25 = vld [vmem:[#allocation35_spill] sm:$0xff]  ;;  %v5823_v23 = vld [vmem:[#allocation36_spill] sm:$0xff] }
 0x325   : > { %v1278_v30 = vpop.f32.mrf.mxu2  ;;  %v2083_v36 = vmul.f32 %v4218_v32, %v5823_v23 }
 0x326   : > { %2778 = vst.msk [vmem:[%s4240_s13 + $0x204] sm:$0xf] %vm2702_vm1, %v2582_v2  ;;  %v2312_v18 = vadd.f32 %v4228_v58, %v1985_v16  ;;  %v2074_v5 = vmul.f32 %v4218_v32, %v1278_v30  ;;  %v2323_v16 = vadd.f32 %v4228_v58, %v1996_v55 }
 0x327   : > { %v5097_v4 = vpop.f32.mrf.mxu0  ;;  %v1752_v39 = vpop.f32.mrf.mxu1 }
 0x328   : > { %v2584_v12 = vpack.c.bf16 %v2313_v42, %v2312_v18  ;;  %v2401_v44 = vadd.f32 %v4228_v58, %v2074_v5  ;;  %v1987_v56 = vmul.f32 %v4218_v32, %v1752_v39  ;;  %v2410_v39 = vadd.f32 %v4228_v58, %v2083_v36 }
 0x32a   : > { %2780 = vst [vmem:[%s4240_s13 + $0x210] sm:$0xff] %v2584_v12  ;;  %v2637_v24 = vpack.c.bf16 %v2401_v44, %v2400_v60  ;;  %v2314_v3 = vadd.f32 %v4228_v58, %v1987_v56  ;;  %3380 = vmatmul.msk.bf16.gmra.mxu1 %vm549_vm0, %v4002_v9  ;;  %v2001_v56 = vmul.f32 %v4218_v32, %v4789_v46 }
 0x32b   : > { %v1408_v0 = vpop.f32.mrf.mxu3 }
 0x32c   : > { %2833 = vst [vmem:[%s4240_s13 + $0x370] sm:$0xff] %v2637_v24  ;;  %v2585_v47 = vpack.c.bf16 %v2314_v3, %v2314_v3  ;;  %v1990_v31 = vmul.f32 %v4218_v32, %v1408_v0  ;;  %v5824_v0 = vld [vmem:[#allocation37_spill] sm:$0xff] }
 0x32d   : > { %v1280_v48 = vpop.f32.mrf.mxu2  ;;  %v2088_v45 = vmul.f32 %v4218_v32, %v5824_v0 }
 0x32e   : > { %2781 = vst.msk [vmem:[%s4240_s13 + $0x218] sm:$0xf] %vm2702_vm1, %v2585_v47  ;;  %v2317_v52 = vadd.f32 %v4228_v58, %v1990_v31  ;;  %v2079_v21 = vmul.f32 %v4218_v32, %v1280_v48  ;;  %v2328_v48 = vadd.f32 %v4228_v58, %v2001_v56 }
 0x32f   : > { %v5117_v9 = vpop.f32.mrf.mxu0  ;;  %v1754_v61 = vpop.f32.mrf.mxu1 }
 0x330   : > { %v2587_v28 = vpack.c.bf16 %v2318_v11, %v2317_v52  ;;  %v2406_v8 = vadd.f32 %v4228_v58, %v2079_v21  ;;  %v1992_v13 = vmul.f32 %v4218_v32, %v1754_v61  ;;  %3315 = vmatmul.msk.bf16.gmra.mxu3 %vm549_vm0, %v4018_v17  ;;  %v2415_v21 = vadd.f32 %v4228_v58, %v2088_v45 }
 0x332   : > { %2783 = vst [vmem:[%s4240_s13 + $0x224] sm:$0xff] %v2587_v28  ;;  %v2640_v38 = vpack.c.bf16 %v2406_v8, %v2405_v53  ;;  %v2319_v6 = vadd.f32 %v4228_v58, %v1992_v13  ;;  %3291 = vmatmul.msk.bf16.gmra.mxu2 %vm549_vm0, %v5822_v25  ;;  %3356 = vmatmul.msk.bf16.gmra.mxu0 %vm549_vm0, %v5819_v15 }
 0x333   : > { %v1411_v22 = vpop.f32.mrf.mxu3  ;;  %v2006_v8 = vmul.f32 %v4218_v32, %v4809_v20 }
 0x334   : > { %2836 = vst [vmem:[%s4240_s13 + $0x384] sm:$0xff] %v2640_v38  ;;  %v2588_v33 = vpack.c.bf16 %v2319_v6, %v2319_v6  ;;  %v1995_v2 = vmul.f32 %v4218_v32, %v1411_v22  ;;  %v5825_v38 = vld [vmem:[#allocation38_spill] sm:$0xff]  ;;  %v5826_v22 = vld [vmem:[#allocation39_spill] sm:$0xff] }
 0x335   : > { %v1283_v51 = vpop.f32.mrf.mxu2  ;;  %v2093_v23 = vmul.f32 %v4218_v32, %v5826_v22 }
 0x336   : > { %2784 = vst.msk [vmem:[%s4240_s13 + $0x22c] sm:$0xf] %vm2702_vm1, %v2588_v33  ;;  %v2322_v30 = vadd.f32 %v4228_v58, %v1995_v2  ;;  %v2084_v42 = vmul.f32 %v4218_v32, %v1283_v51  ;;  %v2333_v2 = vadd.f32 %v4228_v58, %v2006_v8 }
 0x337   : > { %v5141_v18 = vpop.f32.mrf.mxu0  ;;  %v1757_v5 = vpop.f32.mrf.mxu1 }
 0x338   : > { %v2590_v60 = vpack.c.bf16 %v2323_v16, %v2322_v30  ;;  %v2411_v12 = vadd.f32 %v4228_v58, %v2084_v42  ;;  %v1997_v44 = vmul.f32 %v4218_v32, %v1757_v5  ;;  %v2420_v5 = vadd.f32 %v4228_v58, %v2093_v23 }
 0x33a   : > { %2786 = vst [vmem:[%s4240_s13 + $0x238] sm:$0xff] %v2590_v60  ;;  %v2643_v59 = vpack.c.bf16 %v2411_v12, %v2410_v39  ;;  %v2324_v24 = vadd.f32 %v4228_v58, %v1997_v44  ;;  %3381 = vmatmul.msk.bf16.gmra.mxu1 %vm549_vm0, %v4018_v17  ;;  %v2011_v44 = vmul.f32 %v4218_v32, %v4833_v19 }
 0x33b   : > { %v1413_v3 = vpop.f32.mrf.mxu3 }
 0x33c   : > { %2839 = vst [vmem:[%s4240_s13 + $0x398] sm:$0xff] %v2643_v59  ;;  %v2591_v14 = vpack.c.bf16 %v2324_v24, %v2324_v24  ;;  %v2000_v47 = vmul.f32 %v4218_v32, %v1413_v3  ;;  %v5827_v3 = vld [vmem:[#allocation40_spill] sm:$0xff] }
 0x33d   : > { %v1285_v31 = vpop.f32.mrf.mxu2  ;;  %v2098_v0 = vmul.f32 %v4218_v32, %v5827_v3 }
 0x33e   : > { %2787 = vst.msk [vmem:[%s4240_s13 + $0x240] sm:$0xf] %vm2702_vm1, %v2591_v14  ;;  %v2327_v46 = vadd.f32 %v4228_v58, %v2000_v47  ;;  %v2089_v11 = vmul.f32 %v4218_v32, %v1285_v31  ;;  %v2338_v31 = vadd.f32 %v4228_v58, %v2011_v44 }
 0x33f   : > { %v5161_v17 = vpop.f32.mrf.mxu0  ;;  %v1759_v52 = vpop.f32.mrf.mxu1 }
 0x340   : > { %v2593_v61 = vpack.c.bf16 %v2328_v48, %v2327_v46  ;;  %v2416_v53 = vadd.f32 %v4228_v58, %v2089_v11  ;;  %v2002_v28 = vmul.f32 %v4218_v32, %v1759_v52  ;;  %3316 = vmatmul.msk.bf16.gmra.mxu3 %vm549_vm0, %v4037_v27  ;;  %v2425_v11 = vadd.f32 %v4228_v58, %v2098_v0 }
 0x342   : > { %2789 = vst [vmem:[%s4240_s13 + $0x24c] sm:$0xff] %v2593_v61  ;;  %v2646_v13 = vpack.c.bf16 %v2416_v53, %v2415_v21  ;;  %v2329_v55 = vadd.f32 %v4228_v58, %v2002_v28  ;;  %3292 = vmatmul.msk.bf16.gmra.mxu2 %vm549_vm0, %v5825_v38  ;;  %3357 = vmatmul.msk.bf16.gmra.mxu0 %vm549_vm0, %v5822_v25 }
 0x343   : > { %v1416_v6 = vpop.f32.mrf.mxu3  ;;  %v2016_v53 = vmul.f32 %v4218_v32, %v4853_v10 }
 0x344   : > { %2842 = vst [vmem:[%s4240_s13 + $0x3ac] sm:$0xff] %v2646_v13  ;;  %v2594_v36 = vpack.c.bf16 %v2329_v55, %v2329_v55  ;;  %v2005_v33 = vmul.f32 %v4218_v32, %v1416_v6  ;;  %v5828_v55 = vld [vmem:[#allocation41_spill] sm:$0xff] }
 0x345   : > { %v1288_v20 = vpop.f32.mrf.mxu2  ;;  %v2103_v6 = vmul.f32 %v4218_v32, %v5828_v55 }
 0x346   : > { %2790 = vst.msk [vmem:[%s4240_s13 + $0x254] sm:$0xf] %vm2702_vm1, %v2594_v36  ;;  %v2332_v51 = vadd.f32 %v4228_v58, %v2005_v33  ;;  %v2094_v16 = vmul.f32 %v4218_v32, %v1288_v20  ;;  %v2343_v33 = vadd.f32 %v4228_v58, %v2016_v53 }
 0x347   : > { %v5185_v30 = vpop.f32.mrf.mxu0  ;;  %v1762_v42 = vpop.f32.mrf.mxu1 }
 0x348   : > { %v2596_v39 = vpack.c.bf16 %v2333_v2, %v2332_v51  ;;  %v2421_v60 = vadd.f32 %v4228_v58, %v2094_v16  ;;  %v2007_v12 = vmul.f32 %v4218_v32, %v1762_v42  ;;  %v2430_v16 = vadd.f32 %v4228_v58, %v2103_v6 }
 0x34a   : > { %2792 = vst [vmem:[%s4240_s13 + $0x260] sm:$0xff] %v2596_v39  ;;  %v2649_v56 = vpack.c.bf16 %v2421_v60, %v2420_v5  ;;  %v2334_v59 = vadd.f32 %v4228_v58, %v2007_v12  ;;  %3382 = vmatmul.msk.bf16.gmra.mxu1 %vm549_vm0, %v4037_v27  ;;  %v2021_v60 = vmul.f32 %v4218_v32, %v4877_v29 }
 0x34b   : > { %v1418_v24 = vpop.f32.mrf.mxu3 }
 0x34c   : > { %2845 = vst [vmem:[%s4240_s13 + $0x3c0] sm:$0xff] %v2649_v56  ;;  %v2597_v45 = vpack.c.bf16 %v2334_v59, %v2334_v59  ;;  %v2010_v14 = vmul.f32 %v4218_v32, %v1418_v24  ;;  %v5829_v59 = vld [vmem:[#allocation42_spill] sm:$0xff] }
 0x34d   : > { %v1290_v47 = vpop.f32.mrf.mxu2  ;;  %v2108_v24 = vmul.f32 %v4218_v32, %v5829_v59 }
 0x34e   : > { %2793 = vst.msk [vmem:[%s4240_s13 + $0x268] sm:$0xf] %vm2702_vm1, %v2597_v45  ;;  %v2337_v19 = vadd.f32 %v4228_v58, %v2010_v14  ;;  %v2099_v48 = vmul.f32 %v4218_v32, %v1290_v47  ;;  %v2348_v14 = vadd.f32 %v4228_v58, %v2021_v60 }
 0x34f   : > { %v5205_v27 = vpop.f32.mrf.mxu0  ;;  %v1764_v46 = vpop.f32.mrf.mxu1 }
 0x350   : > { %v2599_v52 = vpack.c.bf16 %v2338_v31, %v2337_v19  ;;  %v2426_v21 = vadd.f32 %v4228_v58, %v2099_v48  ;;  %v2012_v61 = vmul.f32 %v4218_v32, %v1764_v46  ;;  %3317 = vmatmul.msk.bf16.gmra.mxu3 %vm549_vm0, %v4050_v35  ;;  %v2435_v19 = vadd.f32 %v4228_v58, %v2108_v24 }
 0x352   : > { %2795 = vst [vmem:[%s4240_s13 + $0x274] sm:$0xff] %v2599_v52  ;;  %v2652_v28 = vpack.c.bf16 %v2426_v21, %v2425_v11  ;;  %v2339_v8 = vadd.f32 %v4228_v58, %v2012_v61  ;;  %3358 = vmatmul.msk.bf16.gmra.mxu0 %vm549_vm0, %v5825_v38  ;;  %v2026_v52 = vmul.f32 %v4218_v32, %v4897_v34 }
 0x353   : > { %v1421_v13 = vpop.f32.mrf.mxu3 }
 0x354   : > { %2848 = vst [vmem:[%s4240_s13 + $0x3d4] sm:$0xff] %v2652_v28  ;;  %v2600_v22 = vpack.c.bf16 %v2339_v8, %v2339_v8  ;;  %v2015_v23 = vmul.f32 %v4218_v32, %v1421_v13  ;;  %v5830_v28 = vld [vmem:[#allocation43_spill] sm:$0xff] }
 0x355   : > { %v1293_v36 = vpop.f32.mrf.mxu2  ;;  %v2113_v8 = vmul.f32 %v4218_v32, %v5830_v28 }
 0x356   : > { %2796 = vst.msk [vmem:[%s4240_s13 + $0x27c] sm:$0xf] %vm2702_vm1, %v2600_v22  ;;  %v2342_v10 = vadd.f32 %v4228_v58, %v2015_v23  ;;  %v2104_v20 = vmul.f32 %v4218_v32, %v1293_v36  ;;  %v2353_v22 = vadd.f32 %v4228_v58, %v2026_v52  ;;  %v5832_v52 = vld [vmem:[#allocation45_spill] sm:$0xff] }
 0x357   : > { %v5227_v2 = vpop.f32.mrf.mxu0  ;;  %v1767_v51 = vpop.f32.mrf.mxu1 }
 0x358   : > { %v2602_v42 = vpack.c.bf16 %v2343_v33, %v2342_v10  ;;  %v2431_v5 = vadd.f32 %v4228_v58, %v2104_v20  ;;  %v2017_v39 = vmul.f32 %v4218_v32, %v1767_v51  ;;  %v2440_v10 = vadd.f32 %v4228_v58, %v2113_v8 }
 0x35a   : > { %2798 = vst [vmem:[%s4240_s13 + $0x288] sm:$0xff] %v2602_v42  ;;  %v2655_v12 = vpack.c.bf16 %v2431_v5, %v2430_v16  ;;  %v2344_v44 = vadd.f32 %v4228_v58, %v2017_v39  ;;  %3383 = vmatmul.msk.bf16.gmra.mxu1 %vm549_vm0, %v4050_v35  ;;  %v2031_v42 = vmul.f32 %v4218_v32, %v4921_v62 }
 0x35b   : > { %v1423_v56 = vpop.f32.mrf.mxu3 }
 0x35c   : > { %2851 = vst [vmem:[%s4240_s13 + $0x3e8] sm:$0xff] %v2655_v12  ;;  %v2603_v3 = vpack.c.bf16 %v2344_v44, %v2344_v44  ;;  %v2020_v0 = vmul.f32 %v4218_v32, %v1423_v56  ;;  %v5831_v12 = vld [vmem:[#allocation44_spill] sm:$0xff] }
 0x35d   : > { %v1295_v45 = vpop.f32.mrf.mxu2  ;;  %v2118_v44 = vmul.f32 %v4218_v32, %v5831_v12 }
 0x35e   : > { %2799 = vst.msk [vmem:[%s4240_s13 + $0x290] sm:$0xf] %vm2702_vm1, %v2603_v3  ;;  %v2347_v29 = vadd.f32 %v4228_v58, %v2020_v0  ;;  %v2109_v47 = vmul.f32 %v4218_v32, %v1295_v45  ;;  %v2358_v3 = vadd.f32 %v4228_v58, %v2031_v42  ;;  %v5833_v42 = vld [vmem:[#allocation46_spill] sm:$0xff] }
 0x35f   : > { %v5247_v35 = vpop.f32.mrf.mxu0  ;;  %v1769_v31 = vpop.f32.mrf.mxu1 }
 0x360   : > { %v2605_v48 = vpack.c.bf16 %v2348_v14, %v2347_v29  ;;  %v2436_v46 = vadd.f32 %v4228_v58, %v2109_v47  ;;  %v2022_v11 = vmul.f32 %v4218_v32, %v1769_v31  ;;  %3318 = vmatmul.msk.bf16.gmra.mxu3 %vm549_vm0, %v5804_v26  ;;  %v2445_v14 = vadd.f32 %v4228_v58, %v2118_v44 }
 0x362   : > { %2801 = vst [vmem:[%s4240_s13 + $0x29c] sm:$0xff] %v2605_v48  ;;  %v2658_v21 = vpack.c.bf16 %v2436_v46, %v2435_v19  ;;  %v2349_v61 = vadd.f32 %v4228_v58, %v2022_v11  ;;  %v2036_v19 = vmul.f32 %v4218_v32, %v4941_v41 }
 0x363   : > { %v1426_v53 = vpop.f32.mrf.mxu3 }
 0x364   : > { %2854 = vst [vmem:[%s4240_s13 + $0x3fc] sm:$0xff] %v2658_v21  ;;  %v2606_v13 = vpack.c.bf16 %v2349_v61, %v2349_v61  ;;  %v2025_v55 = vmul.f32 %v4218_v32, %v1426_v53  ;;  %v2123_v21 = vmul.f32 %v4218_v32, %v5832_v52  ;;  %v2363_v8 = vadd.f32 %v4228_v58, %v2036_v19 }
 0x365   : > { %v1298_v6 = vpop.f32.mrf.mxu2 }
 0x366   : > { %2802 = vst.msk [vmem:[%s4240_s13 + $0x2a4] sm:$0xf] %vm2702_vm1, %v2606_v13  ;;  %v2352_v34 = vadd.f32 %v4228_v58, %v2025_v55  ;;  %v2114_v23 = vmul.f32 %v4218_v32, %v1298_v6 }
 0x367   : > { %v5267_v36 = vpop.f32.mrf.mxu0  ;;  %v1772_v33 = vpop.f32.mrf.mxu1 }
 0x368   : > { %v2608_v20 = vpack.c.bf16 %v2353_v22, %v2352_v34  ;;  %v2441_v51 = vadd.f32 %v4228_v58, %v2114_v23  ;;  %v2027_v16 = vmul.f32 %v4218_v32, %v1772_v33  ;;  %v2450_v22 = vadd.f32 %v4228_v58, %v2123_v21 }
 0x36a   : > { %2804 = vst [vmem:[%s4240_s13 + $0x2b0] sm:$0xff] %v2608_v20  ;;  %v2661_v5 = vpack.c.bf16 %v2441_v51, %v2440_v10  ;;  %v2354_v39 = vadd.f32 %v4228_v58, %v2027_v16  ;;  %3384 = vmatmul.msk.bf16.gmra.mxu1 %vm549_vm0, %v5804_v26  ;;  %v2041_v10 = vmul.f32 %v4218_v32, %v4965_v50 }
 0x36b   : > { %v1428_v60 = vpop.f32.mrf.mxu3 }
 0x36c   : > { %2857 = vst [vmem:[%s4240_s13 + $0x410] sm:$0xff] %v2661_v5  ;;  %v2609_v56 = vpack.c.bf16 %v2354_v39, %v2354_v39  ;;  %v2030_v59 = vmul.f32 %v4218_v32, %v1428_v60  ;;  %v2128_v5 = vmul.f32 %v4218_v32, %v5833_v42  ;;  %v2368_v44 = vadd.f32 %v4228_v58, %v2041_v10 }
 0x36d   : > { %v1300_v24 = vpop.f32.mrf.mxu2 }
 0x36e   : > { %2805 = vst.msk [vmem:[%s4240_s13 + $0x2b8] sm:$0xf] %vm2702_vm1, %v2609_v56  ;;  %v2357_v62 = vadd.f32 %v4228_v58, %v2030_v59  ;;  %v2119_v0 = vmul.f32 %v4218_v32, %v1300_v24  ;;  %v2455_v24 = vadd.f32 %v4228_v58, %v2128_v5 }
 0x36f   : > { %v5287_v26 = vpop.f32.mrf.mxu0  ;;  %v1774_v45 = vpop.f32.mrf.mxu1 }
 0x370   : > { %v2611_v29 = vpack.c.bf16 %v2358_v3, %v2357_v62  ;;  %v2446_v47 = vadd.f32 %v4228_v58, %v2119_v0  ;;  %v2032_v31 = vmul.f32 %v4218_v32, %v1774_v45  ;;  %3319 = vmatmul.msk.bf16.gmra.mxu3 %vm549_vm0, %v5807_v37  ;;  %v2046_v45 = vmul.f32 %v4218_v32, %v4985_v49 }
 0x372   : > { %2807 = vst [vmem:[%s4240_s13 + $0x2c4] sm:$0xff] %v2611_v29  ;;  %v2664_v48 = vpack.c.bf16 %v2446_v47, %v2445_v14  ;;  %v2359_v46 = vadd.f32 %v4228_v58, %v2032_v31  ;;  %v5834_v31 = vld [vmem:[#allocation47_spill] sm:$0xff]  ;;  %v2373_v52 = vadd.f32 %v4228_v58, %v2046_v45 }
 0x373   : > { %v1431_v11 = vpop.f32.mrf.mxu3  ;;  %v2133_v19 = vmul.f32 %v4218_v32, %v5834_v31 }
 0x374   : > { %2860 = vst [vmem:[%s4240_s13 + $0x424] sm:$0xff] %v2664_v48  ;;  %v2612_v61 = vpack.c.bf16 %v2359_v46, %v2359_v46  ;;  %v2035_v53 = vmul.f32 %v4218_v32, %v1431_v11 }
 0x375   : > { %v1303_v28 = vpop.f32.mrf.mxu2 }
 0x376   : > { %2808 = vst.msk [vmem:[%s4240_s13 + $0x2cc] sm:$0xf] %vm2702_vm1, %v2612_v61  ;;  %v2362_v41 = vadd.f32 %v4228_v58, %v2035_v53  ;;  %v2124_v13 = vmul.f32 %v4218_v32, %v1303_v28  ;;  %v2460_v28 = vadd.f32 %v4228_v58, %v2133_v19 }
 0x377   : > { %v5307_v55 = vpop.f32.mrf.mxu0  ;;  %v1777_v6 = vpop.f32.mrf.mxu1 }
 0x378   : > { %v2614_v34 = vpack.c.bf16 %v2363_v8, %v2362_v41  ;;  %v2451_v23 = vadd.f32 %v4228_v58, %v2124_v13  ;;  %v2037_v33 = vmul.f32 %v4218_v32, %v1777_v6  ;;  %v2051_v6 = vmul.f32 %v4218_v32, %v5009_v43 }
 0x37a   : > { %2810 = vst [vmem:[%s4240_s13 + $0x2d8] sm:$0xff] %v2614_v34  ;;  %v2667_v20 = vpack.c.bf16 %v2451_v23, %v2450_v22  ;;  %v2364_v51 = vadd.f32 %v4228_v58, %v2037_v33  ;;  %3385 = vmatmul.msk.bf16.gmra.mxu1 %vm549_vm0, %v5807_v37  ;;  %v5835_v33 = vld [vmem:[#allocation48_spill] sm:$0xff]  ;;  %v2378_v42 = vadd.f32 %v4228_v58, %v2051_v6 }
 0x37b   : > { %v1433_v16 = vpop.f32.mrf.mxu3  ;;  %v2138_v10 = vmul.f32 %v4218_v32, %v5835_v33 }
 0x37c   : > { %2863 = vst [vmem:[%s4240_s13 + $0x438] sm:$0xff] %v2667_v20  ;;  %v2615_v39 = vpack.c.bf16 %v2364_v51, %v2364_v51  ;;  %v2040_v60 = vmul.f32 %v4218_v32, %v1433_v16 }
 0x37d   : > { %v1305_v12 = vpop.f32.mrf.mxu2 }
 0x37e   : > { %2811 = vst.msk [vmem:[%s4240_s13 + $0x2e0] sm:$0xf] %vm2702_vm1, %v2615_v39  ;;  %v2367_v50 = vadd.f32 %v4228_v58, %v2040_v60  ;;  %v2129_v56 = vmul.f32 %v4218_v32, %v1305_v12  ;;  %v2465_v60 = vadd.f32 %v4228_v58, %v2138_v10 }
 0x37f   : > { %v5327_v37 = vpop.f32.mrf.mxu0  ;;  %v1779_v59 = vpop.f32.mrf.mxu1 }
 0x380   : > { %v2617_v3 = vpack.c.bf16 %v2368_v44, %v2367_v50  ;;  %v2456_v62 = vadd.f32 %v4228_v58, %v2129_v56  ;;  %v2042_v0 = vmul.f32 %v4218_v32, %v1779_v59  ;;  %3320 = vmatmul.msk.bf16.gmra.mxu3 %vm549_vm0, %v5810_v40  ;;  %v2056_v56 = vmul.f32 %v4218_v32, %v5029_v57 }
 0x382   : > { %2813 = vst [vmem:[%s4240_s13 + $0x2ec] sm:$0xff] %v2617_v3  ;;  %v2670_v14 = vpack.c.bf16 %v2456_v62, %v2455_v24  ;;  %v2369_v29 = vadd.f32 %v4228_v58, %v2042_v0  ;;  %v5836_v62 = vld [vmem:[#allocation49_spill] sm:$0xff] }
 0x383   : > { %v1436_v47 = vpop.f32.mrf.mxu3  ;;  %v2143_v0 = vmul.f32 %v4218_v32, %v5836_v62 }
 0x384   : > { %2866 = vst [vmem:[%s4240_s13 + $0x44c] sm:$0xff] %v2670_v14  ;;  %v2618_v48 = vpack.c.bf16 %v2369_v29, %v2369_v29  ;;  %v2045_v46 = vmul.f32 %v4218_v32, %v1436_v47  ;;  %v2383_v47 = vadd.f32 %v4228_v58, %v2056_v56 }
 0x385   : > { %v1308_v11 = vpop.f32.mrf.mxu2 }
 0x386   : > { %2814 = vst.msk [vmem:[%s4240_s13 + $0x2f4] sm:$0xf] %vm2702_vm1, %v2618_v48  ;;  %v2372_v49 = vadd.f32 %v4228_v58, %v2045_v46  ;;  %v2134_v21 = vmul.f32 %v4218_v32, %v1308_v11  ;;  %v2470_v46 = vadd.f32 %v4228_v58, %v2143_v0 }
 0x387   : > { %v5347_v61 = vpop.f32.mrf.mxu0  ;;  %v1782_v53 = vpop.f32.mrf.mxu1 }
 0x388   : > { %v2620_v8 = vpack.c.bf16 %v2373_v52, %v2372_v49  ;;  %v2461_v41 = vadd.f32 %v4228_v58, %v2134_v21  ;;  %v2047_v13 = vmul.f32 %v4218_v32, %v1782_v53  ;;  %v2061_v21 = vmul.f32 %v4218_v32, %v5053_v54 }
 0x38a   : > { %2816 = vst [vmem:[%s4240_s13 + $0x300] sm:$0xff] %v2620_v8  ;;  %v2673_v22 = vpack.c.bf16 %v2461_v41, %v2460_v28  ;;  %v2374_v34 = vadd.f32 %v4228_v58, %v2047_v13  ;;  %3386 = vmatmul.msk.bf16.gmra.mxu1 %vm549_vm0, %v5810_v40  ;;  %v5837_v41 = vld [vmem:[#allocation50_spill] sm:$0xff] }
 0x38b   : > { %v1438_v23 = vpop.f32.mrf.mxu3  ;;  %v2148_v13 = vmul.f32 %v4218_v32, %v5837_v41 }
 0x38c   : > { %2869 = vst [vmem:[%s4240_s13 + $0x460] sm:$0xff] %v2673_v22  ;;  %v2621_v20 = vpack.c.bf16 %v2374_v34, %v2374_v34  ;;  %v2050_v51 = vmul.f32 %v4218_v32, %v1438_v23  ;;  %v2388_v23 = vadd.f32 %v4228_v58, %v2061_v21 }
 0x38d   : > { %v1310_v16 = vpop.f32.mrf.mxu2 }
 0x38e   : > { %2817 = vst.msk [vmem:[%s4240_s13 + $0x308] sm:$0xf] %vm2702_vm1, %v2621_v20  ;;  %v2377_v43 = vadd.f32 %v4228_v58, %v2050_v51  ;;  %v2139_v5 = vmul.f32 %v4218_v32, %v1310_v16  ;;  %v2475_v20 = vadd.f32 %v4228_v58, %v2148_v13 }
 0x38f   : > { %v5367_v40 = vpop.f32.mrf.mxu0  ;;  %v1784_v39 = vpop.f32.mrf.mxu1 }
 0x390   : > { %v2623_v12 = vpack.c.bf16 %v2378_v42, %v2377_v43  ;;  %v2466_v44 = vadd.f32 %v4228_v58, %v2139_v5  ;;  %v2052_v50 = vmul.f32 %v4218_v32, %v1784_v39  ;;  %3321 = vmatmul.msk.bf16.gmra.mxu3 %vm549_vm0, %v5813_v7  ;;  %v2066_v43 = vmul.f32 %v4218_v32, %v5073_v1 }
 0x392   : > { %2819 = vst [vmem:[%s4240_s13 + $0x314] sm:$0xff] %v2623_v12  ;;  %v2676_v59 = vpack.c.bf16 %v2466_v44, %v2465_v60  ;;  %v2379_v24 = vadd.f32 %v4228_v58, %v2052_v50  ;;  %v5838_v12 = vld [vmem:[#allocation51_spill] sm:$0xff] }
 0x393   : > { %v1441_v3 = vpop.f32.mrf.mxu3  ;;  %v2153_v44 = vmul.f32 %v4218_v32, %v5838_v12 }
 0x394   : > { %2872 = vst [vmem:[%s4240_s13 + $0x474] sm:$0xff] %v2676_v59  ;;  %v2624_v45 = vpack.c.bf16 %v2379_v24, %v2379_v24  ;;  %v2055_v14 = vmul.f32 %v4218_v32, %v1441_v3  ;;  %v2393_v24 = vadd.f32 %v4228_v58, %v2066_v43 }
 0x395   : > { %v1313_v29 = vpop.f32.mrf.mxu2 }
 0x396   : > { %2820 = vst.msk [vmem:[%s4240_s13 + $0x31c] sm:$0xf] %vm2702_vm1, %v2624_v45  ;;  %v2382_v57 = vadd.f32 %v4228_v58, %v2055_v14  ;;  %v2144_v31 = vmul.f32 %v4218_v32, %v1313_v29  ;;  %v2480_v45 = vadd.f32 %v4228_v58, %v2153_v44 }
 0x397   : > { %v5387_v19 = vpop.f32.mrf.mxu0  ;;  %v1787_v48 = vpop.f32.mrf.mxu1 }
 0x398   : > { %v2626_v11 = vpack.c.bf16 %v2383_v47, %v2382_v57  ;;  %v2471_v52 = vadd.f32 %v4228_v58, %v2144_v31  ;;  %v2057_v49 = vmul.f32 %v4218_v32, %v1787_v48  ;;  %v2071_v57 = vmul.f32 %v4218_v32, %v5097_v4 }
 0x39a   : > { %2822 = vst [vmem:[%s4240_s13 + $0x328] sm:$0xff] %v2626_v11  ;;  %v2679_v53 = vpack.c.bf16 %v2471_v52, %v2470_v46  ;;  %v2384_v28 = vadd.f32 %v4228_v58, %v2057_v49  ;;  %3387 = vmatmul.msk.bf16.gmra.mxu1 %vm549_vm0, %v5813_v7  ;;  %v5839_v11 = vld [vmem:[#allocation52_spill] sm:$0xff] }
 0x39b   : > { %v1443_v8 = vpop.f32.mrf.mxu3  ;;  %v2158_v52 = vmul.f32 %v4218_v32, %v5839_v11 }
 0x39c   : > { %2875 = vst [vmem:[%s4240_s13 + $0x488] sm:$0xff] %v2679_v53  ;;  %v2627_v6 = vpack.c.bf16 %v2384_v28, %v2384_v28  ;;  %v2060_v22 = vmul.f32 %v4218_v32, %v1443_v8  ;;  %v2398_v28 = vadd.f32 %v4228_v58, %v2071_v57 }
 0x39d   : > { %v1315_v34 = vpop.f32.mrf.mxu2  ;;  %v2485_v13 = vadd.f32 %v4228_v58, %v2158_v52 }
 0x39e   : > { %2823 = vst.msk [vmem:[%s4240_s13 + $0x330] sm:$0xf] %vm2702_vm1, %v2627_v6  ;;  %v2387_v54 = vadd.f32 %v4228_v58, %v2060_v22  ;;  %v2149_v33 = vmul.f32 %v4218_v32, %v1315_v34 }
 0x39f   : > { %v5407_v7 = vpop.f32.mrf.mxu0  ;;  %v1789_v10 = vpop.f32.mrf.mxu1 }
 0x3a0   : > { %v2629_v51 = vpack.c.bf16 %v2388_v23, %v2387_v54  ;;  %v2476_v16 = vadd.f32 %v4228_v58, %v2149_v33  ;;  %v2062_v42 = vmul.f32 %v4218_v32, %v1789_v10  ;;  %3322 = vmatmul.msk.bf16.gmra.mxu3 %vm549_vm0, %v5816_v63  ;;  %v2076_v23 = vmul.f32 %v4218_v32, %v5117_v9 }
 0x3a2   : > { %2825 = vst [vmem:[%s4240_s13 + $0x33c] sm:$0xff] %v2629_v51  ;;  %v2682_v5 = vpack.c.bf16 %v2476_v16, %v2475_v20  ;;  %v2389_v39 = vadd.f32 %v4228_v58, %v2062_v42  ;;  %v5840_v20 = vld [vmem:[#allocation53_spill] sm:$0xff] }
 0x3a3   : > { %v1446_v60 = vpop.f32.mrf.mxu3  ;;  %v2163_v51 = vmul.f32 %v4218_v32, %v5840_v20 }
 0x3a4   : > { %2878 = vst [vmem:[%s4240_s13 + $0x49c] sm:$0xff] %v2682_v5  ;;  %v2630_v50 = vpack.c.bf16 %v2389_v39, %v2389_v39  ;;  %v2065_v56 = vmul.f32 %v4218_v32, %v1446_v60  ;;  %v2403_v5 = vadd.f32 %v4228_v58, %v2076_v23 }
 0x3a5   : > { %v1318_v59 = vpop.f32.mrf.mxu2  ;;  %v2490_v44 = vadd.f32 %v4228_v58, %v2163_v51 }
 0x3a6   : > { %2826 = vst.msk [vmem:[%s4240_s13 + $0x344] sm:$0xf] %vm2702_vm1, %v2630_v50  ;;  %v2392_v1 = vadd.f32 %v4228_v58, %v2065_v56  ;;  %v2154_v3 = vmul.f32 %v4218_v32, %v1318_v59 }
 0x3a7   : > { %v5427_v62 = vpop.f32.mrf.mxu0  ;;  %v1792_v0 = vpop.f32.mrf.mxu1 }
 0x3a8   : > { %v2632_v14 = vpack.c.bf16 %v2393_v24, %v2392_v1  ;;  %v2481_v29 = vadd.f32 %v4228_v58, %v2154_v3  ;;  %v2067_v47 = vmul.f32 %v4218_v32, %v1792_v0  ;;  %v2081_v24 = vmul.f32 %v4218_v32, %v5141_v18 }
 0x3aa   : > { %2828 = vst [vmem:[%s4240_s13 + $0x350] sm:$0xff] %v2632_v14  ;;  %v2685_v31 = vpack.c.bf16 %v2481_v29, %v2480_v45  ;;  %v2394_v48 = vadd.f32 %v4228_v58, %v2067_v47  ;;  %3388 = vmatmul.msk.bf16.gmra.mxu1 %vm549_vm0, %v5816_v63  ;;  %v5841_v45 = vld [vmem:[#allocation54_spill] sm:$0xff] }
 0x3ab   : > { %v1448_v46 = vpop.f32.mrf.mxu3  ;;  %v2168_v14 = vmul.f32 %v4218_v32, %v5841_v45 }
 0x3ac   : > { %2881 = vst [vmem:[%s4240_s13 + $0x4b0] sm:$0xff] %v2685_v31  ;;  %v2633_v49 = vpack.c.bf16 %v2394_v48, %v2394_v48  ;;  %v2070_v21 = vmul.f32 %v4218_v32, %v1448_v46  ;;  %v2408_v31 = vadd.f32 %v4228_v58, %v2081_v24 }
 0x3ad   : > { %v1320_v53 = vpop.f32.mrf.mxu2  ;;  %v2495_v11 = vadd.f32 %v4228_v58, %v2168_v14 }
 0x3ae   : > { %2829 = vst.msk [vmem:[%s4240_s13 + $0x358] sm:$0xf] %vm2702_vm1, %v2633_v49  ;;  %v2397_v4 = vadd.f32 %v4228_v58, %v2070_v21  ;;  %v2159_v8 = vmul.f32 %v4218_v32, %v1320_v53  ;;  %v2086_v53 = vmul.f32 %v4218_v32, %v5161_v17 }
 0x3af   : > { %v5447_v63 = vpop.f32.mrf.mxu0  ;;  %v1794_v41 = vpop.f32.mrf.mxu1 }
 0x3b0   : > { %v2635_v6 = vpack.c.bf16 %v2398_v28, %v2397_v4  ;;  %v2486_v22 = vadd.f32 %v4228_v58, %v2159_v8  ;;  %v2072_v34 = vmul.f32 %v4218_v32, %v1794_v41  ;;  %3323 = vmatmul.msk.bf16.gmra.mxu3 %vm549_vm0, %v5819_v15  ;;  %v5842_v41 = vld [vmem:[#allocation55_spill] sm:$0xff]  ;;  %v2413_v23 = vadd.f32 %v4228_v58, %v2086_v53 }
 0x3b2   : > { %2831 = vst [vmem:[%s4240_s13 + $0x364] sm:$0xff] %v2635_v6  ;;  %v2688_v54 = vpack.c.bf16 %v2486_v22, %v2485_v13  ;;  %v2399_v33 = vadd.f32 %v4228_v58, %v2072_v34  ;;  %v2173_v13 = vmul.f32 %v4218_v32, %v5842_v41  ;;  %v2106_v41 = vmul.f32 %v4218_v32, %v5247_v35 }
 0x3b3   : > { %v1451_v10 = vpop.f32.mrf.mxu3  ;;  %v2111_v35 = vmul.f32 %v4218_v32, %v5267_v36  ;;  %v2116_v36 = vmul.f32 %v4218_v32, %v5287_v26  ;;  %v2121_v26 = vmul.f32 %v4218_v32, %v5307_v55  ;;  %v2126_v55 = vmul.f32 %v4218_v32, %v5327_v37 }
 0x3b4   : > { %2884 = vst [vmem:[%s4240_s13 + $0x4c4] sm:$0xff] %v2688_v54  ;;  %v2636_v16 = vpack.c.bf16 %v2399_v33, %v2399_v33  ;;  %v2075_v42 = vmul.f32 %v4218_v32, %v1451_v10  ;;  %v2500_v20 = vadd.f32 %v4228_v58, %v2173_v13  ;;  %v2131_v37 = vmul.f32 %v4218_v32, %v5347_v61 }
 0x3b5   : > { %v1323_v43 = vpop.f32.mrf.mxu2  ;;  %v2136_v61 = vmul.f32 %v4218_v32, %v5367_v40  ;;  %v2141_v40 = vmul.f32 %v4218_v32, %v5387_v19  ;;  %v2146_v19 = vmul.f32 %v4218_v32, %v5407_v7  ;;  %v2151_v7 = vmul.f32 %v4218_v32, %v5427_v62 }
 0x3b6   : > { %2832 = vst.msk [vmem:[%s4240_s13 + $0x36c] sm:$0xf] %vm2702_vm1, %v2636_v16  ;;  %v2402_v9 = vadd.f32 %v4228_v58, %v2075_v42  ;;  %v2164_v39 = vmul.f32 %v4218_v32, %v1323_v43  ;;  %v2091_v43 = vmul.f32 %v4218_v32, %v5185_v30  ;;  %v2156_v62 = vmul.f32 %v4218_v32, %v5447_v63 }
 0x3b7   : > { %v5467_v60 = vpop.f32.mrf.mxu0  ;;  %v1797_v12 = vpop.f32.mrf.mxu1 }
 0x3b8   : > { %v2638_v50 = vpack.c.bf16 %v2403_v5, %v2402_v9  ;;  %v2491_v56 = vadd.f32 %v4228_v58, %v2164_v39  ;;  %v2077_v59 = vmul.f32 %v4218_v32, %v1797_v12  ;;  %v2161_v63 = vmul.f32 %v4218_v32, %v5467_v60 }
 0x3ba   : > { %2834 = vst [vmem:[%s4240_s13 + $0x378] sm:$0xff] %v2638_v50  ;;  %v2691_v1 = vpack.c.bf16 %v2491_v56, %v2490_v44  ;;  %v2404_v3 = vadd.f32 %v4228_v58, %v2077_v59  ;;  %3389 = vmatmul.msk.bf16.gmra.mxu1 %vm549_vm0, %v5819_v15  ;;  %v2418_v56 = vadd.f32 %v4228_v58, %v2091_v43 }
 0x3bb   : > { %v1453_v0 = vpop.f32.mrf.mxu3  ;;  %v2438_v43 = vadd.f32 %v4228_v58, %v2111_v35 }
 0x3bc   : > { %2887 = vst [vmem:[%s4240_s13 + $0x4d8] sm:$0xff] %v2691_v1  ;;  %v2639_v29 = vpack.c.bf16 %v2404_v3, %v2404_v3  ;;  %v2080_v47 = vmul.f32 %v4218_v32, %v1453_v0 }
 0x3bd   : > { %v1325_v57 = vpop.f32.mrf.mxu2 }
 0x3be   : > { %2835 = vst.msk [vmem:[%s4240_s13 + $0x380] sm:$0xf] %vm2702_vm1, %v2639_v29  ;;  %v2407_v18 = vadd.f32 %v4228_v58, %v2080_v47  ;;  %v2169_v48 = vmul.f32 %v4218_v32, %v1325_v57 }
 0x3bf   : > { %v5487_v15 = vpop.f32.mrf.mxu0  ;;  %v1799_v46 = vpop.f32.mrf.mxu1 }
 0x3c0   : > { %v2641_v52 = vpack.c.bf16 %v2408_v31, %v2407_v18  ;;  %v2496_v49 = vadd.f32 %v4228_v58, %v2169_v48  ;;  %v2082_v21 = vmul.f32 %v4218_v32, %v1799_v46  ;;  %3324 = vmatmul.msk.bf16.gmra.mxu3 %vm549_vm0, %v5822_v25  ;;  %v2101_v46 = vmul.f32 %v4218_v32, %v5227_v2 }
 0x3c1   : > { %v2166_v60 = vmul.f32 %v4218_v32, %v5487_v15 }
 0x3c2   : > { %2837 = vst [vmem:[%s4240_s13 + $0x38c] sm:$0xff] %v2641_v52  ;;  %v2694_v28 = vpack.c.bf16 %v2496_v49, %v2495_v11  ;;  %v2409_v4 = vadd.f32 %v4228_v58, %v2082_v21  ;;  %v2428_v53 = vadd.f32 %v4228_v58, %v2101_v46 }
 0x3c3   : > { %v1456_v8 = vpop.f32.mrf.mxu3 }
 0x3c4   : > { %2890 = vst [vmem:[%s4240_s13 + $0x4ec] sm:$0xff] %v2694_v28  ;;  %v2642_v6 = vpack.c.bf16 %v2409_v4, %v2409_v4  ;;  %v2085_v22 = vmul.f32 %v4218_v32, %v1456_v8 }
 0x3c5   : > { %v1328_v34 = vpop.f32.mrf.mxu2 }
 0x3c6   : > { %2838 = vst.msk [vmem:[%s4240_s13 + $0x394] sm:$0xf] %vm2702_vm1, %v2642_v6  ;;  %v2412_v17 = vadd.f32 %v4228_v58, %v2085_v22  ;;  %v2174_v54 = vmul.f32 %v4218_v32, %v1328_v34  ;;  %v2433_v34 = vadd.f32 %v4228_v58, %v2106_v41 }
 0x3c7   : > { %v5507_v33 = vpop.f32.mrf.mxu0  ;;  %v1802_v10 = vpop.f32.mrf.mxu1 }
 0x3c8   : > { %v2644_v51 = vpack.c.bf16 %v2413_v23, %v2412_v17  ;;  %v2501_v16 = vadd.f32 %v4228_v58, %v2174_v54  ;;  %v2087_v42 = vmul.f32 %v4218_v32, %v1802_v10  ;;  %v2171_v15 = vmul.f32 %v4218_v32, %v5507_v33 }
 0x3ca   : > { %2840 = vst [vmem:[%s4240_s13 + $0x3a0] sm:$0xff] %v2644_v51  ;;  %v2697_v5 = vpack.c.bf16 %v2501_v16, %v2500_v20  ;;  %v2414_v9 = vadd.f32 %v4228_v58, %v2087_v42  ;;  %3390 = vmatmul.msk.bf16.gmra.mxu1 %vm549_vm0, %v5822_v25  ;;  %v2096_v25 = vmul.f32 %v4218_v32, %v5205_v27 }
 0x3cb   : > { %v1458_v39 = vpop.f32.mrf.mxu3 }
 0x3cc   : > { %2893 = vst [vmem:[%s4240_s13 + $0x500] sm:$0x77] %v2697_v5  ;;  %v2645_v12 = vpack.c.bf16 %v2414_v9, %v2414_v9  ;;  %v2090_v44 = vmul.f32 %v4218_v32, %v1458_v39  ;;  %v2423_v47 = vadd.f32 %v4228_v58, %v2096_v25 }
 0x3cd   : > { %v1330_v50 = vpop.f32.mrf.mxu2 }
 0x3ce   : > { %2841 = vst.msk [vmem:[%s4240_s13 + $0x3a8] sm:$0xf] %vm2702_vm1, %v2645_v12  ;;  %v2417_v30 = vadd.f32 %v4228_v58, %v2090_v44 }
 0x3cf   : > { %v5524_v59 = vpop.f32.mrf.mxu0  ;;  %v1804_v24 = vpop.f32.mrf.mxu1 }
 0x3d0   : > { %v2647_v1 = vpack.c.bf16 %v2418_v56, %v2417_v30  ;;  %v2092_v3 = vmul.f32 %v4218_v32, %v1804_v24  ;;  %3325 = vmatmul.msk.bf16.gmra.mxu3 %vm549_vm0, %v5825_v38  ;;  %v2443_v24 = vadd.f32 %v4228_v58, %v2116_v36  ;;  %v2176_v33 = vmul.f32 %v4218_v32, %v5524_v59 }
 0x3d2   : > { %2843 = vst [vmem:[%s4240_s13 + $0x3b4] sm:$0xff] %v2647_v1  ;;  %v2419_v0 = vadd.f32 %v4228_v58, %v2092_v3 }
 0x3d3   : > { %v1461_v45 = vpop.f32.mrf.mxu3 }
 0x3d4   : > { %v2648_v14 = vpack.c.bf16 %v2419_v0, %v2419_v0  ;;  %v2095_v29 = vmul.f32 %v4218_v32, %v1461_v45 }
 0x3d6   : > { %2844 = vst.msk [vmem:[%s4240_s13 + $0x3bc] sm:$0xf] %vm2702_vm1, %v2648_v14  ;;  %v2422_v57 = vadd.f32 %v4228_v58, %v2095_v29 }
 0x3d7   : > { %v1676_v31 = vpop.f32.mrf.mxu0  ;;  %v1807_v18 = vpop.f32.mrf.mxu1 }
 0x3d8   : > { %v2650_v48 = vpack.c.bf16 %v2423_v47, %v2422_v57  ;;  %v2097_v27 = vmul.f32 %v4218_v32, %v1807_v18  ;;  %v2448_v57 = vadd.f32 %v4228_v58, %v2121_v26  ;;  %v2473_v26 = vadd.f32 %v4228_v58, %v2146_v19 }
 0x3da   : > { %2846 = vst [vmem:[%s4240_s13 + $0x3c8] sm:$0xff] %v2650_v48  ;;  %v2424_v11 = vadd.f32 %v4228_v58, %v2097_v27  ;;  %3391 = vmatmul.msk.bf16.gmra.mxu1 %vm549_vm0, %v5825_v38 }
 0x3db   : > { %v1463_v52 = vpop.f32.mrf.mxu3 }
 0x3dc   : > { %v2651_v49 = vpack.c.bf16 %v2424_v11, %v2424_v11  ;;  %v2100_v21 = vmul.f32 %v4218_v32, %v1463_v52 }
 0x3de   : > { %2847 = vst.msk [vmem:[%s4240_s13 + $0x3d0] sm:$0xf] %vm2702_vm1, %v2651_v49  ;;  %v2427_v28 = vadd.f32 %v4228_v58, %v2100_v21  ;;  %v2453_v21 = vadd.f32 %v4228_v58, %v2126_v55 }
 0x3df   : > { %v1809_v4 = vpop.f32.mrf.mxu1 }
 0x3e0   : > { %v2653_v2 = vpack.c.bf16 %v2428_v53, %v2427_v28  ;;  %v2102_v8 = vmul.f32 %v4218_v32, %v1809_v4 }
 0x3e2   : > { %2849 = vst [vmem:[%s4240_s13 + $0x3dc] sm:$0xff] %v2653_v2  ;;  %v2429_v38 = vadd.f32 %v4228_v58, %v2102_v8 }
 0x3e3   : > { %v1466_v13 = vpop.f32.mrf.mxu3 }
 0x3e4   : > { %v2654_v6 = vpack.c.bf16 %v2429_v38, %v2429_v38  ;;  %v2105_v22 = vmul.f32 %v4218_v32, %v1466_v13 }
 0x3e6   : > { %2850 = vst.msk [vmem:[%s4240_s13 + $0x3e4] sm:$0xf] %vm2702_vm1, %v2654_v6  ;;  %v2432_v23 = vadd.f32 %v4228_v58, %v2105_v22  ;;  %v2458_v6 = vadd.f32 %v4228_v58, %v2131_v37 }
 0x3e7   : > { %v1812_v17 = vpop.f32.mrf.mxu1 }
 0x3e8   : > { %v2656_v54 = vpack.c.bf16 %v2433_v34, %v2432_v23  ;;  %v2107_v10 = vmul.f32 %v4218_v32, %v1812_v17 }
 0x3ea   : > { %2852 = vst [vmem:[%s4240_s13 + $0x3f0] sm:$0xff] %v2656_v54  ;;  %v2434_v20 = vadd.f32 %v4228_v58, %v2107_v10 }
 0x3eb   : > { %v1468_v51 = vpop.f32.mrf.mxu3 }
 0x3ec   : > { %v2657_v16 = vpack.c.bf16 %v2434_v20, %v2434_v20  ;;  %v2110_v42 = vmul.f32 %v4218_v32, %v1468_v51  ;;  %v2463_v51 = vadd.f32 %v4228_v58, %v2136_v61 }
 0x3ee   : > { %2853 = vst.msk [vmem:[%s4240_s13 + $0x3f8] sm:$0xf] %vm2702_vm1, %v2657_v16  ;;  %v2437_v5 = vadd.f32 %v4228_v58, %v2110_v42 }
 0x3ef   : > { %v1814_v9 = vpop.f32.mrf.mxu1 }
 0x3f0   : > { %v2659_v39 = vpack.c.bf16 %v2438_v43, %v2437_v5  ;;  %v2112_v12 = vmul.f32 %v4218_v32, %v1814_v9 }
 0x3f2   : > { %2855 = vst [vmem:[%s4240_s13 + $0x404] sm:$0xff] %v2659_v39  ;;  %v2439_v44 = vadd.f32 %v4228_v58, %v2112_v12 }
 0x3f3   : > { %v1471_v50 = vpop.f32.mrf.mxu3 }
 0x3f4   : > { %v2660_v56 = vpack.c.bf16 %v2439_v44, %v2439_v44  ;;  %v2115_v30 = vmul.f32 %v4218_v32, %v1471_v50  ;;  %v2468_v44 = vadd.f32 %v4228_v58, %v2141_v40 }
 0x3f6   : > { %2856 = vst.msk [vmem:[%s4240_s13 + $0x40c] sm:$0xf] %vm2702_vm1, %v2660_v56  ;;  %v2442_v1 = vadd.f32 %v4228_v58, %v2115_v30 }
 0x3f7   : > { %v1817_v3 = vpop.f32.mrf.mxu1 }
 0x3f8   : > { %v2662_v25 = vpack.c.bf16 %v2443_v24, %v2442_v1  ;;  %v2117_v0 = vmul.f32 %v4218_v32, %v1817_v3 }
 0x3fa   : > { %2858 = vst [vmem:[%s4240_s13 + $0x418] sm:$0xff] %v2662_v25  ;;  %v2444_v45 = vadd.f32 %v4228_v58, %v2117_v0 }
 0x3fb   : > { %v1473_v14 = vpop.f32.mrf.mxu3 }
 0x3fc   : > { %v2663_v29 = vpack.c.bf16 %v2444_v45, %v2444_v45  ;;  %v2120_v47 = vmul.f32 %v4218_v32, %v1473_v14 }
 0x3fe   : > { %2859 = vst.msk [vmem:[%s4240_s13 + $0x420] sm:$0xf] %vm2702_vm1, %v2663_v29  ;;  %v2447_v31 = vadd.f32 %v4228_v58, %v2120_v47 }
 0x3ff   : > { %v1819_v18 = vpop.f32.mrf.mxu1 }
 0x400   : > { %v2665_v48 = vpack.c.bf16 %v2448_v57, %v2447_v31  ;;  %v2122_v27 = vmul.f32 %v4218_v32, %v1819_v18 }
 0x402   : > { %2861 = vst [vmem:[%s4240_s13 + $0x42c] sm:$0xff] %v2665_v48  ;;  %v2449_v46 = vadd.f32 %v4228_v58, %v2122_v27  ;;  %v2478_v27 = vadd.f32 %v4228_v58, %v2151_v7 }
 0x403   : > { %v1476_v11 = vpop.f32.mrf.mxu3 }
 0x404   : > { %v2666_v52 = vpack.c.bf16 %v2449_v46, %v2449_v46  ;;  %v2125_v49 = vmul.f32 %v4218_v32, %v1476_v11 }
 0x406   : > { %2862 = vst.msk [vmem:[%s4240_s13 + $0x434] sm:$0xf] %vm2702_vm1, %v2666_v52  ;;  %v2452_v53 = vadd.f32 %v4228_v58, %v2125_v49 }
 0x407   : > { %v1822_v28 = vpop.f32.mrf.mxu1 }
 0x408   : > { %v2668_v4 = vpack.c.bf16 %v2453_v21, %v2452_v53  ;;  %v2127_v2 = vmul.f32 %v4218_v32, %v1822_v28 }
 0x40a   : > { %2864 = vst [vmem:[%s4240_s13 + $0x440] sm:$0xff] %v2668_v4  ;;  %v2454_v8 = vadd.f32 %v4228_v58, %v2127_v2  ;;  %v2483_v4 = vadd.f32 %v4228_v58, %v2156_v62 }
 0x40b   : > { %v1478_v41 = vpop.f32.mrf.mxu3 }
 0x40c   : > { %v2669_v38 = vpack.c.bf16 %v2454_v8, %v2454_v8  ;;  %v2130_v13 = vmul.f32 %v4218_v32, %v1478_v41 }
 0x40e   : > { %2865 = vst.msk [vmem:[%s4240_s13 + $0x448] sm:$0xf] %vm2702_vm1, %v2669_v38  ;;  %v2457_v22 = vadd.f32 %v4228_v58, %v2130_v13 }
 0x40f   : > { %v1824_v34 = vpop.f32.mrf.mxu1 }
 0x410   : > { %v2671_v23 = vpack.c.bf16 %v2458_v6, %v2457_v22  ;;  %v2132_v17 = vmul.f32 %v4218_v32, %v1824_v34  ;;  %v2488_v34 = vadd.f32 %v4228_v58, %v2161_v63 }
 0x412   : > { %2867 = vst [vmem:[%s4240_s13 + $0x454] sm:$0xff] %v2671_v23  ;;  %v2459_v54 = vadd.f32 %v4228_v58, %v2132_v17 }
 0x413   : > { %v1481_v10 = vpop.f32.mrf.mxu3 }
 0x414   : > { %v2672_v35 = vpack.c.bf16 %v2459_v54, %v2459_v54  ;;  %v2135_v20 = vmul.f32 %v4218_v32, %v1481_v10 }
 0x416   : > { %2868 = vst.msk [vmem:[%s4240_s13 + $0x45c] sm:$0xf] %vm2702_vm1, %v2672_v35  ;;  %v2462_v16 = vadd.f32 %v4228_v58, %v2135_v20 }
 0x417   : > { %v1827_v42 = vpop.f32.mrf.mxu1 }
 0x418   : > { %v2674_v43 = vpack.c.bf16 %v2463_v51, %v2462_v16  ;;  %v2137_v5 = vmul.f32 %v4218_v32, %v1827_v42  ;;  %v2493_v16 = vadd.f32 %v4228_v58, %v2166_v60 }
 0x41a   : > { %2870 = vst [vmem:[%s4240_s13 + $0x468] sm:$0xff] %v2674_v43  ;;  %v2464_v9 = vadd.f32 %v4228_v58, %v2137_v5 }
 0x41b   : > { %v1483_v39 = vpop.f32.mrf.mxu3 }
 0x41c   : > { %v2675_v12 = vpack.c.bf16 %v2464_v9, %v2464_v9  ;;  %v2140_v36 = vmul.f32 %v4218_v32, %v1483_v39 }
 0x41e   : > { %2871 = vst.msk [vmem:[%s4240_s13 + $0x470] sm:$0xf] %vm2702_vm1, %v2675_v12  ;;  %v2467_v50 = vadd.f32 %v4228_v58, %v2140_v36 }
 0x41f   : > { %v1829_v56 = vpop.f32.mrf.mxu1 }
 0x420   : > { %v2677_v30 = vpack.c.bf16 %v2468_v44, %v2467_v50  ;;  %v2142_v24 = vmul.f32 %v4218_v32, %v1829_v56  ;;  %v2498_v44 = vadd.f32 %v4228_v58, %v2171_v15 }
 0x422   : > { %2873 = vst [vmem:[%s4240_s13 + $0x47c] sm:$0xff] %v2677_v30  ;;  %v2469_v1 = vadd.f32 %v4228_v58, %v2142_v24 }
 0x423   : > { %v1486_v3 = vpop.f32.mrf.mxu3 }
 0x424   : > { %v2678_v25 = vpack.c.bf16 %v2469_v1, %v2469_v1  ;;  %v2145_v0 = vmul.f32 %v4218_v32, %v1486_v3 }
 0x426   : > { %2874 = vst.msk [vmem:[%s4240_s13 + $0x484] sm:$0xf] %vm2702_vm1, %v2678_v25  ;;  %v2472_v45 = vadd.f32 %v4228_v58, %v2145_v0  ;;  %v2503_v0 = vadd.f32 %v4228_v58, %v2176_v33 }
 0x427   : > { %v1832_v14 = vpop.f32.mrf.mxu1 }
 0x428   : > { %v2680_v29 = vpack.c.bf16 %v2473_v26, %v2472_v45  ;;  %v2147_v47 = vmul.f32 %v4218_v32, %v1832_v14 }
 0x42a   : > { %2876 = vst [vmem:[%s4240_s13 + $0x490] sm:$0xff] %v2680_v29  ;;  %v2474_v57 = vadd.f32 %v4228_v58, %v2147_v47 }
 0x42b   : > { %v1488_v31 = vpop.f32.mrf.mxu3 }
 0x42c   : > { %v2681_v18 = vpack.c.bf16 %v2474_v57, %v2474_v57  ;;  %v2150_v48 = vmul.f32 %v4218_v32, %v1488_v31 }
 0x42e   : > { %2877 = vst.msk [vmem:[%s4240_s13 + $0x498] sm:$0xf] %vm2702_vm1, %v2681_v18  ;;  %v2477_v55 = vadd.f32 %v4228_v58, %v2150_v48 }
 0x42f   : > { %v1834_v46 = vpop.f32.mrf.mxu1 }
 0x430   : > { %v2683_v11 = vpack.c.bf16 %v2478_v27, %v2477_v55  ;;  %v2152_v52 = vmul.f32 %v4218_v32, %v1834_v46 }
 0x432   : > { %2879 = vst [vmem:[%s4240_s13 + $0x4a4] sm:$0xff] %v2683_v11  ;;  %v2479_v49 = vadd.f32 %v4228_v58, %v2152_v52 }
 0x433   : > { %v1491_v21 = vpop.f32.mrf.mxu3 }
 0x434   : > { %v2684_v53 = vpack.c.bf16 %v2479_v49, %v2479_v49  ;;  %v2155_v28 = vmul.f32 %v4218_v32, %v1491_v21 }
 0x436   : > { %2880 = vst.msk [vmem:[%s4240_s13 + $0x4ac] sm:$0xf] %vm2702_vm1, %v2684_v53  ;;  %v2482_v2 = vadd.f32 %v4228_v58, %v2155_v28 }
 0x437   : > { %v1837_v37 = vpop.f32.mrf.mxu1 }
 0x438   : > { %v2686_v8 = vpack.c.bf16 %v2483_v4, %v2482_v2  ;;  %v2157_v41 = vmul.f32 %v4218_v32, %v1837_v37 }
 0x43a   : > { %2882 = vst [vmem:[%s4240_s13 + $0x4b8] sm:$0xff] %v2686_v8  ;;  %v2484_v38 = vadd.f32 %v4228_v58, %v2157_v41 }
 0x43b   : > { %v1493_v13 = vpop.f32.mrf.mxu3 }
 0x43c   : > { %v2687_v6 = vpack.c.bf16 %v2484_v38, %v2484_v38  ;;  %v2160_v22 = vmul.f32 %v4218_v32, %v1493_v13 }
 0x43e   : > { %2883 = vst.msk [vmem:[%s4240_s13 + $0x4c0] sm:$0xf] %vm2702_vm1, %v2687_v6  ;;  %v2487_v23 = vadd.f32 %v4228_v58, %v2160_v22 }
 0x43f   : > { %v1839_v17 = vpop.f32.mrf.mxu1 }
 0x440   : > { %v2689_v61 = vpack.c.bf16 %v2488_v34, %v2487_v23  ;;  %v2162_v54 = vmul.f32 %v4218_v32, %v1839_v17 }
 0x442   : > { %2885 = vst [vmem:[%s4240_s13 + $0x4cc] sm:$0xff] %v2689_v61  ;;  %v2489_v10 = vadd.f32 %v4228_v58, %v2162_v54 }
 0x443   : > { %v1496_v35 = vpop.f32.mrf.mxu3 }
 0x444   : > { %v2690_v20 = vpack.c.bf16 %v2489_v10, %v2489_v10  ;;  %v2165_v51 = vmul.f32 %v4218_v32, %v1496_v35 }
 0x446   : > { %2886 = vst.msk [vmem:[%s4240_s13 + $0x4d4] sm:$0xf] %vm2702_vm1, %v2690_v20  ;;  %v2492_v42 = vadd.f32 %v4228_v58, %v2165_v51 }
 0x447   : > { %v1842_v43 = vpop.f32.mrf.mxu1 }
 0x448   : > { %v2692_v5 = vpack.c.bf16 %v2493_v16, %v2492_v42  ;;  %v2167_v40 = vmul.f32 %v4218_v32, %v1842_v43 }
 0x44a   : > { %2888 = vst [vmem:[%s4240_s13 + $0x4e0] sm:$0xff] %v2692_v5  ;;  %v2494_v9 = vadd.f32 %v4228_v58, %v2167_v40 }
 0x44b   : > { %v1498_v39 = vpop.f32.mrf.mxu3 }
 0x44c   : > { %v2693_v12 = vpack.c.bf16 %v2494_v9, %v2494_v9  ;;  %v2170_v36 = vmul.f32 %v4218_v32, %v1498_v39 }
 0x44e   : > { %2889 = vst.msk [vmem:[%s4240_s13 + $0x4e8] sm:$0xf] %vm2702_vm1, %v2693_v12  ;;  %v2497_v50 = vadd.f32 %v4228_v58, %v2170_v36 }
 0x44f   : > { %v1844_v56 = vpop.f32.mrf.mxu1 }
 0x450   : > { %v2695_v30 = vpack.c.bf16 %v2498_v44, %v2497_v50  ;;  %v2172_v24 = vmul.f32 %v4218_v32, %v1844_v56 }
 0x452   : > { %2891 = vst [vmem:[%s4240_s13 + $0x4f4] sm:$0xff] %v2695_v30  ;;  %v2499_v19 = vadd.f32 %v4228_v58, %v2172_v24 }
 0x453   : > { %v1501_v1 = vpop.f32.mrf.mxu3 }
 0x454   : > { %v2696_v3 = vpack.c.bf16 %v2499_v19, %v2499_v19  ;;  %v2175_v25 = vmul.f32 %v4218_v32, %v1501_v1 }
 0x456   : > { %2892 = vst.msk [vmem:[%s4240_s13 + $0x4fc] sm:$0xf] %vm2702_vm1, %v2696_v3  ;;  %v2502_v26 = vadd.f32 %v4228_v58, %v2175_v25 }
 0x457   : > { %v1847_v45 = vpop.f32.mrf.mxu1 }
 0x458   : > { %v2698_v14 = vpack.c.bf16 %v2503_v0, %v2502_v26  ;;  %v2177_v29 = vmul.f32 %v4218_v32, %v1847_v45 }
 0x45a   : > { %2894 = vst [vmem:[%s4240_s13 + $0x508] sm:$0x77] %v2698_v14  ;;  %v2504_v59 = vadd.f32 %v4228_v58, %v2177_v29 }
 0x45b   : > { %v1503_v47 = vpop.f32.mrf.mxu3 }
 0x45c   : > { %v2699_v7 = vpack.c.bf16 %v2504_v59, %v2504_v59 }
 0x45e   : > { %2896 = vst.msk [vmem:[%s4240_s13 + $0x510] sm:$0x7] %vm2895_vm2, %v2699_v7 }
 0x45f   : > { %v1849_v57 = vpop.f32.mrf.mxu1 }
 0x460 PF: > { %s5843_s14 = sld [smem:[#allocation14_spill]]  ;;  %s5846_s18 = smov %s3686_s19 }
 0x461   : > { %s5844_s15 = sld [smem:[#allocation15_spill]]  ;;  %s5847_s19 = smov %s3690_s20 }
 0x462   : > { %s5845_s16 = sld [smem:[#allocation16_spill]]  ;;  %s5848_s20 = smov %s3838_s17 }
 0x463   : > { %s5849_s21 = smov %s3702_s23  ;;  %s5850_s22 = smov %s3706_s24 }
 0x466   : > { %s21_s25 = sadd.s32 1, %s5843_s14  }
 0x467   : > { %p18_p4 = scmp.ge.s32.totalorder %s21_s25, 8   ;;  %s5851_s23 = smov %s5844_s15 }
 0x468   : > { %s5852_s24 = smov %s5845_s16 }
 0x469   :  { %20 = sbr.rel (!%p18_p4) target bundleno = 12 (0xc), region = 93 }
 0x46e   :  { %2926 = vsyncpa [#allocation3], 1 }
 0x46f   :  { %2928 = vsyncpa [#allocation3 + $0x1], 1 }
 0x470   :  { %2929 = vsyncpa [#allocation9], 1 }
 0x471   :  { %2930 = vsyncpa [#allocation4], 1 }
 0x472   :  { %2932 = vsyncpa [#allocation4 + $0x1], 1 }
 0x473   :  { %2933 = vsyncpa [#allocation6], 1 }

</bundles_post_ra>
